<compile_context>
chip_gen: v6e
topology: v6e:2x2x1
jax: 0.10.0
libtpu: 0.0.40
codegen_flags: <defaults>
</compile_context>

<pallas_src>
import functools

import numpy as np
import jax
import jax.numpy as jnp
from jax import lax
from jax.experimental import pallas as pl
from jax.experimental.pallas import tpu as pltpu

_LANE = 128
_ROW_GRAN = 64  # row granularity: multiple of the sublane tile for f32 (8) and bf16 (16)


def _ss_argmin_kernel(x_ref, w_ref, o_ref, *, d_min, D):
    # x_ref: (TILE_ROWS, D) block of logits (any float dtype), D on the lane axis.
    # w_ref: (2D, 128) bf16 constant, columns [ones, hi(d), lo(d), 0...] stacked twice
    #        along K (for the exact hi/lo bf16 split of e). Resident across grid steps.
    x = x_ref[...].astype(jnp.float32)                        # (TR, D)

    # ---- unnormalized softmax numerator: e = exp(x - rowmax)  =>  max(e) == 1 exactly
    m = jnp.max(x, axis=-1, keepdims=True)                    # (TR, 1)  XLU lane-reduce
    e = jnp.exp(x - m)                                        # EUP

    # ---- row sums on the (otherwise idle) MXU ---------------------------------------
    # f32-accurate matmul through the bf16 MXU path via an exact hi/lo split of e,
    # fused into a single K=2D contraction (one MXU push per result tile).
    e_hi = e.astype(jnp.bfloat16)
    e_lo = (e - e_hi.astype(jnp.float32)).astype(jnp.bfloat16)
    e2 = jnp.concatenate([e_hi, e_lo], axis=-1)               # (TR, 2D) lane concat ~free
    sums = jnp.dot(e2, w_ref[...], preferred_element_type=jnp.float32)   # (TR, 128)
    s = sums[:, 0:1]                                          # sum_d e
    wsum = sums[:, 1:2] + sums[:, 2:3]                        # sum_d e * d

    r = pl.reciprocal(s, approx=True)                         # EUP
    r = r * (2.0 - s * r)                                     # one Newton step -> ~f32 exact
    disparity = d_min + wsum * r                              # (TR, 1)

    # ---- top-5 confidence masks -----------------------------------------------------
    # Exact max+argmax emulation (first-occurrence tie-break, matching lax.top_k).
    # jnp.argmax is intentionally not used: its lowering is not guaranteed in Mosaic.
    col = lax.broadcasted_iota(jnp.int32, e.shape, 1)
    # iteration 0: top-1 of e is exactly 1; its (first-occurrence) index comes straight
    # from x >= rowmax -- no extra value reduction needed.
    a0 = jnp.min(jnp.where(x >= m, col, D), axis=-1, keepdims=True)
    v_sum = jnp.ones_like(s)                                  # top-1 value of e == 1
    min_idx = a0
    max_idx = a0
    work = jnp.where(col == a0, -1.0, e)                      # e >= 0, so -1 is a safe sentinel
    for t in range(4):                                        # top-2 .. top-5 (exact)
        vmax = jnp.max(work, axis=-1, keepdims=True)
        amax = jnp.min(jnp.where(work == vmax, col, D), axis=-1, keepdims=True)
        v_sum = v_sum + vmax
        min_idx = jnp.minimum(min_idx, amax)
        max_idx = jnp.maximum(max_idx, amax)
        if t < 3:                                             # final knockout would be dead work
            work = jnp.where(col == amax, -1.0, work)

    # thresholds rescaled by s instead of normalizing the whole slab:
    mask_1 = 0.7 * s < 1.0                                    # top-1 prob  > 0.7
    # NB: the torch source uses undefined `v_s`; read as v_sum (sum of top-5 probs).
    mask_2 = v_sum > 0.7 * s                                  # top-5 sum   > 0.7
    mask_3 = (max_idx - min_idx) < 6
    keep = jnp.logical_or(mask_1, jnp.logical_and(mask_2, mask_3))
    o_ref[...] = jnp.where(keep, disparity, 0.0).astype(o_ref.dtype)


def _mxu_weights(D):
    """(2D, 128) bf16 constant: cols [ones, hi(d), lo(d), 0...], stacked twice along K."""
    d = np.arange(D, dtype=np.float64)
    w = np.zeros((D, _LANE), dtype=np.float32)
    w[:, 0] = 1.0
    w[:, 1] = np.floor(d / 256.0) * 256.0     # hi(d): multiple of 256, exact in bf16
    w[:, 2] = np.mod(d, 256.0)                # lo(d): integer < 256, exact in bf16
    return jnp.asarray(np.concatenate([w, w], axis=0), dtype=jnp.bfloat16)


def ss_argmin(x, d_min, d_max, *, tile_rows=4096):
    """Pallas implementation of ss_argmin.forward(x, min, max)."""
    D = x.shape[-1]
    assert D == int(d_max) - int(d_min) + 1, "last dim must equal max - min + 1"
    assert D >= 5, "top-5 selection requires at least 5 disparity bins"
    lead = x.shape[:-1]
    N = int(np.prod(lead)) if lead else 1
    x2 = x.reshape(N, D)
    itemsize = np.dtype(x.dtype).itemsize

    # Generation-aware VMEM budget (128 MiB on v5e/v6e, 64 MiB on v7x).
    try:
        vmem_cap = int(getattr(pltpu.get_tpu_info(), "vmem_capacity_bytes", 64 * 2**20))
    except Exception:
        vmem_cap = 64 * 2**20
    vmem_limit = int(min(vmem_cap * 3 // 4, 96 * 2**20))

    # Tile selection: ~10 tile-sized f32 intermediates + double-buffered input block must
    # stay within ~2/3 of the scoped VMEM limit; never exceed what N actually needs.
    per_row_bytes = D * (10 * 4 + 2 * itemsize)
    hw_rows = max(_ROW_GRAN, (vmem_limit * 2 // 3) // per_row_bytes)
    need_rows = -(-N // _ROW_GRAN) * _ROW_GRAN
    tr = min(int(tile_rows), int(hw_rows), int(need_rows))
    tr = max(_ROW_GRAN, (tr // _ROW_GRAN) * _ROW_GRAN)
    if N > _ROW_GRAN:
        # Keep at least two grid steps so both v7x TensorCores get work under "parallel".
        half = -(-((N + 1) // 2) // _ROW_GRAN) * _ROW_GRAN
        tr = max(_ROW_GRAN, min(tr, half))
    num_tiles = (N + tr - 1) // tr            # last block may run ragged: no host-side pad

    w2 = _mxu_weights(D)

    cost = pl.CostEstimate(
        flops=int(2 * N * (2 * D) * _LANE + 40 * N * D),
        transcendentals=int(N * D + N),
        bytes_accessed=int(N * D * itemsize + N * 4 + 2 * D * _LANE * 2),
    )

    out = pl.pallas_call(
        functools.partial(_ss_argmin_kernel, d_min=float(d_min), D=D),
        out_shape=jax.ShapeDtypeStruct((N, 1), jnp.float32),
        grid_spec=pltpu.PrefetchScalarGridSpec(
            num_scalar_prefetch=0,
            grid=(num_tiles,),
            in_specs=[pl.BlockSpec((tr, D), lambda i: (i, 0)),
                      pl.BlockSpec((2 * D, _LANE), lambda i: (0, 0))],  # constant -> resident
            out_specs=pl.BlockSpec((tr, 1), lambda i: (i, 0)),
        ),
        compiler_params=pltpu.CompilerParams(
            dimension_semantics=("parallel",),
            vmem_limit_bytes=vmem_limit,
        ),
        cost_estimate=cost,
    )(x2, w2)
    return out[:, 0].reshape(lead)


def ss_argmin_ref(x, d_min, d_max):
    """Pure-JAX reference matching the torch semantics."""
    p = jax.nn.softmax(x.astype(jnp.float32), axis=-1)
    D = x.shape[-1]
    idx = d_min + jnp.arange(D, dtype=jnp.float32)
    disparity = jnp.sum(p * idx, axis=-1)
    v1 = jnp.max(p, axis=-1)
    mask_1 = (v1 > 0.7).astype(jnp.float32)
    v5, i5 = lax.top_k(p, 5)
    v_sum = jnp.sum(v5, axis=-1)
    mask_2 = (v_sum > 0.7).astype(jnp.float32)
    i_dis = jnp.max(i5, axis=-1) - jnp.min(i5, axis=-1)
    mask_3 = (i_dis < 6).astype(jnp.float32)
    mask = mask_1 + mask_2 * mask_3
    mask = (mask > 0).astype(jnp.float32)
    return disparity * mask


if __name__ == "__main__":
    key = jax.random.PRNGKey(0)
    k1, k2 = jax.random.split(key)

    d_min, d_max = 0, 127
    D = d_max - d_min + 1

    # Primary check: f32 cost volume, multi-tile grid (exercises the >=2 tile split).
    B, H, W = 2, 8, 16
    x = 5.0 * jax.random.normal(k1, (B, H, W, D), dtype=jnp.float32)
    out = jax.block_until_ready(ss_argmin(x, d_min, d_max))
    ref = ss_argmin_ref(x, d_min, d_max)
    np.testing.assert_allclose(np.asarray(out), np.asarray(ref), rtol=1e-4, atol=1e-4)

    # Secondary check: bf16 ingestion + non-divisible row count (exercises the ragged
    # last block -- no host-side pad anymore -- with a small forced tile size).
    xb = (5.0 * jax.random.normal(k2, (1, 7, 9, D), dtype=jnp.float32)).astype(jnp.bfloat16)
    out_b = jax.block_until_ready(ss_argmin(xb, d_min, d_max, tile_rows=64))
    ref_b = ss_argmin_ref(xb, d_min, d_max)
    np.testing.assert_allclose(np.asarray(out_b), np.asarray(ref_b), rtol=1e-4, atol=1e-4)

    print("KERNEL_OK")
</pallas_src>

<mosaic_0001>
module attributes {stable_mosaic.version = 11 : i64} {
  func.func @_ss_argmin_kernel(%arg0: i32, %arg1: memref<128x128xf32, #tpu.memory_space<vmem>>, %arg2: memref<256x128xbf16, #tpu.memory_space<vmem>>, %arg3: memref<128x1xf32, #tpu.memory_space<vmem>>) attributes {dimension_semantics = [#tpu.dimension_semantics<parallel>], iteration_bounds = array<i64: 2>, scalar_prefetch = 0 : i64, scratch_operands = 0 : i64, tpu.core_type = #tpu.core_type<tc>, window_params = [{transform_indices = @transform_0, window_bounds = array<i64: 128, 128>}, {pipeline_mode = #tpu.pipeline_mode<synchronous>, transform_indices = @transform_1, window_bounds = array<i64: 256, 128>}, {transform_indices = @transform_2, window_bounds = array<i64: 128, 1>}]} {
    %c0 = arith.constant 0 : index
    %c0_0 = arith.constant 0 : index
    %0 = vector.load %arg1[%c0, %c0_0] : memref<128x128xf32, #tpu.memory_space<vmem>>, vector<128x128xf32>
    %cst = arith.constant dense<0xFF800000> : vector<128xf32>
    %1 = vector.multi_reduction <maximumf>, %0, %cst [1] : vector<128x128xf32> to vector<128xf32>
    %2 = vector.shape_cast %1 : vector<128xf32> to vector<128x1xf32>
    %3 = vector.broadcast %2 : vector<128x1xf32> to vector<128x128xf32>
    %4 = arith.subf %0, %3 : vector<128x128xf32>
    %5 = math.exp %4 : vector<128x128xf32>
    %6 = arith.truncf %5 : vector<128x128xf32> to vector<128x128xbf16>
    %7 = arith.extf %6 : vector<128x128xbf16> to vector<128x128xf32>
    %8 = arith.subf %5, %7 : vector<128x128xf32>
    %9 = arith.truncf %8 : vector<128x128xf32> to vector<128x128xbf16>
    %10 = tpu.concatenate %6, %9 in 1 : vector<128x128xbf16>, vector<128x128xbf16> -> vector<128x256xbf16>
    %c0_1 = arith.constant 0 : index
    %c0_2 = arith.constant 0 : index
    %11 = vector.load %arg2[%c0_1, %c0_2] : memref<256x128xbf16, #tpu.memory_space<vmem>>, vector<256x128xbf16>
    %cst_3 = arith.constant dense<0.000000e+00> : vector<128x128xf32>
    %12 = tpu.matmul %10, %11, %cst_3 {dimension_numbers = #tpu.dot_dimension_numbers<[1], [0], [0], [1], [0, 0, 1, 1], [], []>} : vector<128x256xbf16>, vector<256x128xbf16>, vector<128x128xf32> -> vector<128x128xf32>
    %13 = vector.extract_strided_slice %12 {offsets = [0, 0], sizes = [128, 1], strides = [1, 1]} : vector<128x128xf32> to vector<128x1xf32>
    %14 = vector.extract_strided_slice %12 {offsets = [0, 1], sizes = [128, 1], strides = [1, 1]} : vector<128x128xf32> to vector<128x1xf32>
    %15 = vector.extract_strided_slice %12 {offsets = [0, 2], sizes = [128, 1], strides = [1, 1]} : vector<128x128xf32> to vector<128x1xf32>
    %16 = arith.addf %14, %15 : vector<128x1xf32>
    %17 = tpu.reciprocal %13 {approx = true} : vector<128x1xf32> -> vector<128x1xf32>
    %18 = arith.mulf %13, %17 : vector<128x1xf32>
    %cst_4 = arith.constant 2.000000e+00 : f32
    %19 = vector.broadcast %cst_4 : f32 to vector<128x1xf32>
    %20 = arith.subf %19, %18 : vector<128x1xf32>
    %21 = arith.mulf %17, %20 : vector<128x1xf32>
    %22 = arith.mulf %16, %21 : vector<128x1xf32>
    %cst_5 = arith.constant 0.000000e+00 : f32
    %23 = vector.broadcast %cst_5 : f32 to vector<128x1xf32>
    %24 = arith.addf %23, %22 : vector<128x1xf32>
    %25 = tpu.iota {dimensions = array<i32: 1>} : vector<128x128xi32>
    %26 = vector.broadcast %2 : vector<128x1xf32> to vector<128x128xf32>
    %27 = arith.cmpf oge, %0, %26 : vector<128x128xf32>
    %c128_i32 = arith.constant 128 : i32
    %28 = vector.broadcast %c128_i32 : i32 to vector<128x128xi32>
    %29 = arith.select %27, %25, %28 : vector<128x128xi1>, vector<128x128xi32>
    %cst_6 = arith.constant dense<2147483647> : vector<128xi32>
    %30 = vector.multi_reduction <minsi>, %29, %cst_6 [1] : vector<128x128xi32> to vector<128xi32>
    %31 = vector.shape_cast %30 : vector<128xi32> to vector<128x1xi32>
    %cst_7 = arith.constant 1.000000e+00 : f32
    %32 = vector.broadcast %cst_7 : f32 to vector<128x1xf32>
    %33 = vector.broadcast %31 : vector<128x1xi32> to vector<128x128xi32>
    %34 = arith.cmpi eq, %25, %33 : vector<128x128xi32>
    %cst_8 = arith.constant -1.000000e+00 : f32
    %35 = vector.broadcast %cst_8 : f32 to vector<128x128xf32>
    %36 = arith.select %34, %35, %5 : vector<128x128xi1>, vector<128x128xf32>
    %cst_9 = arith.constant dense<0xFF800000> : vector<128xf32>
    %37 = vector.multi_reduction <maximumf>, %36, %cst_9 [1] : vector<128x128xf32> to vector<128xf32>
    %38 = vector.shape_cast %37 : vector<128xf32> to vector<128x1xf32>
    %39 = vector.broadcast %38 : vector<128x1xf32> to vector<128x128xf32>
    %40 = arith.cmpf oeq, %36, %39 : vector<128x128xf32>
    %c128_i32_10 = arith.constant 128 : i32
    %41 = vector.broadcast %c128_i32_10 : i32 to vector<128x128xi32>
    %42 = arith.select %40, %25, %41 : vector<128x128xi1>, vector<128x128xi32>
    %cst_11 = arith.constant dense<2147483647> : vector<128xi32>
    %43 = vector.multi_reduction <minsi>, %42, %cst_11 [1] : vector<128x128xi32> to vector<128xi32>
    %44 = vector.shape_cast %43 : vector<128xi32> to vector<128x1xi32>
    %45 = arith.addf %32, %38 : vector<128x1xf32>
    %46 = arith.minsi %31, %44 : vector<128x1xi32>
    %47 = arith.maxsi %31, %44 : vector<128x1xi32>
    %48 = vector.broadcast %44 : vector<128x1xi32> to vector<128x128xi32>
    %49 = arith.cmpi eq, %25, %48 : vector<128x128xi32>
    %cst_12 = arith.constant -1.000000e+00 : f32
    %50 = vector.broadcast %cst_12 : f32 to vector<128x128xf32>
    %51 = arith.select %49, %50, %36 : vector<128x128xi1>, vector<128x128xf32>
    %cst_13 = arith.constant dense<0xFF800000> : vector<128xf32>
    %52 = vector.multi_reduction <maximumf>, %51, %cst_13 [1] : vector<128x128xf32> to vector<128xf32>
    %53 = vector.shape_cast %52 : vector<128xf32> to vector<128x1xf32>
    %54 = vector.broadcast %53 : vector<128x1xf32> to vector<128x128xf32>
    %55 = arith.cmpf oeq, %51, %54 : vector<128x128xf32>
    %c128_i32_14 = arith.constant 128 : i32
    %56 = vector.broadcast %c128_i32_14 : i32 to vector<128x128xi32>
    %57 = arith.select %55, %25, %56 : vector<128x128xi1>, vector<128x128xi32>
    %cst_15 = arith.constant dense<2147483647> : vector<128xi32>
    %58 = vector.multi_reduction <minsi>, %57, %cst_15 [1] : vector<128x128xi32> to vector<128xi32>
    %59 = vector.shape_cast %58 : vector<128xi32> to vector<128x1xi32>
    %60 = arith.addf %45, %53 : vector<128x1xf32>
    %61 = arith.minsi %46, %59 : vector<128x1xi32>
    %62 = arith.maxsi %47, %59 : vector<128x1xi32>
    %63 = vector.broadcast %59 : vector<128x1xi32> to vector<128x128xi32>
    %64 = arith.cmpi eq, %25, %63 : vector<128x128xi32>
    %cst_16 = arith.constant -1.000000e+00 : f32
    %65 = vector.broadcast %cst_16 : f32 to vector<128x128xf32>
    %66 = arith.select %64, %65, %51 : vector<128x128xi1>, vector<128x128xf32>
    %cst_17 = arith.constant dense<0xFF800000> : vector<128xf32>
    %67 = vector.multi_reduction <maximumf>, %66, %cst_17 [1] : vector<128x128xf32> to vector<128xf32>
    %68 = vector.shape_cast %67 : vector<128xf32> to vector<128x1xf32>
    %69 = vector.broadcast %68 : vector<128x1xf32> to vector<128x128xf32>
    %70 = arith.cmpf oeq, %66, %69 : vector<128x128xf32>
    %c128_i32_18 = arith.constant 128 : i32
    %71 = vector.broadcast %c128_i32_18 : i32 to vector<128x128xi32>
    %72 = arith.select %70, %25, %71 : vector<128x128xi1>, vector<128x128xi32>
    %cst_19 = arith.constant dense<2147483647> : vector<128xi32>
    %73 = vector.multi_reduction <minsi>, %72, %cst_19 [1] : vector<128x128xi32> to vector<128xi32>
    %74 = vector.shape_cast %73 : vector<128xi32> to vector<128x1xi32>
    %75 = arith.addf %60, %68 : vector<128x1xf32>
    %76 = arith.minsi %61, %74 : vector<128x1xi32>
    %77 = arith.maxsi %62, %74 : vector<128x1xi32>
    %78 = vector.broadcast %74 : vector<128x1xi32> to vector<128x128xi32>
    %79 = arith.cmpi eq, %25, %78 : vector<128x128xi32>
    %cst_20 = arith.constant -1.000000e+00 : f32
    %80 = vector.broadcast %cst_20 : f32 to vector<128x128xf32>
    %81 = arith.select %79, %80, %66 : vector<128x128xi1>, vector<128x128xf32>
    %cst_21 = arith.constant dense<0xFF800000> : vector<128xf32>
    %82 = vector.multi_reduction <maximumf>, %81, %cst_21 [1] : vector<128x128xf32> to vector<128xf32>
    %83 = vector.shape_cast %82 : vector<128xf32> to vector<128x1xf32>
    %84 = vector.broadcast %83 : vector<128x1xf32> to vector<128x128xf32>
    %85 = arith.cmpf oeq, %81, %84 : vector<128x128xf32>
    %c128_i32_22 = arith.constant 128 : i32
    %86 = vector.broadcast %c128_i32_22 : i32 to vector<128x128xi32>
    %87 = arith.select %85, %25, %86 : vector<128x128xi1>, vector<128x128xi32>
    %cst_23 = arith.constant dense<2147483647> : vector<128xi32>
    %88 = vector.multi_reduction <minsi>, %87, %cst_23 [1] : vector<128x128xi32> to vector<128xi32>
    %89 = vector.shape_cast %88 : vector<128xi32> to vector<128x1xi32>
    %90 = arith.addf %75, %83 : vector<128x1xf32>
    %91 = arith.minsi %76, %89 : vector<128x1xi32>
    %92 = arith.maxsi %77, %89 : vector<128x1xi32>
    %cst_24 = arith.constant 0.699999988 : f32
    %93 = vector.broadcast %cst_24 : f32 to vector<128x1xf32>
    %94 = arith.mulf %93, %13 : vector<128x1xf32>
    %cst_25 = arith.constant 1.000000e+00 : f32
    %95 = vector.broadcast %cst_25 : f32 to vector<128x1xf32>
    %96 = arith.cmpf olt, %94, %95 : vector<128x1xf32>
    %cst_26 = arith.constant 0.699999988 : f32
    %97 = vector.broadcast %cst_26 : f32 to vector<128x1xf32>
    %98 = arith.mulf %97, %13 : vector<128x1xf32>
    %99 = arith.cmpf ogt, %90, %98 : vector<128x1xf32>
    %100 = arith.subi %92, %91 : vector<128x1xi32>
    %c6_i32 = arith.constant 6 : i32
    %101 = vector.broadcast %c6_i32 : i32 to vector<128x1xi32>
    %102 = arith.cmpi slt, %100, %101 : vector<128x1xi32>
    %103 = arith.andi %99, %102 : vector<128x1xi1>
    %104 = arith.ori %96, %103 : vector<128x1xi1>
    %cst_27 = arith.constant 0.000000e+00 : f32
    %105 = vector.broadcast %cst_27 : f32 to vector<128x1xf32>
    %106 = arith.select %104, %24, %105 : vector<128x1xi1>, vector<128x1xf32>
    %c0_28 = arith.constant 0 : index
    %c0_29 = arith.constant 0 : index
    %107 = vector.load %arg3[%c0_28, %c0_29] : memref<128x1xf32, #tpu.memory_space<vmem>>, vector<128x1xf32>
    tpu.vector_store %arg3[%c0_28, %c0_29], %106 {strides = array<i32>} : memref<128x1xf32, #tpu.memory_space<vmem>>, vector<128x1xf32>,
    return
  }
  func.func @transform_0(%arg0: i32) -> (i32, i32) {
    %c0_i32 = arith.constant 0 : i32
    %c0_i32_0 = arith.constant 0 : i32
    return %arg0, %c0_i32 : i32, i32
  }
  func.func @transform_1(%arg0: i32) -> (i32, i32) {
    %c0_i32 = arith.constant 0 : i32
    %c0_i32_0 = arith.constant 0 : i32
    %c0_i32_1 = arith.constant 0 : i32
    return %c0_i32, %c0_i32_0 : i32, i32
  }
  func.func @transform_2(%arg0: i32) -> (i32, i32) {
    %c0_i32 = arith.constant 0 : i32
    %c0_i32_0 = arith.constant 0 : i32
    return %arg0, %c0_i32 : i32, i32
  }
}

</mosaic_0001>

<bundles_post_ra>
// kernel: tpu_custom_call.1
= control target key start
LH: loop header
LB: loop body
LE: loop exit
PB: predicated region body
PF: predicated region fallthrough
CT: control target
= control target key end

     0   :  { %7 = vsyncpa [#allocation3], 0  ;;  %s6354_s0 = inlined_call_operand.hbm [shape: f32[256,128], index: 0, kind: input, shape index: {}]   ;;  %s6355_s1 = inlined_call_operand.hbm [shape: bf16[256,128], index: 1, kind: input, shape index: {}]   ;;  %s6356_s2 = inlined_call_operand.vmem [shape: f32[256,1], index: 2, kind: output, shape index: {}]  }
   0x1   :  { %9 = vsyncpa [#allocation3 + $0x1], 0 }
   0x2   :  { %10 = vsyncpa [#allocation5], 0  ;;  %s3300_s9 = smov 0   ;;  %s3302_s10 = smov 0  }
   0x3   :  { %s3304_s11 = smov 0   ;;  %s3306_s12 = smov 0  }
   0x4 LB: > { %s2935_s13 = sadd.s32 4294967295, %s3275_s12   ;;  %p36_p0 = scmp.ne.s32.totalorder %s3267_s10, %s3263_s9  ;;  %s3275_s12 = sphi %s3306_s12, %s7019_s12   ;;  %s3271_s11 = sphi %s3304_s11, %s7018_s11   ;;  %s3267_s10 = sphi %s3302_s10, %s7017_s10   ;;  %s3263_s9 = sphi %s3300_s9, %s7016_s9  }
   0x5   : > { %p3322_p1 = scmp.eq.s32.totalorder %s2935_s13, 0  ;;  %p2937_p2 = scmp.ge.s32.totalorder %s3275_s12, 1 }
   0x6   : > { %p94_p3 = scmp.lt.s32.totalorder %s3275_s12, 3  ;;  %s3277_s17 = smov [#allocation4]  }
   0x7   : > { %s6566_s14 = scalar_select %p3322_p1, 1, 0 }
   0x8   : > { %p3330_p4 = por %p3322_p1, %p36_p0  ;;  %p3334_p5 = pnand %p2937_p2, %p94_p3 }
   0x9   : > { %s106_s18 = sshll.u32 %s3277_s17, 4  ;;  %s3347_s20 = sadd.s32 1, %s3275_s12   ;;  %s107_s18 = int_to_ptr.vmem [resolvable:$true] %s106_s18 }
   0xa   : > { %s6567_s15 = scalar_select %p3330_p4, 1, 0 }
   0xb   : > { %s6568_s16 = scalar_select %p3334_p5, 1, 0 }
   0xc   : > { %p3053_p6 = pneg %p3334_p5  ;;  %s23_s21 = sadd.s32 1, %s3271_s11 }
   0xd   : > { %s20_s22 = ssub.s32 %s3275_s12, %s3347_s20  ;;  %s3194_s23 = scalar_lea.vmem %s107_s18, 2048 }
   0xe   : > { %p3342_p7 = pnand %p3053_p6, %p3322_p1  ;;  %p3195_p9 = scmp.ne.s32.totalorder %s107_s18, %s3194_s23 }
   0xf   : > { %p3202_p12 = scmp.lt.s32.totalorder %s107_s18, %s107_s18  ;;  %p3203_p13 = scmp.lt.s32.totalorder %s3194_s23, %s3194_s23 }
  0x10   : > { %p3185_p8 = pneg %p3342_p7 }
  0x11   : > { %p3204_p0 = por %p3203_p13, %p3202_p12 }
  0x12   : > { %p3197_p10 = pnand %p3195_p9, %p3185_p8 }
  0x14   : > { %p3198_p11 = pneg %p3197_p10 }
  0x16   : > { %p3205_p2 = pnand %p3204_p0, %p3198_p11 }
  0x18   : > { %3208 = shalt.err (!%p3205_p2)
}
  0x19   : > { %s3278_s24 = smov 64   ;;  %s3279_s25 = smov 4  }
  0x1a   : > { %3056 = dma.hbm_to_vmem [thread:$0]  (!%p3342_p7), %s6355_s1, 2048, %s107_s18, [#allocation5], %s3278_s24, %s3278_s24, %s3279_s25  }
  0x1b   : > { %p21_p3 = scmp.eq.s32.totalorder %s20_s22, 0  ;;  %p30_p6 = scmp.ne.s32.totalorder %s3271_s11, %s3267_s10 }
  0x1c   : > { %p31_p8 = scmp.eq.s32.totalorder %s3275_s12, 0  ;;  %p3062_p9 = scmp.lt.s32.totalorder %s3275_s12, 2 }
  0x1d   : > { %s3364_s28 = scalar_select %p21_p3, %s3271_s11, %s23_s21  }
  0x1e   : > { %p32_p10 = por %p31_p8, %p30_p6  ;;  %s120_s29 = sand.u32 1, %s3271_s11  }
  0x1f   : > { %s2940_s30 = sshll.u32 %s120_s29, 7  ;;  %s2966_s3 = sshll.u32 %s3275_s12, 11 }
  0x20   : > { %s3371_s6 = scalar_lea.hbm %s6354_s0, %s2966_s3  ;;  %s124_s7 = scalar_lea.vmem [#allocation2], %s2940_s30 }
  0x21   : > { %s131_s8 = sshll.u32 %s124_s7, 4  ;;  %p3375_p7 = pnand %p3062_p9, %p32_p10  ;;  %s3373_s8 = int_to_ptr.vmem [resolvable:$true] %s131_s8 }
  0x22   : > { %s3379_s17 = scalar_lea.sflag [#allocation3], %s120_s29  ;;  %s3209_s18 = scalar_lea.hbm %s3371_s6, 2048 }
  0x23   : > { %p3210_p11 = scmp.ne.s32.totalorder %s3371_s6, %s3209_s18  ;;  %p3211_p12 = pneg %p3375_p7 }
  0x24   : > { %s3214_s22 = scalar_lea.hbm %s6354_s0, 4096  ;;  %p3215_p2 = scmp.lt.s32.totalorder %s3371_s6, %s6354_s0 }
  0x25   : > { %p3212_p13 = pnand %p3211_p12, %p3210_p11  ;;  %p3216_p3 = scmp.lt.s32.totalorder %s3214_s22, %s3209_s18 }
  0x27   : > { %p3213_p0 = pneg %p3212_p13  ;;  %p3217_p6 = por %p3216_p3, %p3215_p2 }
  0x29   : > { %p3218_p8 = pnand %p3217_p6, %p3213_p0 }
  0x2b   : > { %3221 = shalt.err (!%p3218_p8)
}
  0x2c   : > { %s3222_s25 = scalar_lea.vmem %s3373_s8, 2048  ;;  %s3280_s26 = smov [#allocation2]  }
  0x2d   : > { %p3223_p9 = scmp.ne.s32.totalorder %s3373_s8, %s3222_s25  ;;  %s3227_s27 = sshll.u32 %s3280_s26, 4  ;;  %s3228_s27 = int_to_ptr.vmem [resolvable:$false] %s3227_s27 }
  0x2e   : > { %s3229_s29 = scalar_lea.vmem %s3228_s27, 4096  ;;  %p3230_p13 = scmp.lt.s32.totalorder %s3373_s8, %s3228_s27 }
  0x2f   : > { %p3225_p10 = pnand %p3223_p9, %p3211_p12  ;;  %p3231_p1 = scmp.lt.s32.totalorder %s3229_s29, %s3222_s25 }
  0x31   : > { %p3226_p11 = pneg %p3225_p10  ;;  %p3232_p4 = por %p3231_p1, %p3230_p13 }
  0x33   : > { %p3233_p5 = pnand %p3232_p4, %p3226_p11 }
  0x35   : > { %3236 = shalt.err (!%p3233_p5)
}
  0x36   : > { %s3281_s30 = smov 128   ;;  %s3282_s3 = smov 8  }
  0x37   : > { %3060 = dma.hbm_to_vmem [thread:$0]  (!%p3375_p7), %s3371_s6, 2048, %s3373_s8, %s3379_s17, %s3281_s30, %s3281_s30, %s3282_s3  }
  0x38   : > { %p6571_p12 = scmp.ne.s32.totalorder %s6568_s16, 0 }
  0x3a   : > { %143 = sbr.rel (%p6571_p12) target bundleno = 2338 (0x922), region = 28 }
  0x3f   : > { %s145_s4 = sand.u32 1, %s3267_s10   ;;  %p6572_p1 = scmp.ne.s32.totalorder %s6567_s15, 0 }
  0x40   : > { %s2944_s5 = sshll.u32 %s145_s4, 7  ;;  %s146_s7 = scalar_lea.sflag [#allocation3], %s145_s4 }
  0x41   : > { %s3403_s18 = scalar_lea.vmem [#allocation2], %s2944_s5 }
  0x42   : > { %3254 = dma.done.wait (%p6572_p1), %s146_s7, 2048  }
  0x43   : > { %3256 = vsyncadd (%p6572_p1), %s146_s7, 4294965248  ;;  %p6573_p4 = scmp.ne.s32.totalorder %s6566_s14, 0 }
  0x45   : > { %3258 = dma.done.wait (%p6573_p4), [#allocation5], 2048  }
  0x46   : > { %3260 = vsyncadd (%p6573_p4), [#allocation5], 4294965248  ;;  %v3414_v0 = vld [vmem:[%s3403_s18 + $0x10] sm:$0xff]  ;;  %v3417_v1 = vld [vmem:[%s3403_s18] sm:$0xff]  ;;  %v791_v32 = vlaneseq  ;;  %s3283_s14 = smov 127   ;;  %s3284_s15 = smov 1  }
  0x47   : > { %202 = vmax.xlane.f32.xlu1 %v3414_v0  ;;  %198 = vmax.xlane.f32.xlu0 %v3417_v1  ;;  %v3422_v2 = vld [vmem:[%s3403_s18 + $0x18] sm:$0xff]  ;;  %v3425_v3 = vld [vmem:[%s3403_s18 + $0x8] sm:$0xff]  ;;  %v3433_v5 = vld [vmem:[%s3403_s18 + $0x20] sm:$0xff]  ;;  %s6020_s16 = sshll.u32 %s2935_s13, 4 }
  0x48   : > { %v3428_v4 = vld [vmem:[%s3403_s18 + $0x28] sm:$0xff]  ;;  %v3103_v6 = vld [vmem:[#allocation4 + $0x78] sm:$0xff]   ;;  %v3439_v8 = vld [vmem:[%s3403_s18 + $0x30] sm:$0xff]  ;;  %v3477_v33 = vand.u32 127, %v791_v32  ;;  %p176_p5 = scmp.lt.s32.totalorder %s6020_s16, 31 }
  0x49   : > { %v3436_v7 = vld [vmem:[%s3403_s18 + $0x38] sm:$0xff]  ;;  %2967 = vmatprep.subr.bf16.mxu0 %v3103_v6  ;;  %3031 = vmatprep.subr.bf16.mxu1 %v3103_v6  ;;  %v3444_v10 = vld [vmem:[%s3403_s18 + $0x48] sm:$0xff]  ;;  %v3447_v11 = vld [vmem:[%s3403_s18 + $0x40] sm:$0xff] }
  0x4a   : > { %v3104_v9 = vld [vmem:[#allocation4 + $0x38] sm:$0xff]   ;;  %v3105_v12 = vld [vmem:[#allocation4 + $0x70] sm:$0xff]   ;;  %v3107_v14 = vld [vmem:[#allocation4 + $0x68] sm:$0xff]   ;;  %s7021_s16 = smov (!%p176_p5, %s6020_s16), 31 }
  0x4b   : > { %204 = vmax.xlane.f32.xlu1 %v3422_v2  ;;  %200 = vmax.xlane.f32.xlu0 %v3425_v3  ;;  %v3106_v13 = vld [vmem:[#allocation4 + $0x30] sm:$0xff]   ;;  %v3457_v16 = vld [vmem:[%s3403_s18 + $0x58] sm:$0xff]  ;;  %v3108_v17 = vld [vmem:[#allocation4 + $0x28] sm:$0xff]   ;;  %s2947_s12 = sshll.u32 %s7021_s16, 3 }
  0x4c   : > { %2968 = vmatpush3.bf16.msra.mxu0 %v3104_v9  ;;  %3039 = vmatpush3.bf16.msra.mxu1 %v3104_v9  ;;  %v3454_v15 = vld [vmem:[%s3403_s18 + $0x50] sm:$0xff]  ;;  %v3109_v18 = vld [vmem:[#allocation4 + $0x60] sm:$0xff]   ;;  %v3465_v20 = vld [vmem:[%s3403_s18 + $0x68] sm:$0xff]  ;;  %s6097_s8 = scalar_lea.vmem %s6356_s2, %s2947_s12 }
  0x4d   : > { %2969 = vmatprep.subr.bf16.mxu0 %v3105_v12  ;;  %3032 = vmatprep.subr.bf16.mxu1 %v3105_v12  ;;  %v3462_v19 = vld [vmem:[%s3403_s18 + $0x60] sm:$0xff]  ;;  %v3111_v22 = vld [vmem:[#allocation4 + $0x58] sm:$0xff]   ;;  %v3470_v23 = vld [vmem:[%s3403_s18 + $0x70] sm:$0xff] }
  0x4e   : > { %v3110_v21 = vld [vmem:[#allocation4 + $0x20] sm:$0xff]   ;;  %v3473_v24 = vld [vmem:[%s3403_s18 + $0x78] sm:$0xff]  ;;  %v3113_v26 = vld [vmem:[#allocation4 + $0x50] sm:$0xff]  }
  0x4f   : > { %208 = vmax.xlane.f32.xlu1 %v3428_v4  ;;  %206 = vmax.xlane.f32.xlu0 %v3433_v5  ;;  %v3112_v25 = vld [vmem:[#allocation4 + $0x18] sm:$0xff]   ;;  %v3114_v27 = vld [vmem:[#allocation4 + $0x10] sm:$0xff]   ;;  %v3115_v28 = vld [vmem:[#allocation4 + $0x48] sm:$0xff]  }
  0x50   : > { %2970 = vmatpush3.bf16.msra.mxu0 %v3106_v13  ;;  %3040 = vmatpush3.bf16.msra.mxu1 %v3106_v13  ;;  %v3116_v29 = vld [vmem:[#allocation4 + $0x8] sm:$0xff]   ;;  %v3117_v30 = vld [vmem:[#allocation4 + $0x40] sm:$0xff]  }
  0x51   : > { %2971 = vmatprep.subr.bf16.mxu0 %v3107_v14  ;;  %3033 = vmatprep.subr.bf16.mxu1 %v3107_v14  ;;  %v3118_v31 = vld [vmem:[#allocation4] sm:$0xff]  }
  0x53   : > { %212 = vmax.xlane.f32.xlu1 %v3436_v7  ;;  %210 = vmax.xlane.f32.xlu0 %v3439_v8 }
  0x54   : > { %2972 = vmatpush3.bf16.msra.mxu0 %v3108_v17  ;;  %3041 = vmatpush3.bf16.msra.mxu1 %v3108_v17 }
  0x55   : > { %2973 = vmatprep.subr.bf16.mxu0 %v3109_v18  ;;  %3034 = vmatprep.subr.bf16.mxu1 %v3109_v18 }
  0x57   : > { %216 = vmax.xlane.f32.xlu1 %v3444_v10  ;;  %214 = vmax.xlane.f32.xlu0 %v3447_v11 }
  0x58   : > { %2974 = vmatpush3.bf16.msra.mxu0 %v3110_v21  ;;  %3042 = vmatpush3.bf16.msra.mxu1 %v3110_v21 }
  0x59   : > { %2975 = vmatprep.subr.bf16.mxu0 %v3111_v22  ;;  %3035 = vmatprep.subr.bf16.mxu1 %v3111_v22 }
  0x5b   : > { %218 = vmax.xlane.f32.xlu0 %v3454_v15  ;;  %220 = vmax.xlane.f32.xlu1 %v3457_v16 }
  0x5c   : > { %2976 = vmatpush3.bf16.msra.mxu0 %v3112_v25  ;;  %3043 = vmatpush3.bf16.msra.mxu1 %v3112_v25 }
  0x5d   : > { %2977 = vmatprep.subr.bf16.mxu0 %v3113_v26  ;;  %3036 = vmatprep.subr.bf16.mxu1 %v3113_v26 }
  0x5f   : > { %222 = vmax.xlane.f32.xlu0 %v3462_v19  ;;  %224 = vmax.xlane.f32.xlu1 %v3465_v20 }
  0x60   : > { %2978 = vmatpush3.bf16.msra.mxu0 %v3114_v27  ;;  %3044 = vmatpush3.bf16.msra.mxu1 %v3114_v27 }
  0x61   : > { %2979 = vmatprep.subr.bf16.mxu0 %v3115_v28  ;;  %3037 = vmatprep.subr.bf16.mxu1 %v3115_v28 }
  0x63   : > { %226 = vmax.xlane.f32.xlu0 %v3470_v23  ;;  %228 = vmax.xlane.f32.xlu1 %v3473_v24 }
  0x64   : > { %2980 = vmatpush3.bf16.msra.mxu0 %v3116_v29  ;;  %3045 = vmatpush3.bf16.msra.mxu1 %v3116_v29 }
  0x65   : > { %2981 = vmatprep.subr.bf16.mxu0 %v3117_v30  ;;  %3038 = vmatprep.subr.bf16.mxu1 %v3117_v30 }
  0x68   : > { %2982 = vmatpush3.bf16.msra.mxu0 %v3118_v31  ;;  %3046 = vmatpush3.bf16.msra.mxu1 %v3118_v31 }
  0xd0   : > { %v203_v34 = vpop.xlane.xlu1 %202  ;;  %v199_v35 = vpop.xlane.xlu0 %198 }
  0xd1   : > { %v232_v36 = vsub.f32 %v3414_v0, %v203_v34  ;;  %vm795_vm0 = vcmp.ge.f32.partialorder %v3414_v0, %v203_v34  ;;  %v230_v37 = vsub.f32 %v3417_v1, %v199_v35  ;;  %vm793_vm1 = vcmp.ge.f32.partialorder %v3417_v1, %v199_v35 }
  0xd2   : > { %v3484_v38 = vsel %vm793_vm1, %v3477_v33, 128  ;;  %v3487_v39 = vsel %vm795_vm0, %v3477_v33, 128 }
  0xd3   : > { %v250_v40 = vmul.f32 1.442695, %v232_v36  ;;  %v826_v41 = vshra.s32 %v3484_v38, 16  ;;  %v246_v42 = vmul.f32 1.442695, %v230_v37  ;;  %v854_v45 = vshra.s32 %v3487_v39, 16 }
  0xd4   : > { %v205_v43 = vpop.xlane.xlu1 %204  ;;  %v201_v44 = vpop.xlane.xlu0 %200 }
  0xd5   : > { %v233_v46 = vsub.f32 %v3422_v2, %v205_v43  ;;  %vm796_vm2 = vcmp.ge.f32.partialorder %v3422_v2, %v205_v43  ;;  %v231_v47 = vsub.f32 %v3425_v3, %v201_v44  ;;  %3119 = vpow2.f32 %v250_v40 }
  0xd6   : > { %vm794_vm3 = vcmp.ge.f32.partialorder %v3425_v3, %v201_v44  ;;  %v3495_v48 = vcvt.s32.f32 %v826_v41  ;;  %v3501_v52 = vsel %vm796_vm2, %v3477_v33, 128  ;;  %3121 = vpow2.f32 %v246_v42 }
  0xd7   : > { %v252_v49 = vmul.f32 1.442695, %v233_v46  ;;  %v248_v50 = vmul.f32 1.442695, %v231_v47  ;;  %v3498_v51 = vsel %vm794_vm3, %v3477_v33, 128  ;;  %v3504_v55 = vcvt.s32.f32 %v854_v45 }
  0xd8   : > { %829 = vmin.xlane.f32.xlu0 %v3495_v48  ;;  %v209_v53 = vpop.xlane.xlu1 %208  ;;  %v207_v54 = vpop.xlane.xlu0 %206  ;;  %v840_v56 = vshra.s32 %v3498_v51, 16  ;;  %v868_v60 = vshra.s32 %v3501_v52, 16 }
  0xd9   : > { %3123 = vpow2.f32 %v252_v49  ;;  %v235_v57 = vsub.f32 %v3428_v4, %v209_v53  ;;  %vm798_vm4 = vcmp.ge.f32.partialorder %v3428_v4, %v209_v53  ;;  %v234_v58 = vsub.f32 %v3433_v5, %v207_v54 }
  0xda   : > { %3125 = vpow2.f32 %v248_v50  ;;  %vm797_vm5 = vcmp.ge.f32.partialorder %v3433_v5, %v207_v54  ;;  %v3511_v59 = vcvt.s32.f32 %v840_v56  ;;  %v3518_v62 = vsel %vm798_vm4, %v3477_v33, 128 }
  0xdb   : > { %v3515_v61 = vsel %vm797_vm5, %v3477_v33, 128  ;;  %v256_v63 = vmul.f32 1.442695, %v235_v57  ;;  %v254_v3 = vmul.f32 1.442695, %v234_v58  ;;  %v3527_v6 = vcvt.s32.f32 %v868_v60 }
  0xdc   : > { %857 = vmin.xlane.f32.xlu0 %v3504_v55  ;;  %843 = vmin.xlane.f32.xlu1 %v3511_v59  ;;  %v213_v0 = vpop.xlane.xlu1 %212  ;;  %v211_v1 = vpop.xlane.xlu0 %210  ;;  %v882_v2 = vshra.s32 %v3515_v61, 16  ;;  %v896_v12 = vshra.s32 %v3518_v62, 16 }
  0xdd   : > { %v237_v4 = vsub.f32 %v3436_v7, %v213_v0  ;;  %vm800_vm6 = vcmp.ge.f32.partialorder %v3436_v7, %v213_v0  ;;  %v236_v5 = vsub.f32 %v3439_v8, %v211_v1  ;;  %vm799_vm7 = vcmp.ge.f32.partialorder %v3439_v8, %v211_v1 }
  0xde   : > { %v3529_v9 = vcvt.s32.f32 %v882_v2  ;;  %v3533_v14 = vsel %vm799_vm7, %v3477_v33, 128  ;;  %v3536_v17 = vsel %vm800_vm6, %v3477_v33, 128  ;;  %3127 = vpow2.f32 %v256_v63 }
  0xdf   : > { %v260_v13 = vmul.f32 1.442695, %v237_v4  ;;  %v258_v18 = vmul.f32 1.442695, %v236_v5  ;;  %v910_v21 = vshra.s32 %v3533_v14, 16  ;;  %v924_v22 = vshra.s32 %v3536_v17, 16 }
  0xe0   : > { %871 = vmin.xlane.f32.xlu1 %v3527_v6  ;;  %885 = vmin.xlane.f32.xlu0 %v3529_v9  ;;  %v217_v7 = vpop.xlane.xlu1 %216  ;;  %v215_v8 = vpop.xlane.xlu0 %214  ;;  %3129 = vpow2.f32 %v254_v3  ;;  %v3546_v27 = vcvt.s32.f32 %v896_v12 }
  0xe1   : > { %v239_v25 = vsub.f32 %v3444_v10, %v217_v7  ;;  %vm802_vm8 = vcmp.ge.f32.partialorder %v3444_v10, %v217_v7  ;;  %v238_v26 = vsub.f32 %v3447_v11, %v215_v8  ;;  %3131 = vpow2.f32 %v260_v13 }
  0xe2   : > { %vm801_vm9 = vcmp.ge.f32.partialorder %v3447_v11, %v215_v8  ;;  %v3548_v28 = vcvt.s32.f32 %v910_v21  ;;  %v3550_v29 = vpop.eup %3119  ;;  %v3556_v34 = vsel %vm802_vm8, %v3477_v33, 128  ;;  %3133 = vpow2.f32 %v258_v18 }
  0xe3   : > { %v264_v30 = vmul.f32 1.442695, %v239_v25  ;;  %v262_v31 = vmul.f32 1.442695, %v238_v26  ;;  %v3553_v32 = vsel %vm801_vm9, %v3477_v33, 128  ;;  %v3560_v11 = vcvt.s32.f32 %v924_v22  ;;  %v3564_v40 = vpop.eup %3121 }
  0xe4   : > { %899 = vmin.xlane.f32.xlu1 %v3546_v27  ;;  %913 = vmin.xlane.f32.xlu0 %v3548_v28  ;;  %v219_v10 = vpop.xlane.xlu0 %218  ;;  %v938_v35 = vshra.s32 %v3553_v32, 16  ;;  %v221_v36 = vpop.xlane.xlu1 %220  ;;  %v952_v37 = vshra.s32 %v3556_v34, 16 }
  0xe5   : > { %3135 = vpow2.f32 %v264_v30  ;;  %v240_v41 = vsub.f32 %v3454_v15, %v219_v10  ;;  %vm803_vm10 = vcmp.ge.f32.partialorder %v3454_v15, %v219_v10  ;;  %v241_v42 = vsub.f32 %v3457_v16, %v221_v36 }
  0xe6   : > { %v3569_v43 = vpop.eup %3123  ;;  %3137 = vpow2.f32 %v262_v31  ;;  %v3571_v44 = vcvt.s32.f32 %v938_v35  ;;  %vm804_vm11 = vcmp.ge.f32.partialorder %v3457_v16, %v221_v36  ;;  %v3574_v45 = vcvt.s32.f32 %v952_v37 }
  0xe7   : > { %6574 = vst [vmem:[#allocation8_spill] sm:$0xff] %v3569_v43  ;;  %v3576_v46 = vpop.eup %3125  ;;  %v266_v47 = vmul.f32 1.442695, %v240_v41  ;;  %v268_v49 = vmul.f32 1.442695, %v241_v42  ;;  %v3579_v50 = vsel %vm803_vm10, %v3477_v33, 128  ;;  %v3592_v58 = vpack.c.bf16 %v3569_v43, %v3550_v29 }
  0xe8   : > { %v3582_v15 = vsel %vm804_vm11, %v3477_v33, 128  ;;  %927 = vmin.xlane.f32.xlu1 %v3560_v11  ;;  %941 = vmin.xlane.f32.xlu0 %v3571_v44  ;;  %v223_v53 = vpop.xlane.xlu0 %222  ;;  %v966_v54 = vshra.s32 %v3579_v50, 16  ;;  %v225_v16 = vpop.xlane.xlu1 %224  ;;  %v278_v57 = vpack.c.bf16 %v3576_v46, %v3564_v40 }
  0xe9   : > { %v980_v56 = vshra.s32 %v3582_v15, 16  ;;  %3139 = vpow2.f32 %v266_v47  ;;  %v242_v60 = vsub.f32 %v3462_v19, %v223_v53  ;;  %vm805_vm12 = vcmp.ge.f32.partialorder %v3462_v19, %v223_v53 }
  0xea   : > { %v243_v63 = vsub.f32 %v3465_v20, %v225_v16  ;;  %3141 = vpow2.f32 %v268_v49  ;;  %v3597_v0 = vcvt.s32.f32 %v966_v54  ;;  %vm806_vm13 = vcmp.ge.f32.partialorder %v3465_v20, %v225_v16 }
  0xeb   : > { %v3600_v1 = vcvt.s32.f32 %v980_v56  ;;  %v270_v2 = vmul.f32 1.442695, %v242_v60  ;;  %v286_v4 = vunpack.c.l.bf16 %v278_v57  ;;  %v287_v5 = vunpack.c.h.bf16 %v278_v57  ;;  %v3612_v8 = vpop.eup %3127 }
  0xec   : > { %v272_v3 = vmul.f32 1.442695, %v243_v63  ;;  %955 = vmin.xlane.f32.xlu1 %v3574_v45  ;;  %969 = vmin.xlane.f32.xlu0 %v3597_v0  ;;  %v227_v12 = vpop.xlane.xlu0 %226  ;;  %v3605_v19 = vsel %vm805_vm12, %v3477_v33, 128  ;;  %v229_v13 = vpop.xlane.xlu1 %228  ;;  %v288_v18 = vunpack.c.l.bf16 %v3592_v58  ;;  %v289_v7 = vunpack.c.h.bf16 %v3592_v58  ;;  %6575 = vst [vmem:[#allocation9_spill] sm:$0xff] %v3612_v8 }
  0xed   : > { %v3610_v20 = vsel %vm806_vm13, %v3477_v33, 128  ;;  %3143 = vpow2.f32 %v270_v2  ;;  %v244_v21 = vsub.f32 %v3470_v23, %v227_v12  ;;  %vm807_vm14 = vcmp.ge.f32.partialorder %v3470_v23, %v227_v12  ;;  %v3617_v25 = vpop.eup %3129 }
  0xee   : > { %v302_v22 = vsub.f32 %v3564_v40, %v286_v4  ;;  %3145 = vpow2.f32 %v272_v3  ;;  %v303_v26 = vsub.f32 %v3576_v46, %v287_v5  ;;  %v994_v30 = vshra.s32 %v3605_v19, 16  ;;  %v3622_v10 = vpop.eup %3131 }
  0xef   : > { %v245_v31 = vsub.f32 %v3473_v24, %v229_v13  ;;  %v274_v35 = vmul.f32 1.442695, %v244_v21  ;;  %vm808_vm15 = vcmp.ge.f32.partialorder %v3473_v24, %v229_v13  ;;  %v304_v36 = vsub.f32 %v3550_v29, %v288_v18  ;;  %v3631_v53 = vpop.eup %3133 }
  0xf0   : > { %v305_v37 = vsub.f32 %v3569_v43, %v289_v7  ;;  %983 = vmin.xlane.f32.xlu1 %v3600_v1  ;;  %v318_v41 = vpack.c.bf16 %v303_v26, %v302_v22  ;;  %v3628_v42 = vcvt.s32.f32 %v994_v30  ;;  %v1008_v49 = vshra.s32 %v3610_v20, 16 }
  0xf1   : > { %v276_v47 = vmul.f32 1.442695, %v245_v31  ;;  %3147 = vpow2.f32 %v274_v35  ;;  %v3636_v24 = vsel %vm807_vm14, %v3477_v33, 128  ;;  %v3639_v16 = vsel %vm808_vm15, %v3477_v33, 128 }
  0xf2   : > { %v319_v54 = vpack.c.bf16 %v305_v37, %v304_v36  ;;  %v3641_v56 = vpop.eup %3135  ;;  %486 = vmatprep.mubr.bf16.mxu0 %v318_v41  ;;  %997 = vmin.xlane.f32.xlu0 %v3628_v42  ;;  %v3644_v60 = vcvt.s32.f32 %v1008_v49  ;;  %v1022_v63 = vshra.s32 %v3636_v24, 16  ;;  %v1036_v2 = vshra.s32 %v3639_v16, 16 }
  0xf3   : > { %6576 = vst [vmem:[#allocation10_spill] sm:$0xff] %v3641_v56  ;;  %3149 = vpow2.f32 %v276_v47  ;;  %v3648_v3 = vpop.eup %3137  ;;  %487 = vmatmul.mubr.bf16.vlgmr.msra.gmra.mxu0 %v278_v57  ;;  %v280_v23 = vpack.c.bf16 %v3612_v8, %v3617_v25  ;;  %v281_v7 = vpack.c.bf16 %v3622_v10, %v3631_v53 }
  0xf4   : > { %494 = vmatprep.mubr.bf16.mxu0 %v319_v54  ;;  %1011 = vmin.xlane.f32.xlu1 %v3644_v60  ;;  %v3653_v4 = vcvt.s32.f32 %v1022_v63  ;;  %v3655_v5 = vcvt.s32.f32 %v1036_v2  ;;  %v282_v12 = vpack.c.bf16 %v3641_v56, %v3648_v3 }
  0xf5   : > { %v290_v13 = vunpack.c.l.bf16 %v280_v23  ;;  %v291_v18 = vunpack.c.h.bf16 %v280_v23  ;;  %v292_v41 = vunpack.c.l.bf16 %v281_v7  ;;  %v293_v47 = vunpack.c.h.bf16 %v281_v7 }
  0xf6   : > { %v3661_v21 = vpop.eup %3139  ;;  %1025 = vmin.xlane.f32.xlu0 %v3653_v4  ;;  %v294_v57 = vunpack.c.l.bf16 %v282_v12  ;;  %v295_v22 = vunpack.c.h.bf16 %v282_v12 }
  0xf7   : > { %v3664_v26 = vpop.eup %3141  ;;  %v306_v30 = vsub.f32 %v3617_v25, %v290_v13  ;;  %v307_v31 = vsub.f32 %v3612_v8, %v291_v18 }
  0xf8   : > { %6577 = vst [vmem:[#allocation11_spill] sm:$0xff] %v3664_v26  ;;  %1039 = vmin.xlane.f32.xlu1 %v3655_v5  ;;  %v310_v35 = vsub.f32 %v3648_v3, %v294_v57  ;;  %v311_v36 = vsub.f32 %v3641_v56, %v295_v22  ;;  %v283_v37 = vpack.c.bf16 %v3664_v26, %v3661_v21 }
  0xf9   : > { %v320_v54 = vpack.c.bf16 %v307_v31, %v306_v30  ;;  %v308_v56 = vsub.f32 %v3631_v53, %v292_v41  ;;  %v309_v31 = vsub.f32 %v3622_v10, %v293_v47 }
  0xfa   : > { %v3673_v49 = vpop.eup %3143  ;;  %v322_v63 = vpack.c.bf16 %v311_v36, %v310_v35  ;;  %v296_v2 = vunpack.c.l.bf16 %v283_v37  ;;  %v297_v43 = vunpack.c.h.bf16 %v283_v37 }
  0xfb   : > { %v3675_v13 = vpop.eup %3145  ;;  %495 = vmatmul.mubr.bf16.gmra.mxu0 %v3592_v58 }
  0xfc   : > { %502 = vmatprep.mubr.bf16.mxu0 %v320_v54  ;;  %518 = vmatprep.mubr.bf16.mxu1 %v322_v63  ;;  %v312_v18 = vsub.f32 %v3661_v21, %v296_v2  ;;  %v313_v57 = vsub.f32 %v3664_v26, %v297_v43  ;;  %v284_v22 = vpack.c.bf16 %v3675_v13, %v3673_v49 }
  0xfd   : > { %519 = vmatmul.mubr.bf16.vlgmr.msra.gmra.mxu1 %v282_v12  ;;  %v321_v12 = vpack.c.bf16 %v309_v31, %v308_v56  ;;  %v839_v31 = vand.u32 65535, %v3498_v51 }
  0xfe   : > { %v3683_v30 = vpop.eup %3147  ;;  %v323_v35 = vpack.c.bf16 %v313_v57, %v312_v18  ;;  %v298_v36 = vunpack.c.l.bf16 %v284_v22  ;;  %v299_v8 = vunpack.c.h.bf16 %v284_v22 }
 0x100   : > { %v3686_v58 = vpop.eup %3149  ;;  %526 = vmatprep.mubr.bf16.mxu1 %v323_v35  ;;  %v314_v54 = vsub.f32 %v3673_v49, %v298_v36  ;;  %v315_v43 = vsub.f32 %v3675_v13, %v299_v8  ;;  %v825_v8 = vand.u32 65535, %v3484_v38  ;;  %v867_v38 = vand.u32 65535, %v3501_v52 }
 0x101   : > { %v285_v63 = vpack.c.bf16 %v3686_v58, %v3683_v30  ;;  %v895_v52 = vand.u32 65535, %v3518_v62  ;;  %v923_v62 = vand.u32 65535, %v3536_v17  ;;  %v951_v17 = vand.u32 65535, %v3556_v34 }
 0x102   : > { %v324_v2 = vpack.c.bf16 %v315_v43, %v314_v54  ;;  %v827_v56 = vcvt.s32.f32 %v825_v8  ;;  %v881_v54 = vand.u32 65535, %v3515_v61  ;;  %v909_v61 = vand.u32 65535, %v3533_v14 }
 0x103   : > { %v300_v41 = vunpack.c.l.bf16 %v285_v63  ;;  %v301_v26 = vunpack.c.h.bf16 %v285_v63  ;;  %503 = vmatmul.mubr.bf16.gmra.mxu0 %v280_v23  ;;  %v853_v23 = vand.u32 65535, %v3487_v39  ;;  %v937_v14 = vand.u32 65535, %v3553_v32 }
 0x104   : > { %510 = vmatprep.mubr.bf16.mxu0 %v321_v12  ;;  %v883_v12 = vcvt.s32.f32 %v881_v54  ;;  %v965_v32 = vand.u32 65535, %v3579_v50  ;;  %v979_v34 = vand.u32 65535, %v3582_v15  ;;  %v993_v50 = vand.u32 65535, %v3605_v19 }
 0x105   : > { %527 = vmatmul.mubr.bf16.gmra.mxu1 %v283_v37  ;;  %v316_v47 = vsub.f32 %v3683_v30, %v300_v41  ;;  %v317_v18 = vsub.f32 %v3686_v58, %v301_v26  ;;  %v855_v36 = vcvt.s32.f32 %v853_v23 }
 0x106   : > { %534 = vmatprep.mubr.bf16.mxu1 %v324_v2  ;;  %v981_v54 = vcvt.s32.f32 %v979_v34 }
 0x107   : > { %v325_v57 = vpack.c.bf16 %v317_v18, %v316_v47  ;;  %v897_v47 = vcvt.s32.f32 %v895_v52  ;;  %v911_v18 = vcvt.s32.f32 %v909_v61  ;;  %v1035_v52 = vand.u32 65535, %v3639_v16 }
 0x10b   : > { %511 = vmatmul.mubr.bf16.gmra.mxu0 %v281_v7 }
 0x10d   : > { %535 = vmatmul.mubr.bf16.gmra.mxu1 %v284_v22  ;;  %v841_v22 = vcvt.s32.f32 %v839_v31  ;;  %v939_v31 = vcvt.s32.f32 %v937_v14 }
 0x10e   : > { %542 = vmatprep.mubr.bf16.mxu1 %v325_v57 }
 0x115   : > { %543 = vmatmul.mubr.bf16.gmra.mxu1 %v285_v63  ;;  %v869_v63 = vcvt.s32.f32 %v867_v38 }
 0x161   : > { %v3695_v35 = vpop.xlane.xlu0 %829 }
 0x162   : > { %vm831_vm0 = vcmp.eq.f32.partialorder %v3495_v48, %v3695_v35 }
 0x163   : > { %v832_v37 = vsel %vm831_vm0, %v827_v56, inf  ;;  %v925_v56 = vcvt.s32.f32 %v923_v62 }
 0x164   : > { %833 = vmin.xlane.f32.xlu0 %v832_v37 }
 0x165   : > { %v3701_v26 = vpop.xlane.xlu1 %843  ;;  %v3703_v7 = vpop.xlane.xlu0 %857 }
 0x166   : > { %vm845_vm1 = vcmp.eq.f32.partialorder %v3511_v59, %v3701_v26  ;;  %vm859_vm2 = vcmp.eq.f32.partialorder %v3504_v55, %v3703_v7 }
 0x167   : > { %v846_v39 = vsel %vm845_vm1, %v841_v22, inf  ;;  %v860_v48 = vsel %vm859_vm2, %v855_v36, inf  ;;  %v953_v22 = vcvt.s32.f32 %v951_v17  ;;  %v967_v36 = vcvt.s32.f32 %v965_v32 }
 0x168   : > { %847 = vmin.xlane.f32.xlu1 %v846_v39  ;;  %861 = vmin.xlane.f32.xlu0 %v860_v48  ;;  %v1007_v39 = vand.u32 65535, %v3610_v20  ;;  %v995_v48 = vcvt.s32.f32 %v993_v50 }
 0x169   : > { %v3711_v51 = vpop.xlane.xlu1 %871  ;;  %v3713_v43 = vpop.xlane.xlu0 %885 }
 0x16a   : > { %vm873_vm3 = vcmp.eq.f32.partialorder %v3527_v6, %v3711_v51  ;;  %vm887_vm4 = vcmp.eq.f32.partialorder %v3529_v9, %v3713_v43 }
 0x16b   : > { %v874_v55 = vsel %vm873_vm3, %v869_v63, inf  ;;  %v888_v59 = vsel %vm887_vm4, %v883_v12, inf  ;;  %v1009_v12 = vcvt.s32.f32 %v1007_v39 }
 0x16c   : > { %875 = vmin.xlane.f32.xlu1 %v874_v55  ;;  %889 = vmin.xlane.f32.xlu0 %v888_v59  ;;  %v1037_v55 = vcvt.s32.f32 %v1035_v52 }
 0x16d   : > { %v3721_v2 = vpop.xlane.xlu1 %899  ;;  %v3723_v41 = vpop.xlane.xlu0 %913 }
 0x16e   : > { %vm901_vm5 = vcmp.eq.f32.partialorder %v3546_v27, %v3721_v2  ;;  %vm915_vm6 = vcmp.eq.f32.partialorder %v3548_v28, %v3723_v41 }
 0x16f   : > { %v902_v6 = vsel %vm901_vm5, %v897_v47, inf  ;;  %v916_v9 = vsel %vm915_vm6, %v911_v18, inf }
 0x170   : > { %903 = vmin.xlane.f32.xlu1 %v902_v6  ;;  %917 = vmin.xlane.f32.xlu0 %v916_v9 }
 0x171   : > { %v3731_v57 = vpop.xlane.xlu1 %927  ;;  %v3733_v8 = vpop.xlane.xlu0 %941 }
 0x172   : > { %vm929_vm7 = vcmp.eq.f32.partialorder %v3560_v11, %v3731_v57  ;;  %vm943_vm8 = vcmp.eq.f32.partialorder %v3571_v44, %v3733_v8 }
 0x173   : > { %v930_v27 = vsel %vm929_vm7, %v925_v56, inf  ;;  %v944_v28 = vsel %vm943_vm8, %v939_v31, inf }
 0x174   : > { %931 = vmin.xlane.f32.xlu1 %v930_v27  ;;  %945 = vmin.xlane.f32.xlu0 %v944_v28 }
 0x175   : > { %v3741_v23 = vpop.xlane.xlu1 %955  ;;  %v3743_v37 = vpop.xlane.xlu0 %969 }
 0x176   : > { %vm957_vm9 = vcmp.eq.f32.partialorder %v3574_v45, %v3741_v23  ;;  %vm971_vm10 = vcmp.eq.f32.partialorder %v3597_v0, %v3743_v37  ;;  %v1021_v0 = vand.u32 65535, %v3636_v24 }
 0x177   : > { %v958_v11 = vsel %vm957_vm9, %v953_v22, inf  ;;  %v972_v44 = vsel %vm971_vm10, %v967_v36, inf }
 0x178   : > { %959 = vmin.xlane.f32.xlu1 %v958_v11  ;;  %973 = vmin.xlane.f32.xlu0 %v972_v44  ;;  %v1023_v61 = vcvt.s32.f32 %v1021_v0 }
 0x179   : > { %v3751_v38 = vpop.xlane.xlu1 %983 }
 0x17a   : > { %vm985_vm11 = vcmp.eq.f32.partialorder %v3600_v1, %v3751_v38 }
 0x17b   : > { %v3756_v15 = vpop.xlane.xlu0 %997  ;;  %v986_v45 = vsel %vm985_vm11, %v981_v54, inf }
 0x17c   : > { %987 = vmin.xlane.f32.xlu1 %v986_v45  ;;  %vm999_vm12 = vcmp.eq.f32.partialorder %v3628_v42, %v3756_v15 }
 0x17d   : > { %v1000_v19 = vsel %vm999_vm12, %v995_v48, inf  ;;  %v3761_v63 = vpop.xlane.xlu1 %1011 }
 0x17e   : > { %1001 = vmin.xlane.f32.xlu0 %v1000_v19  ;;  %vm1013_vm13 = vcmp.eq.f32.partialorder %v3644_v60, %v3761_v63 }
 0x17f   : > { %v3766_v1 = vpop.xlane.xlu0 %1025  ;;  %v1014_v20 = vsel %vm1013_vm13, %v1009_v12, inf }
 0x180   : > { %1015 = vmin.xlane.f32.xlu1 %v1014_v20  ;;  %vm1027_vm14 = vcmp.eq.f32.partialorder %v3653_v4, %v3766_v1 }
 0x181   : > { %v1028_v24 = vsel %vm1027_vm14, %v1023_v61, inf  ;;  %v3770_v42 = vpop.xlane.xlu1 %1039 }
 0x182   : > { %1029 = vmin.xlane.f32.xlu0 %v1028_v24  ;;  %vm1041_vm15 = vcmp.eq.f32.partialorder %v3655_v5, %v3770_v42 }
 0x183   : > { %v1042_v16 = vsel %vm1041_vm15, %v1037_v55, inf }
 0x184   : > { %1043 = vmin.xlane.f32.xlu1 %v1042_v16 }
 0x1b3   : > { %v2983_v59 = vpop.f32.mrf.mxu0 }
 0x1b5   : > { %v2984_v60 = vpop.f32.mrf.mxu0 }
 0x1b6   : > { %v3774_v47 = vadd.f32 %v2984_v60, %v2983_v59 }
 0x1b7   : > { %v2986_v18 = vpop.f32.mrf.mxu0 }
 0x1b8   : > { %6578 = vst [vmem:[#allocation12_spill] sm:$0xff] %v3774_v47  ;;  %567 = vrot.lane.b32.xlu0 %v3774_v47, %s3283_s14  ;;  %3151 = vrcp.f32 %v3774_v47 }
 0x1b9   : > { %v2987_v4 = vpop.f32.mrf.mxu0 }
 0x1ba   : > { %v3778_v62 = vadd.f32 %v2987_v4, %v2986_v18 }
 0x1bb   : > { %v2989_v14 = vpop.f32.mrf.mxu0 }
 0x1bc   : > { %6579 = vst [vmem:[#allocation13_spill] sm:$0xff] %v3778_v62  ;;  %569 = vrot.lane.b32.xlu1 %v3778_v62, %s3283_s14  ;;  %3153 = vrcp.f32 %v3778_v62 }
 0x1bd   : > { %v2990_v5 = vpop.f32.mrf.mxu0  ;;  %v3007_v6 = vpop.f32.mrf.mxu1 }
 0x1be   : > { %v3794_v54 = vadd.f32 %v2990_v5, %v2989_v14 }
 0x1bf   : > { %v2992_v9 = vpop.f32.mrf.mxu0  ;;  %v3008_v56 = vpop.f32.mrf.mxu1 }
 0x1c0   : > { %v3783_v31 = vadd.f32 %v3008_v56, %v3007_v6  ;;  %6583 = vst [vmem:[#allocation17_spill] sm:$0xff] %v3794_v54 }
 0x1c1   : > { %v2993_v17 = vpop.f32.mrf.mxu0  ;;  %v3010_v32 = vpop.f32.mrf.mxu1 }
 0x1c2   : > { %6580 = vst [vmem:[#allocation14_spill] sm:$0xff] %v3783_v31  ;;  %583 = vrot.lane.b32.xlu0 %v3783_v31, %s3283_s14  ;;  %v3803_v52 = vadd.f32 %v2993_v17, %v2992_v9 }
 0x1c3   : > { %v2995_v27 = vpop.f32.mrf.mxu0  ;;  %v3011_v28 = vpop.f32.mrf.mxu1 }
 0x1c4   : > { %v3788_v22 = vadd.f32 %v3011_v28, %v3010_v32  ;;  %6585 = vst [vmem:[#allocation19_spill] sm:$0xff] %v3803_v52 }
 0x1c5   : > { %v2996_v36 = vpop.f32.mrf.mxu0  ;;  %v3013_v34 = vpop.f32.mrf.mxu1 }
 0x1c6   : > { %6581 = vst [vmem:[#allocation15_spill] sm:$0xff] %v3788_v22  ;;  %v3790_v11 = vadd.f32 %v2996_v36, %v2995_v27  ;;  %585 = vrot.lane.b32.xlu1 %v3788_v22, %s3283_s14  ;;  %v3152_v45 = vpop.eup %3151 }
 0x1c7   : > { %v2998_v44 = vpop.f32.mrf.mxu0  ;;  %v3014_v50 = vpop.f32.mrf.mxu1  ;;  %v647_v20 = vmul.f32 %v3152_v45, %v3774_v47 }
 0x1c8   : > { %6582 = vst [vmem:[#allocation16_spill] sm:$0xff] %v3790_v11  ;;  %3155 = vrcp.f32 %v3790_v11  ;;  %v3797_v39 = vadd.f32 %v3014_v50, %v3013_v34 }
 0x1c9   : > { %v2999_v48 = vpop.f32.mrf.mxu0  ;;  %v3016_v0 = vpop.f32.mrf.mxu1  ;;  %3157 = vrcp.f32 %v3794_v54  ;;  %v663_v18 = vsub.f32 2.0, %v647_v20 }
 0x1ca   : > { %6584 = vst [vmem:[#allocation18_spill] sm:$0xff] %v3797_v39  ;;  %571 = vrot.lane.b32.xlu1 %v3794_v54, %s3283_s14  ;;  %587 = vrot.lane.b32.xlu0 %v3797_v39, %s3283_s14  ;;  %v3154_v4 = vpop.eup %3153  ;;  %v3822_v6 = vadd.f32 %v2999_v48, %v2998_v44 }
 0x1cb   : > { %v3001_v19 = vpop.f32.mrf.mxu0  ;;  %v3017_v12 = vpop.f32.mrf.mxu1  ;;  %v679_v56 = vmul.f32 %v3152_v45, %v663_v18  ;;  %v648_v17 = vmul.f32 %v3154_v4, %v3778_v62 }
 0x1cc   : > { %v3814_v59 = vadd.f32 %v3017_v12, %v3016_v0  ;;  %6589 = vst [vmem:[#allocation23_spill] sm:$0xff] %v3822_v6 }
 0x1cd   : > { %v3002_v61 = vpop.f32.mrf.mxu0  ;;  %v3019_v24 = vpop.f32.mrf.mxu1  ;;  %v664_v44 = vsub.f32 2.0, %v648_v17 }
 0x1ce   : > { %v3806_v55 = vadd.f32 %v3002_v61, %v3001_v19  ;;  %573 = vrot.lane.b32.xlu1 %v3803_v52, %s3283_s14  ;;  %575 = vrot.lane.b32.xlu0 %v3790_v11, %s3283_s14  ;;  %6587 = vst [vmem:[#allocation21_spill] sm:$0xff] %v3814_v59 }
 0x1cf   : > { %v3020_v16 = vpop.f32.mrf.mxu1  ;;  %v3004_v14 = vpop.f32.mrf.mxu0  ;;  %v680_v19 = vmul.f32 %v3154_v4, %v664_v44 }
 0x1d0   : > { %6586 = vst [vmem:[#allocation20_spill] sm:$0xff] %v3806_v55  ;;  %3159 = vrcp.f32 %v3806_v55  ;;  %v3816_v60 = vadd.f32 %v3020_v16, %v3019_v24 }
 0x1d1   : > { %v3022_v5 = vpop.f32.mrf.mxu1  ;;  %3161 = vrcp.f32 %v3803_v52  ;;  %v3005_v27 = vpop.f32.mrf.mxu0 }
 0x1d2   : > { %6588 = vst [vmem:[#allocation22_spill] sm:$0xff] %v3816_v60  ;;  %589 = vrot.lane.b32.xlu1 %v3814_v59, %s3283_s14  ;;  %591 = vrot.lane.b32.xlu0 %v3816_v60, %s3283_s14  ;;  %3163 = vrcp.f32 %v3822_v6  ;;  %v3830_v36 = vadd.f32 %v3005_v27, %v3004_v14 }
 0x1d3   : > { %v3023_v9 = vpop.f32.mrf.mxu1 }
 0x1d4   : > { %6590 = vst [vmem:[#allocation24_spill] sm:$0xff] %v3830_v36  ;;  %v3832_v34 = vadd.f32 %v3023_v9, %v3022_v5  ;;  %3165 = vrcp.f32 %v3830_v36 }
 0x1d5   : > { %v3156_v32 = vpop.eup %3155  ;;  %v3025_v28 = vpop.f32.mrf.mxu1  ;;  %3167 = vrcp.f32 %v3783_v31 }
 0x1d6   : > { %577 = vrot.lane.b32.xlu1 %v3822_v6, %s3283_s14  ;;  %711 = vrot.lane.b32.xlu0 %v679_v56, %s3284_s15  ;;  %6591 = vst [vmem:[#allocation25_spill] sm:$0xff] %v3832_v34  ;;  %v651_v50 = vmul.f32 %v3156_v32, %v3790_v11  ;;  %v3158_v48 = vpop.eup %3157  ;;  %3169 = vrcp.f32 %v3788_v22 }
 0x1d7   : > { %v3026_v45 = vpop.f32.mrf.mxu1  ;;  %v649_v14 = vmul.f32 %v3158_v48, %v3794_v54  ;;  %3171 = vrcp.f32 %v3797_v39 }
 0x1d8   : > { %v3840_v0 = vadd.f32 %v3026_v45, %v3025_v28  ;;  %v667_v12 = vsub.f32 2.0, %v651_v50  ;;  %3173 = vrcp.f32 %v3814_v59 }
 0x1d9   : > { %v3028_v61 = vpop.f32.mrf.mxu1  ;;  %v665_v27 = vsub.f32 2.0, %v649_v14  ;;  %3175 = vrcp.f32 %v3816_v60 }
 0x1da   : > { %593 = vrot.lane.b32.xlu1 %v3832_v34, %s3283_s14  ;;  %579 = vrot.lane.b32.xlu0 %v3806_v55, %s3283_s14  ;;  %6592 = vst [vmem:[#allocation26_spill] sm:$0xff] %v3840_v0  ;;  %v683_v16 = vmul.f32 %v3156_v32, %v667_v12  ;;  %3177 = vrcp.f32 %v3832_v34 }
 0x1db   : > { %v3029_v9 = vpop.f32.mrf.mxu1  ;;  %v681_v32 = vmul.f32 %v3158_v48, %v665_v27  ;;  %3179 = vrcp.f32 %v3840_v0 }
 0x1dc   : > { %v3850_v56 = vadd.f32 %v3029_v9, %v3028_v61  ;;  %v836_v9 = vcvt.f32.s32 %v3695_v35 }
 0x1dd   : > { %v3160_v20 = vpop.eup %3159 }
 0x1de   : > { %713 = vrot.lane.b32.xlu1 %v680_v19, %s3284_s15  ;;  %595 = vrot.lane.b32.xlu0 %v3840_v0, %s3283_s14  ;;  %v653_v24 = vmul.f32 %v3160_v20, %v3806_v55  ;;  %v3162_v5 = vpop.eup %3161  ;;  %6593 = vst [vmem:[#allocation27_spill] sm:$0xff] %v3850_v56  ;;  %3181 = vrcp.f32 %v3850_v56 }
 0x1df   : > { %v3164_v4 = vpop.eup %3163  ;;  %v650_v28 = vmul.f32 %v3162_v5, %v3803_v52 }
 0x1e0   : > { %v669_v18 = vsub.f32 2.0, %v653_v24  ;;  %v652_v50 = vmul.f32 %v3164_v4, %v3822_v6 }
 0x1e1   : > { %v666_v44 = vsub.f32 2.0, %v650_v28  ;;  %v3166_v45 = vpop.eup %3165  ;;  %v864_v28 = vcvt.f32.s32 %v3703_v7 }
 0x1e2   : > { %581 = vrot.lane.b32.xlu1 %v3830_v36, %s3283_s14  ;;  %719 = vrot.lane.b32.xlu0 %v683_v16, %s3284_s15  ;;  %v685_v17 = vmul.f32 %v3160_v20, %v669_v18  ;;  %v668_v12 = vsub.f32 2.0, %v652_v50  ;;  %v654_v61 = vmul.f32 %v3166_v45, %v3830_v36 }
 0x1e3   : > { %v682_v19 = vmul.f32 %v3162_v5, %v666_v44  ;;  %v837_v5 = vshll.u32 %v836_v9, 16  ;;  %v865_v50 = vshll.u32 %v864_v28, 16  ;;  %v850_v28 = vcvt.f32.s32 %v3701_v26 }
 0x1e4   : > { %v684_v24 = vmul.f32 %v3164_v4, %v668_v12  ;;  %v670_v16 = vsub.f32 2.0, %v654_v61  ;;  %v892_v4 = vcvt.f32.s32 %v3713_v43 }
 0x1e6   : > { %597 = vrot.lane.b32.xlu1 %v3850_v56, %s3283_s14  ;;  %723 = vrot.lane.b32.xlu0 %v685_v17, %s3284_s15  ;;  %v686_v14 = vmul.f32 %v3166_v45, %v670_v16  ;;  %v893_v35 = vshll.u32 %v892_v4, 16 }
 0x1ea   : > { %715 = vrot.lane.b32.xlu1 %v681_v32, %s3284_s15 }
 0x1ed   : > { %v834_v20 = vpop.xlane.xlu0 %833 }
 0x1ee   : > { %717 = vrot.lane.b32.xlu1 %v682_v19, %s3284_s15  ;;  %v835_v17 = vcvt.f32.s32 %v834_v20  ;;  %v920_v20 = vcvt.f32.s32 %v3723_v41 }
 0x1f0   : > { %v3864_v32 = vadd.s32 %v837_v5, %v835_v17 }
 0x1f1   : > { %v862_v18 = vpop.xlane.xlu0 %861  ;;  %v848_v19 = vpop.xlane.xlu1 %847 }
 0x1f2   : > { %721 = vrot.lane.b32.xlu1 %v684_v24, %s3284_s15  ;;  %6594 = vst [vmem:[#allocation28_spill] sm:$0xff] %v3864_v32  ;;  %v863_v44 = vcvt.f32.s32 %v862_v18  ;;  %vm1049_vm0 = vcmp.eq.s32.totalorder %v3477_v33, %v3864_v32  ;;  %v849_v4 = vcvt.f32.s32 %v848_v19 }
 0x1f3   : > { %v3873_v24 = vsel %vm1049_vm0, -1.0, %v3564_v40 }
 0x1f4   : > { %v3867_v61 = vadd.s32 %v865_v50, %v863_v44 }
 0x1f5   : > { %v890_v48 = vpop.xlane.xlu0 %889  ;;  %v876_v7 = vpop.xlane.xlu1 %875 }
 0x1f6   : > { %725 = vrot.lane.b32.xlu1 %v686_v14, %s3284_s15  ;;  %6595 = vst [vmem:[#allocation29_spill] sm:$0xff] %v3867_v61  ;;  %v891_v45 = vcvt.f32.s32 %v890_v48  ;;  %vm1051_vm1 = vcmp.eq.s32.totalorder %v3477_v33, %v3867_v61  ;;  %v921_v14 = vshll.u32 %v920_v20, 16  ;;  %v948_v48 = vcvt.f32.s32 %v3733_v8 }
 0x1f7   : > { %v3882_v9 = vsel %vm1051_vm1, -1.0, %v3550_v29  ;;  %v877_v19 = vcvt.f32.s32 %v876_v7 }
 0x1f8   : > { %v3875_v16 = vadd.s32 %v893_v35, %v891_v45  ;;  %v949_v17 = vshll.u32 %v948_v48, 16  ;;  %v1004_v45 = vcvt.f32.s32 %v3756_v15  ;;  %v878_v35 = vcvt.f32.s32 %v3711_v51 }
 0x1f9   : > { %v918_v27 = vpop.xlane.xlu0 %917  ;;  %v904_v5 = vpop.xlane.xlu1 %903  ;;  %v1032_v48 = vcvt.f32.s32 %v3766_v1 }
 0x1fa   : > { %6596 = vst [vmem:[#allocation30_spill] sm:$0xff] %v3875_v16  ;;  %v919_v18 = vcvt.f32.s32 %v918_v27  ;;  %vm1053_vm2 = vcmp.eq.s32.totalorder %v3477_v33, %v3875_v16  ;;  %v976_v27 = vcvt.f32.s32 %v3743_v37  ;;  %v851_v37 = vshll.u32 %v850_v28, 16 }
 0x1fb   : > { %v3892_v8 = vsel %vm1053_vm2, -1.0, %v3617_v25  ;;  %v1005_v15 = vshll.u32 %v1004_v45, 16  ;;  %v879_v51 = vshll.u32 %v878_v35, 16  ;;  %v905_v7 = vcvt.f32.s32 %v904_v5  ;;  %v6605_v35 = vld [vmem:[#allocation8_spill] sm:$0xff] }
 0x1fc   : > { %v3884_v41 = vadd.s32 %v921_v14, %v919_v18  ;;  %v1033_v1 = vshll.u32 %v1032_v48, 16 }
 0x1fd   : > { %v946_v12 = vpop.xlane.xlu0 %945  ;;  %v932_v25 = vpop.xlane.xlu1 %931  ;;  %v3921_v28 = vadd.s32 %v879_v51, %v877_v19 }
 0x1fe   : > { %6597 = vst [vmem:[#allocation31_spill] sm:$0xff] %v3884_v41  ;;  %v947_v40 = vcvt.f32.s32 %v946_v12  ;;  %vm1055_vm3 = vcmp.eq.s32.totalorder %v3477_v33, %v3884_v41  ;;  %v977_v12 = vshll.u32 %v976_v27, 16  ;;  %v933_v45 = vcvt.f32.s32 %v932_v25 }
 0x1ff   : > { %v3902_v26 = vsel %vm1055_vm3, -1.0, %v3631_v53  ;;  %v906_v53 = vcvt.f32.s32 %v3721_v2  ;;  %6602 = vst [vmem:[#allocation36_spill] sm:$0xff] %v3921_v28  ;;  %vm1052_vm8 = vcmp.eq.s32.totalorder %v3477_v33, %v3921_v28 }
 0x200   : > { %v3894_v29 = vadd.s32 %v949_v17, %v947_v40 }
 0x201   : > { %v974_v43 = vpop.xlane.xlu0 %973  ;;  %v907_v2 = vshll.u32 %v906_v53, 16 }
 0x202   : > { %6598 = vst [vmem:[#allocation32_spill] sm:$0xff] %v3894_v29  ;;  %v975_v50 = vcvt.f32.s32 %v974_v43  ;;  %vm1057_vm4 = vcmp.eq.s32.totalorder %v3477_v33, %v3894_v29  ;;  %v3909_v43 = vadd.s32 %v851_v37, %v849_v4 }
 0x203   : > { %v3914_v40 = vsel %vm1057_vm4, -1.0, %v3648_v3  ;;  %v934_v3 = vcvt.f32.s32 %v3731_v57  ;;  %v3937_v5 = vadd.s32 %v907_v2, %v905_v7  ;;  %v962_v57 = vcvt.f32.s32 %v3741_v23 }
 0x204   : > { %v3904_v20 = vadd.s32 %v977_v12, %v975_v50  ;;  %6600 = vst [vmem:[#allocation34_spill] sm:$0xff] %v3909_v43  ;;  %vm1050_vm6 = vcmp.eq.s32.totalorder %v3477_v33, %v3909_v43  ;;  %v990_v23 = vcvt.f32.s32 %v3751_v38  ;;  %v1018_v38 = vcvt.f32.s32 %v3761_v63 }
 0x205   : > { %1081 = vmax.xlane.f32.xlu0 %v3873_v24  ;;  %v3933_v12 = vsel %vm1050_vm6, -1.0, %v3576_v46  ;;  %6604 = vst [vmem:[#allocation38_spill] sm:$0xff] %v3937_v5  ;;  %vm1054_vm10 = vcmp.eq.s32.totalorder %v3477_v33, %v3937_v5 }
 0x206   : > { %6599 = vst [vmem:[#allocation33_spill] sm:$0xff] %v3904_v20  ;;  %vm1059_vm5 = vcmp.eq.s32.totalorder %v3477_v33, %v3904_v20  ;;  %v991_v7 = vshll.u32 %v990_v23, 16  ;;  %v1019_v2 = vshll.u32 %v1018_v38, 16 }
 0x207   : > { %v1002_v44 = vpop.xlane.xlu0 %1001  ;;  %v3927_v50 = vsel %vm1059_vm5, -1.0, %v3661_v21  ;;  %v935_v21 = vshll.u32 %v934_v3, 16  ;;  %v6610_v3 = vld [vmem:[#allocation10_spill] sm:$0xff] }
 0x208   : > { %v1003_v18 = vcvt.f32.s32 %v1002_v44  ;;  %v960_v44 = vpop.xlane.xlu1 %959 }
 0x209   : > { %1085 = vmax.xlane.f32.xlu0 %v3882_v9  ;;  %v3953_v25 = vadd.s32 %v935_v21, %v933_v45  ;;  %v961_v19 = vcvt.f32.s32 %v960_v44  ;;  %v3168_v21 = vpop.eup %3167 }
 0x20a   : > { %v3916_v17 = vadd.s32 %v1005_v15, %v1003_v18  ;;  %v3949_v18 = vsel %vm1052_vm8, -1.0, %v6605_v35  ;;  %v6607_v15 = vld [vmem:[#allocation9_spill] sm:$0xff]  ;;  %v3170_v23 = vpop.eup %3169 }
 0x20b   : > { %v1030_v14 = vpop.xlane.xlu0 %1029  ;;  %6606 = vst [vmem:[#allocation8_spill] sm:$0xff] %v3953_v25  ;;  %v3964_v48 = vsel %vm1054_vm10, -1.0, %v6607_v15  ;;  %vm1056_vm11 = vcmp.eq.s32.totalorder %v3477_v33, %v3953_v25  ;;  %v656_v15 = vmul.f32 %v3170_v23, %v3788_v22 }
 0x20c   : > { %6601 = vst [vmem:[#allocation35_spill] sm:$0xff] %v3916_v17  ;;  %v1031_v27 = vcvt.f32.s32 %v1030_v14  ;;  %vm1061_vm7 = vcmp.eq.s32.totalorder %v3477_v33, %v3916_v17  ;;  %v988_v46 = vpop.xlane.xlu1 %987 }
 0x20d   : > { %1089 = vmax.xlane.f32.xlu0 %v3892_v8  ;;  %v3944_v37 = vsel %vm1061_vm7, -1.0, %v3673_v49  ;;  %v963_v49 = vshll.u32 %v962_v57, 16  ;;  %v989_v53 = vcvt.f32.s32 %v988_v46  ;;  %v655_v46 = vmul.f32 %v3168_v21, %v3783_v31 }
 0x20e   : > { %v3929_v4 = vadd.s32 %v1033_v1, %v1031_v27 }
 0x20f   : > { %v3966_v51 = vadd.s32 %v963_v49, %v961_v19  ;;  %v3975_v1 = vadd.s32 %v991_v7, %v989_v53  ;;  %v671_v19 = vsub.f32 2.0, %v655_v46  ;;  %v672_v53 = vsub.f32 2.0, %v656_v15 }
 0x210   : > { %6603 = vst [vmem:[#allocation37_spill] sm:$0xff] %v3929_v4  ;;  %vm1063_vm9 = vcmp.eq.s32.totalorder %v3477_v33, %v3929_v4  ;;  %v1016_v27 = vpop.xlane.xlu1 %1015 }
 0x211   : > { %1093 = vmax.xlane.f32.xlu0 %v3902_v26  ;;  %v3960_v14 = vsel %vm1063_vm9, -1.0, %v3683_v30  ;;  %6608 = vst [vmem:[#allocation9_spill] sm:$0xff] %v3966_v51  ;;  %v3973_v30 = vsel %vm1056_vm11, -1.0, %v3622_v10  ;;  %6609 = vst [vmem:[#allocation39_spill] sm:$0xff] %v3975_v1  ;;  %v1017_v44 = vcvt.f32.s32 %v1016_v27  ;;  %vm1058_vm12 = vcmp.eq.s32.totalorder %v3477_v33, %v3966_v51  ;;  %v6612_v10 = vld [vmem:[#allocation11_spill] sm:$0xff] }
 0x212   : > { %v3982_v45 = vsel %vm1058_vm12, -1.0, %v6610_v3  ;;  %vm1060_vm13 = vcmp.eq.s32.totalorder %v3477_v33, %v3975_v1  ;;  %v687_v49 = vmul.f32 %v3168_v21, %v671_v19  ;;  %v688_v27 = vmul.f32 %v3170_v23, %v672_v53 }
 0x213   : > { %v3984_v57 = vadd.s32 %v1019_v2, %v1017_v44  ;;  %v3990_v63 = vsel %vm1060_vm13, -1.0, %v6612_v10  ;;  %v1046_v2 = vcvt.f32.s32 %v3770_v42 }
 0x214   : > { %v1044_v7 = vpop.xlane.xlu1 %1043 }
 0x215   : > { %1097 = vmax.xlane.f32.xlu0 %v3914_v40  ;;  %6611 = vst [vmem:[#allocation10_spill] sm:$0xff] %v3984_v57  ;;  %vm1062_vm14 = vcmp.eq.s32.totalorder %v3477_v33, %v3984_v57  ;;  %v1045_v3 = vcvt.f32.s32 %v1044_v7  ;;  %v1047_v10 = vshll.u32 %v1046_v2, 16 }
 0x216   : > { %v3997_v35 = vsel %vm1062_vm14, -1.0, %v3675_v13 }
 0x217   : > { %v4014_v19 = vadd.s32 %v1047_v10, %v1045_v3 }
 0x219   : > { %1101 = vmax.xlane.f32.xlu0 %v3927_v50  ;;  %6617 = vst [vmem:[#allocation43_spill] sm:$0xff] %v4014_v19  ;;  %vm1064_vm15 = vcmp.eq.s32.totalorder %v3477_v33, %v4014_v19 }
 0x21a   : > { %1083 = vmax.xlane.f32.xlu1 %v3933_v12  ;;  %v4025_v53 = vsel %vm1064_vm15, -1.0, %v3686_v58 }
 0x21d   : > { %1105 = vmax.xlane.f32.xlu0 %v3944_v37 }
 0x21e   : > { %1087 = vmax.xlane.f32.xlu1 %v3949_v18 }
 0x221   : > { %1109 = vmax.xlane.f32.xlu0 %v3960_v14 }
 0x222   : > { %1091 = vmax.xlane.f32.xlu1 %v3964_v48 }
 0x226   : > { %1095 = vmax.xlane.f32.xlu1 %v3973_v30 }
 0x22a   : > { %1099 = vmax.xlane.f32.xlu1 %v3982_v45  ;;  %v4007_v13 = vpop.permute.xlu0 %567 }
 0x22e   : > { %1103 = vmax.xlane.f32.xlu1 %v3990_v63  ;;  %v4003_v38 = vpop.permute.xlu1 %569 }
 0x22f   : > { %6613 = vst [vmem:[#allocation11_spill] sm:$0xff] %v4003_v38 }
 0x232   : > { %1107 = vmax.xlane.f32.xlu1 %v3997_v35 }
 0x234   : > { %v4010_v21 = vpop.permute.xlu0 %583 }
 0x235   : > { %6615 = vst [vmem:[#allocation41_spill] sm:$0xff] %v4010_v21 }
 0x237   : > { %727 = vrot.lane.b32.xlu0 %v687_v49, %s3284_s15 }
 0x238   : > { %v4005_v44 = vpop.permute.xlu1 %585 }
 0x239   : > { %6614 = vst [vmem:[#allocation40_spill] sm:$0xff] %v4005_v44 }
 0x23c   : > { %v4012_v46 = vpop.permute.xlu1 %571  ;;  %v4016_v49 = vpop.permute.xlu0 %587 }
 0x23d   : > { %6616 = vst [vmem:[#allocation42_spill] sm:$0xff] %v4012_v46  ;;  %6618 = vst [vmem:[#allocation44_spill] sm:$0xff] %v4016_v49 }
 0x240   : > { %v4018_v23 = vpop.permute.xlu1 %573  ;;  %v4022_v15 = vpop.permute.xlu0 %575 }
 0x241   : > { %6619 = vst [vmem:[#allocation45_spill] sm:$0xff] %v4018_v23  ;;  %6620 = vst [vmem:[#allocation46_spill] sm:$0xff] %v4022_v15 }
 0x243   : > { %729 = vrot.lane.b32.xlu1 %v688_v27, %s3284_s15 }
 0x244   : > { %v4028_v42 = vpop.permute.xlu1 %589  ;;  %v4030_v27 = vpop.permute.xlu0 %591 }
 0x245   : > { %6621 = vst [vmem:[#allocation47_spill] sm:$0xff] %v4028_v42  ;;  %6622 = vst [vmem:[#allocation48_spill] sm:$0xff] %v4030_v27 }
 0x248   : > { %v4032_v7 = vpop.permute.xlu1 %577  ;;  %v4034_v2 = vpop.permute.xlu0 %711 }
 0x249   : > { %6623 = vst [vmem:[#allocation49_spill] sm:$0xff] %v4032_v7  ;;  %6624 = vst [vmem:[#allocation50_spill] sm:$0xff] %v4034_v2 }
 0x24c   : > { %v4036_v3 = vpop.permute.xlu1 %593  ;;  %v4038_v10 = vpop.permute.xlu0 %579 }
 0x24d   : > { %6625 = vst [vmem:[#allocation51_spill] sm:$0xff] %v4036_v3  ;;  %6626 = vst [vmem:[#allocation52_spill] sm:$0xff] %v4038_v10 }
 0x250   : > { %v4040_v49 = vpop.permute.xlu1 %713  ;;  %v4042_v22 = vpop.permute.xlu0 %595 }
 0x251   : > { %6627 = vst [vmem:[#allocation53_spill] sm:$0xff] %v4040_v49  ;;  %6628 = vst [vmem:[#allocation54_spill] sm:$0xff] %v4042_v22 }
 0x254   : > { %v4044_v58 = vpop.permute.xlu1 %581  ;;  %v4046_v44 = vpop.permute.xlu0 %719 }
 0x255   : > { %6629 = vst [vmem:[#allocation55_spill] sm:$0xff] %v4044_v58  ;;  %6630 = vst [vmem:[#allocation56_spill] sm:$0xff] %v4046_v44 }
 0x258   : > { %v4048_v31 = vpop.permute.xlu1 %597  ;;  %v4050_v42 = vpop.permute.xlu0 %723 }
 0x259   : > { %6631 = vst [vmem:[#allocation57_spill] sm:$0xff] %v4048_v31  ;;  %6632 = vst [vmem:[#allocation58_spill] sm:$0xff] %v4050_v42 }
 0x25c   : > { %v4052_v27 = vpop.permute.xlu1 %715 }
 0x25d   : > { %6633 = vst [vmem:[#allocation59_spill] sm:$0xff] %v4052_v27 }
 0x260   : > { %v4064_v58 = vpop.permute.xlu1 %717 }
 0x261   : > { %6636 = vst [vmem:[#allocation62_spill] sm:$0xff] %v4064_v58 }
 0x267   : > { %1111 = vmax.xlane.f32.xlu1 %v4025_v53 }
 0x28e   : > { %v4054_v21 = vpop.xlane.xlu0 %1081 }
 0x28f   : > { %6634 = vst [vmem:[#allocation60_spill] sm:$0xff] %v4054_v21  ;;  %vm1113_vm0 = vcmp.eq.f32.partialorder %v3873_v24, %v4054_v21 }
 0x290   : > { %v4059_v3 = vsel %vm1113_vm0, %v3477_v33, 128 }
 0x291   : > { %v1146_v22 = vshra.s32 %v4059_v3, 16 }
 0x292   : > { %v4062_v36 = vpop.xlane.xlu0 %1085 }
 0x293   : > { %6635 = vst [vmem:[#allocation61_spill] sm:$0xff] %v4062_v36  ;;  %vm1115_vm1 = vcmp.eq.f32.partialorder %v3882_v9, %v4062_v36  ;;  %v4068_v31 = vcvt.s32.f32 %v1146_v22  ;;  %v4084_v36 = vpop.permute.xlu1 %721 }
 0x294   : > { %v4071_v42 = vsel %vm1115_vm1, %v3477_v33, 128  ;;  %6638 = vst [vmem:[#allocation64_spill] sm:$0xff] %v4084_v36 }
 0x295   : > { %1149 = vmin.xlane.f32.xlu0 %v4068_v31  ;;  %v1174_v21 = vshra.s32 %v4071_v42, 16 }
 0x296   : > { %v4075_v55 = vpop.xlane.xlu0 %1089 }
 0x297   : > { %6637 = vst [vmem:[#allocation63_spill] sm:$0xff] %v4075_v55  ;;  %vm1117_vm2 = vcmp.eq.f32.partialorder %v3892_v8, %v4075_v55  ;;  %v4079_v10 = vcvt.s32.f32 %v1174_v21  ;;  %v4101_v36 = vpop.permute.xlu1 %725 }
 0x298   : > { %v4082_v6 = vsel %vm1117_vm2, %v3477_v33, 128  ;;  %6641 = vst [vmem:[#allocation67_spill] sm:$0xff] %v4101_v36 }
 0x299   : > { %1177 = vmin.xlane.f32.xlu0 %v4079_v10  ;;  %v1202_v22 = vshra.s32 %v4082_v6, 16 }
 0x29a   : > { %v4088_v7 = vpop.xlane.xlu0 %1093 }
 0x29b   : > { %6639 = vst [vmem:[#allocation65_spill] sm:$0xff] %v4088_v7  ;;  %vm1119_vm3 = vcmp.eq.f32.partialorder %v3902_v26, %v4088_v7  ;;  %v4092_v19 = vcvt.s32.f32 %v1202_v22 }
 0x29c   : > { %v4095_v55 = vsel %vm1119_vm3, %v3477_v33, 128 }
 0x29d   : > { %1205 = vmin.xlane.f32.xlu0 %v4092_v19  ;;  %v1230_v21 = vshra.s32 %v4095_v55, 16 }
 0x29e   : > { %v4099_v57 = vpop.xlane.xlu0 %1097 }
 0x29f   : > { %6640 = vst [vmem:[#allocation66_spill] sm:$0xff] %v4099_v57  ;;  %vm1121_vm4 = vcmp.eq.f32.partialorder %v3914_v40, %v4099_v57  ;;  %v4105_v1 = vcvt.s32.f32 %v1230_v21 }
 0x2a0   : > { %v4108_v7 = vsel %vm1121_vm4, %v3477_v33, 128 }
 0x2a1   : > { %1233 = vmin.xlane.f32.xlu0 %v4105_v1  ;;  %v1258_v22 = vshra.s32 %v4108_v7, 16 }
 0x2a2   : > { %v4112_v51 = vpop.xlane.xlu0 %1101 }
 0x2a3   : > { %6642 = vst [vmem:[#allocation68_spill] sm:$0xff] %v4112_v51  ;;  %vm1123_vm5 = vcmp.eq.f32.partialorder %v3927_v50, %v4112_v51  ;;  %v4116_v25 = vpop.xlane.xlu1 %1083  ;;  %v4118_v36 = vcvt.s32.f32 %v1258_v22 }
 0x2a4   : > { %6643 = vst [vmem:[#allocation69_spill] sm:$0xff] %v4116_v25  ;;  %vm1114_vm6 = vcmp.eq.f32.partialorder %v3933_v12, %v4116_v25  ;;  %v4123_v21 = vsel %vm1123_vm5, %v3477_v33, 128 }
 0x2a5   : > { %1261 = vmin.xlane.f32.xlu0 %v4118_v36  ;;  %v1286_v57 = vshra.s32 %v4123_v21, 16  ;;  %v4128_v4 = vsel %vm1114_vm6, %v3477_v33, 128 }
 0x2a6   : > { %v4130_v5 = vpop.xlane.xlu0 %1105  ;;  %v1160_v51 = vshra.s32 %v4128_v4, 16 }
 0x2a7   : > { %6644 = vst [vmem:[#allocation70_spill] sm:$0xff] %v4130_v5  ;;  %vm1125_vm7 = vcmp.eq.f32.partialorder %v3944_v37, %v4130_v5  ;;  %v4135_v22 = vpop.xlane.xlu1 %1087  ;;  %v4137_v25 = vcvt.s32.f32 %v1286_v57 }
 0x2a8   : > { %6645 = vst [vmem:[#allocation71_spill] sm:$0xff] %v4135_v22  ;;  %v4140_v17 = vsel %vm1125_vm7, %v3477_v33, 128  ;;  %vm1116_vm8 = vcmp.eq.f32.partialorder %v3949_v18, %v4135_v22  ;;  %v4144_v28 = vcvt.s32.f32 %v1160_v51 }
 0x2a9   : > { %1289 = vmin.xlane.f32.xlu0 %v4137_v25  ;;  %v1314_v20 = vshra.s32 %v4140_v17, 16  ;;  %v4149_v43 = vsel %vm1116_vm8, %v3477_v33, 128 }
 0x2aa   : > { %1163 = vmin.xlane.f32.xlu1 %v4144_v28  ;;  %v4152_v5 = vpop.xlane.xlu0 %1109  ;;  %v1188_v57 = vshra.s32 %v4149_v43, 16 }
 0x2ab   : > { %6646 = vst [vmem:[#allocation72_spill] sm:$0xff] %v4152_v5  ;;  %vm1127_vm9 = vcmp.eq.f32.partialorder %v3960_v14, %v4152_v5  ;;  %v4157_v29 = vpop.xlane.xlu1 %1091  ;;  %v4159_v51 = vcvt.s32.f32 %v1314_v20 }
 0x2ac   : > { %6647 = vst [vmem:[#allocation73_spill] sm:$0xff] %v4157_v29  ;;  %v4162_v22 = vsel %vm1127_vm9, %v3477_v33, 128  ;;  %vm1118_vm10 = vcmp.eq.f32.partialorder %v3964_v48, %v4157_v29  ;;  %v4166_v41 = vcvt.s32.f32 %v1188_v57 }
 0x2ad   : > { %v4170_v16 = vsel %vm1118_vm10, %v3477_v33, 128  ;;  %1317 = vmin.xlane.f32.xlu0 %v4159_v51  ;;  %v1342_v5 = vshra.s32 %v4162_v22, 16 }
 0x2ae   : > { %1191 = vmin.xlane.f32.xlu1 %v4166_v41  ;;  %v1216_v20 = vshra.s32 %v4170_v16, 16 }
 0x2af   : > { %v4176_v61 = vpop.xlane.xlu1 %1095  ;;  %v4178_v32 = vcvt.s32.f32 %v1342_v5 }
 0x2b0   : > { %6648 = vst [vmem:[#allocation74_spill] sm:$0xff] %v4176_v61  ;;  %vm1120_vm11 = vcmp.eq.f32.partialorder %v3973_v30, %v4176_v61  ;;  %v4182_v57 = vcvt.s32.f32 %v1216_v20 }
 0x2b1   : > { %v4185_v29 = vsel %vm1120_vm11, %v3477_v33, 128  ;;  %1345 = vmin.xlane.f32.xlu0 %v4178_v32 }
 0x2b2   : > { %1219 = vmin.xlane.f32.xlu1 %v4182_v57  ;;  %v1244_v58 = vshra.s32 %v4185_v29, 16 }
 0x2b3   : > { %v4190_v52 = vpop.xlane.xlu1 %1099 }
 0x2b4   : > { %6649 = vst [vmem:[#allocation75_spill] sm:$0xff] %v4190_v52  ;;  %vm1122_vm12 = vcmp.eq.f32.partialorder %v3982_v45, %v4190_v52  ;;  %v4194_v5 = vcvt.s32.f32 %v1244_v58  ;;  %v3172_v58 = vpop.eup %3171 }
 0x2b5   : > { %v4197_v61 = vsel %vm1122_vm12, %v3477_v33, 128  ;;  %v3174_v38 = vpop.eup %3173 }
 0x2b6   : > { %1247 = vmin.xlane.f32.xlu1 %v4194_v5  ;;  %v1272_v20 = vshra.s32 %v4197_v61, 16 }
 0x2b7   : > { %v4201_v23 = vpop.xlane.xlu1 %1103 }
 0x2b8   : > { %6650 = vst [vmem:[#allocation76_spill] sm:$0xff] %v4201_v23  ;;  %vm1124_vm13 = vcmp.eq.f32.partialorder %v3990_v63, %v4201_v23  ;;  %v4205_v44 = vcvt.s32.f32 %v1272_v20  ;;  %v657_v23 = vmul.f32 %v3172_v58, %v3797_v39 }
 0x2b9   : > { %v4209_v52 = vsel %vm1124_vm13, %v3477_v33, 128 }
 0x2ba   : > { %1275 = vmin.xlane.f32.xlu1 %v4205_v44  ;;  %v1300_v11 = vshra.s32 %v4209_v52, 16  ;;  %v673_v49 = vsub.f32 2.0, %v657_v23 }
 0x2bb   : > { %v4213_v15 = vpop.xlane.xlu1 %1107 }
 0x2bc   : > { %6651 = vst [vmem:[#allocation77_spill] sm:$0xff] %v4213_v15  ;;  %vm1126_vm14 = vcmp.eq.f32.partialorder %v3997_v35, %v4213_v15  ;;  %v4217_v27 = vcvt.s32.f32 %v1300_v11  ;;  %v689_v62 = vmul.f32 %v3172_v58, %v673_v49  ;;  %v658_v11 = vmul.f32 %v3174_v38, %v3814_v59 }
 0x2bd   : > { %v4220_v20 = vsel %vm1126_vm14, %v3477_v33, 128 }
 0x2be   : > { %1303 = vmin.xlane.f32.xlu1 %v4217_v27  ;;  %v1328_v54 = vshra.s32 %v4220_v20, 16  ;;  %v674_v15 = vsub.f32 2.0, %v658_v11 }
 0x2bf   : > { %v4231_v39 = vpop.permute.xlu1 %729 }
 0x2c0   : > { %v4225_v46 = vcvt.s32.f32 %v1328_v54  ;;  %v690_v2 = vmul.f32 %v3174_v38, %v674_v15  ;;  %6652 = vst [vmem:[#allocation78_spill] sm:$0xff] %v4231_v39  ;;  %v4245_v38 = vpop.permute.xlu0 %727  ;;  %v1173_v15 = vand.u32 65535, %v4071_v42  ;;  %v1229_v42 = vand.u32 65535, %v4095_v55 }
 0x2c1   : > { %6654 = vst [vmem:[#allocation80_spill] sm:$0xff] %v4245_v38  ;;  %v1285_v55 = vand.u32 65535, %v4123_v21 }
 0x2c2   : > { %1331 = vmin.xlane.f32.xlu1 %v4225_v46  ;;  %v1175_v59 = vcvt.s32.f32 %v1173_v15  ;;  %v1231_v15 = vcvt.s32.f32 %v1229_v42  ;;  %v1313_v42 = vand.u32 65535, %v4140_v17  ;;  %v1341_v17 = vand.u32 65535, %v4162_v22 }
 0x2c4   : > { %v1343_v22 = vcvt.s32.f32 %v1341_v17 }
 0x2c7   : > { %731 = vrot.lane.b32.xlu0 %v689_v62, %s3284_s15  ;;  %v1145_v62 = vand.u32 65535, %v4059_v3 }
 0x2c9   : > { %v1147_v58 = vcvt.s32.f32 %v1145_v62 }
 0x2d3   : > { %733 = vrot.lane.b32.xlu1 %v690_v2, %s3284_s15 }
 0x2f0   : > { %v4233_v47 = vpop.xlane.xlu1 %1111 }
 0x2f1   : > { %6653 = vst [vmem:[#allocation79_spill] sm:$0xff] %v4233_v47  ;;  %vm1128_vm15 = vcmp.eq.f32.partialorder %v4025_v53, %v4233_v47  ;;  %v1201_v47 = vand.u32 65535, %v4082_v6  ;;  %v1257_v6 = vand.u32 65535, %v4108_v7 }
 0x2f2   : > { %v4238_v54 = vsel %vm1128_vm15, %v3477_v33, 128 }
 0x2f3   : > { %v1356_v49 = vshra.s32 %v4238_v54, 16  ;;  %v1203_v62 = vcvt.s32.f32 %v1201_v47  ;;  %v1259_v47 = vcvt.s32.f32 %v1257_v6  ;;  %v1315_v6 = vcvt.s32.f32 %v1313_v42 }
 0x2f4   : > { %v1271_v42 = vand.u32 65535, %v4197_v61 }
 0x2f5   : > { %v4241_v23 = vcvt.s32.f32 %v1356_v49 }
 0x2f7   : > { %1359 = vmin.xlane.f32.xlu1 %v4241_v23 }
 0x31e   : > { %v4248_v2 = vpop.xlane.xlu0 %1149 }
 0x31f   : > { %vm1151_vm0 = vcmp.eq.f32.partialorder %v4068_v31, %v4248_v2 }
 0x320   : > { %v1152_v11 = vsel %vm1151_vm0, %v1147_v58, inf }
 0x321   : > { %1153 = vmin.xlane.f32.xlu0 %v1152_v11  ;;  %v1159_v11 = vand.u32 65535, %v4128_v4 }
 0x322   : > { %v4253_v49 = vpop.xlane.xlu0 %1177 }
 0x323   : > { %vm1179_vm1 = vcmp.eq.f32.partialorder %v4079_v10, %v4253_v49  ;;  %v1161_v21 = vcvt.s32.f32 %v1159_v11 }
 0x324   : > { %v1180_v3 = vsel %vm1179_vm1, %v1175_v59, inf }
 0x325   : > { %1181 = vmin.xlane.f32.xlu0 %v1180_v3  ;;  %v1287_v3 = vcvt.s32.f32 %v1285_v55 }
 0x326   : > { %v4258_v39 = vpop.xlane.xlu0 %1205 }
 0x327   : > { %vm1207_vm2 = vcmp.eq.f32.partialorder %v4092_v19, %v4258_v39 }
 0x328   : > { %v1208_v31 = vsel %vm1207_vm2, %v1203_v62, inf }
 0x329   : > { %1209 = vmin.xlane.f32.xlu0 %v1208_v31 }
 0x32a   : > { %v4263_v58 = vpop.xlane.xlu0 %1233 }
 0x32b   : > { %vm1235_vm3 = vcmp.eq.f32.partialorder %v4105_v1, %v4263_v58  ;;  %v1187_v1 = vand.u32 65535, %v4149_v43 }
 0x32c   : > { %v1236_v59 = vsel %vm1235_vm3, %v1231_v15, inf }
 0x32d   : > { %1237 = vmin.xlane.f32.xlu0 %v1236_v59  ;;  %v1189_v43 = vcvt.s32.f32 %v1187_v1 }
 0x32e   : > { %v4268_v10 = vpop.xlane.xlu0 %1261 }
 0x32f   : > { %vm1263_vm4 = vcmp.eq.f32.partialorder %v4118_v36, %v4268_v10 }
 0x330   : > { %v1264_v19 = vsel %vm1263_vm4, %v1259_v47, inf }
 0x331   : > { %1265 = vmin.xlane.f32.xlu0 %v1264_v19 }
 0x332   : > { %v4273_v7 = vpop.xlane.xlu0 %1289 }
 0x333   : > { %v4277_v62 = vpop.xlane.xlu1 %1163  ;;  %vm1291_vm5 = vcmp.eq.f32.partialorder %v4137_v25, %v4273_v7  ;;  %v1215_v25 = vand.u32 65535, %v4170_v16  ;;  %v1243_v16 = vand.u32 65535, %v4185_v29  ;;  %v1273_v29 = vcvt.s32.f32 %v1271_v42 }
 0x334   : > { %v1292_v31 = vsel %vm1291_vm5, %v1287_v3, inf  ;;  %vm1165_vm6 = vcmp.eq.f32.partialorder %v4144_v28, %v4277_v62  ;;  %v1156_v42 = vcvt.f32.s32 %v4248_v2 }
 0x335   : > { %1293 = vmin.xlane.f32.xlu0 %v1292_v31  ;;  %v1166_v36 = vsel %vm1165_vm6, %v1161_v21, inf  ;;  %v1245_v3 = vcvt.s32.f32 %v1243_v16  ;;  %v1299_v21 = vand.u32 65535, %v4209_v52  ;;  %v3176_v31 = vpop.eup %3175  ;;  %v1355_v16 = vand.u32 65535, %v4238_v54 }
 0x336   : > { %1167 = vmin.xlane.f32.xlu1 %v1166_v36  ;;  %v4283_v4 = vpop.xlane.xlu0 %1317  ;;  %v659_v17 = vmul.f32 %v3176_v31, %v3816_v60 }
 0x337   : > { %v4286_v15 = vpop.xlane.xlu1 %1191  ;;  %vm1319_vm7 = vcmp.eq.f32.partialorder %v4159_v51, %v4283_v4  ;;  %v1217_v51 = vcvt.s32.f32 %v1215_v25  ;;  %v1301_v61 = vcvt.s32.f32 %v1299_v21  ;;  %v1184_v21 = vcvt.f32.s32 %v4253_v49 }
 0x338   : > { %v1320_v59 = vsel %vm1319_vm7, %v1315_v6, inf  ;;  %vm1193_vm8 = vcmp.eq.f32.partialorder %v4166_v41, %v4286_v15  ;;  %v675_v25 = vsub.f32 2.0, %v659_v17 }
 0x339   : > { %1321 = vmin.xlane.f32.xlu0 %v1320_v59  ;;  %v1194_v28 = vsel %vm1193_vm8, %v1189_v43, inf }
 0x33a   : > { %1195 = vmin.xlane.f32.xlu1 %v1194_v28  ;;  %v4294_v55 = vpop.xlane.xlu0 %1345  ;;  %v691_v59 = vmul.f32 %v3176_v31, %v675_v25  ;;  %v3178_v28 = vpop.eup %3177 }
 0x33b   : > { %v4296_v47 = vpop.xlane.xlu1 %1219  ;;  %vm1347_vm9 = vcmp.eq.f32.partialorder %v4178_v32, %v4294_v55 }
 0x33c   : > { %v1348_v11 = vsel %vm1347_vm9, %v1343_v22, inf  ;;  %vm1221_vm10 = vcmp.eq.f32.partialorder %v4182_v57, %v4296_v47 }
 0x33d   : > { %1349 = vmin.xlane.f32.xlu0 %v1348_v11  ;;  %v1222_v41 = vsel %vm1221_vm10, %v1217_v51, inf }
 0x33e   : > { %1223 = vmin.xlane.f32.xlu1 %v1222_v41 }
 0x33f   : > { %v4303_v19 = vpop.xlane.xlu1 %1247 }
 0x340   : > { %vm1249_vm11 = vcmp.eq.f32.partialorder %v4194_v5, %v4303_v19  ;;  %v1327_v5 = vand.u32 65535, %v4220_v20  ;;  %v660_v20 = vmul.f32 %v3178_v28, %v3832_v34 }
 0x341   : > { %v1250_v1 = vsel %vm1249_vm11, %v1245_v3, inf  ;;  %v4334_v3 = vpop.permute.xlu0 %731 }
 0x342   : > { %1251 = vmin.xlane.f32.xlu1 %v1250_v1  ;;  %6656 = vst [vmem:[#allocation82_spill] sm:$0xff] %v4334_v3 }
 0x343   : > { %v4308_v32 = vpop.xlane.xlu1 %1275 }
 0x344   : > { %vm1277_vm12 = vcmp.eq.f32.partialorder %v4205_v44, %v4308_v32  ;;  %v1329_v44 = vcvt.s32.f32 %v1327_v5  ;;  %v1212_v5 = vcvt.f32.s32 %v4258_v39 }
 0x345   : > { %v1278_v57 = vsel %vm1277_vm12, %v1273_v29, inf  ;;  %v1157_v29 = vshll.u32 %v1156_v42, 16 }
 0x346   : > { %1279 = vmin.xlane.f32.xlu1 %v1278_v57  ;;  %v1213_v49 = vshll.u32 %v1212_v5, 16 }
 0x347   : > { %v4314_v36 = vpop.xlane.xlu1 %1303 }
 0x348   : > { %vm1305_vm13 = vcmp.eq.f32.partialorder %v4217_v27, %v4314_v36  ;;  %v676_v27 = vsub.f32 2.0, %v660_v20 }
 0x349   : > { %v1306_v6 = vsel %vm1305_vm13, %v1301_v61, inf  ;;  %v1185_v61 = vshll.u32 %v1184_v21, 16 }
 0x34a   : > { %1307 = vmin.xlane.f32.xlu1 %v1306_v6  ;;  %v692_v22 = vmul.f32 %v3178_v28, %v676_v27  ;;  %v1268_v28 = vcvt.f32.s32 %v4268_v10  ;;  %v1170_v10 = vcvt.f32.s32 %v4277_v62 }
 0x34b   : > { %v4320_v52 = vpop.xlane.xlu1 %1331 }
 0x34c   : > { %vm1333_vm14 = vcmp.eq.f32.partialorder %v4225_v46, %v4320_v52  ;;  %v1357_v46 = vcvt.s32.f32 %v1355_v16  ;;  %v1296_v16 = vcvt.f32.s32 %v4273_v7  ;;  %v1171_v7 = vshll.u32 %v1170_v10, 16 }
 0x34d   : > { %v1334_v43 = vsel %vm1333_vm14, %v1329_v44, inf  ;;  %v1240_v44 = vcvt.f32.s32 %v4263_v58 }
 0x34e   : > { %1335 = vmin.xlane.f32.xlu1 %v1334_v43 }
 0x34f   : > { %v4327_v51 = vpop.permute.xlu1 %733 }
 0x350   : > { %6655 = vst [vmem:[#allocation81_spill] sm:$0xff] %v4327_v51 }
 0x353   : > { %735 = vrot.lane.b32.xlu0 %v691_v59, %s3284_s15  ;;  %v1241_v59 = vshll.u32 %v1240_v44, 16 }
 0x35f   : > { %737 = vrot.lane.b32.xlu1 %v692_v22, %s3284_s15  ;;  %v1269_v22 = vshll.u32 %v1268_v28, 16 }
 0x380   : > { %v4330_v11 = vpop.xlane.xlu1 %1359 }
 0x381   : > { %vm1361_vm15 = vcmp.eq.f32.partialorder %v4241_v23, %v4330_v11 }
 0x382   : > { %v1362_v41 = vsel %vm1361_vm15, %v1357_v46, inf }
 0x383   : > { %1363 = vmin.xlane.f32.xlu1 %v1362_v41 }
 0x3aa   : > { %v1154_v1 = vpop.xlane.xlu0 %1153 }
 0x3ab   : > { %v1155_v57 = vcvt.f32.s32 %v1154_v1  ;;  %v1297_v1 = vshll.u32 %v1296_v16, 16  ;;  %v1254_v16 = vcvt.f32.s32 %v4303_v19 }
 0x3ad   : > { %v4338_v31 = vadd.s32 %v1157_v29, %v1155_v57  ;;  %v1324_v29 = vcvt.f32.s32 %v4283_v4 }
 0x3ae   : > { %v1182_v54 = vpop.xlane.xlu0 %1181 }
 0x3af   : > { %v1183_v6 = vcvt.f32.s32 %v1182_v54  ;;  %vm1449_vm0 = vcmp.eq.s32.totalorder %v3477_v33, %v4338_v31  ;;  %v1198_v54 = vcvt.f32.s32 %v4286_v15  ;;  %v1325_v4 = vshll.u32 %v1324_v29, 16 }
 0x3b0   : > { %v4344_v23 = vsel %vm1449_vm0, -1.0, %v3873_v24  ;;  %v1282_v29 = vcvt.f32.s32 %v4308_v32  ;;  %v1310_v32 = vcvt.f32.s32 %v4314_v36 }
 0x3b1   : > { %v4346_v17 = vadd.s32 %v1185_v61, %v1183_v6  ;;  %1481 = vmax.xlane.f32.xlu0 %v4344_v23  ;;  %v1199_v15 = vshll.u32 %v1198_v54, 16 }
 0x3b2   : > { %v1210_v2 = vpop.xlane.xlu0 %1209 }
 0x3b3   : > { %v1211_v43 = vcvt.f32.s32 %v1210_v2  ;;  %vm1451_vm1 = vcmp.eq.s32.totalorder %v3477_v33, %v4346_v17  ;;  %v1352_v2 = vcvt.f32.s32 %v4294_v55 }
 0x3b4   : > { %v4353_v39 = vsel %vm1451_vm1, -1.0, %v3882_v9 }
 0x3b5   : > { %v4355_v25 = vadd.s32 %v1213_v49, %v1211_v43  ;;  %1485 = vmax.xlane.f32.xlu0 %v4353_v39  ;;  %v1226_v43 = vcvt.f32.s32 %v4296_v47 }
 0x3b6   : > { %v1238_v24 = vpop.xlane.xlu0 %1237 }
 0x3b7   : > { %v1239_v20 = vcvt.f32.s32 %v1238_v24  ;;  %vm1453_vm2 = vcmp.eq.s32.totalorder %v3477_v33, %v4355_v25 }
 0x3b8   : > { %v4362_v58 = vsel %vm1453_vm2, -1.0, %v3892_v8 }
 0x3b9   : > { %v4364_v27 = vadd.s32 %v1241_v59, %v1239_v20  ;;  %1489 = vmax.xlane.f32.xlu0 %v4362_v58 }
 0x3ba   : > { %v1266_v9 = vpop.xlane.xlu0 %1265 }
 0x3bb   : > { %v1267_v46 = vcvt.f32.s32 %v1266_v9  ;;  %vm1455_vm3 = vcmp.eq.s32.totalorder %v3477_v33, %v4364_v27  ;;  %v1353_v9 = vshll.u32 %v1352_v2, 16 }
 0x3bc   : > { %v4372_v41 = vsel %vm1455_vm3, -1.0, %v3902_v26 }
 0x3bd   : > { %v4374_v42 = vadd.s32 %v1269_v22, %v1267_v46  ;;  %1493 = vmax.xlane.f32.xlu0 %v4372_v41 }
 0x3be   : > { %v1294_v8 = vpop.xlane.xlu0 %1293 }
 0x3bf   : > { %v1295_v21 = vcvt.f32.s32 %v1294_v8  ;;  %v1168_v57 = vpop.xlane.xlu1 %1167  ;;  %vm1457_vm4 = vcmp.eq.s32.totalorder %v3477_v33, %v4374_v42 }
 0x3c0   : > { %v1169_v62 = vcvt.f32.s32 %v1168_v57  ;;  %v4382_v26 = vsel %vm1457_vm4, -1.0, %v3914_v40 }
 0x3c1   : > { %v4384_v61 = vadd.s32 %v1297_v1, %v1295_v21  ;;  %1497 = vmax.xlane.f32.xlu0 %v4382_v26 }
 0x3c2   : > { %v4387_v5 = vadd.s32 %v1171_v7, %v1169_v62  ;;  %v1322_v6 = vpop.xlane.xlu0 %1321  ;;  %v1283_v62 = vshll.u32 %v1282_v29, 16  ;;  %v1366_v29 = vcvt.f32.s32 %v4330_v11 }
 0x3c3   : > { %v1323_v49 = vcvt.f32.s32 %v1322_v6  ;;  %v1196_v44 = vpop.xlane.xlu1 %1195  ;;  %vm1459_vm5 = vcmp.eq.s32.totalorder %v3477_v33, %v4384_v61 }
 0x3c4   : > { %v1197_v40 = vcvt.f32.s32 %v1196_v44  ;;  %v4394_v24 = vsel %vm1459_vm5, -1.0, %v3927_v50  ;;  %vm1450_vm6 = vcmp.eq.s32.totalorder %v3477_v33, %v4387_v5  ;;  %v1227_v50 = vshll.u32 %v1226_v43, 16 }
 0x3c5   : > { %6657 = vst [vmem:[#allocation83_spill] sm:$0xff] %v4394_v24  ;;  %v4396_v59 = vadd.s32 %v1325_v4, %v1323_v49  ;;  %1501 = vmax.xlane.f32.xlu0 %v4394_v24  ;;  %v4404_v28 = vsel %vm1450_vm6, -1.0, %v3933_v12  ;;  %v1338_v49 = vcvt.f32.s32 %v4320_v52 }
 0x3c6   : > { %v4401_v55 = vadd.s32 %v1199_v15, %v1197_v40  ;;  %6658 = vst [vmem:[#allocation84_spill] sm:$0xff] %v4404_v28  ;;  %v1350_v20 = vpop.xlane.xlu0 %1349  ;;  %1483 = vmax.xlane.f32.xlu1 %v4404_v28  ;;  %v3180_v15 = vpop.eup %3179 }
 0x3c7   : > { %v1351_v47 = vcvt.f32.s32 %v1350_v20  ;;  %v1224_v22 = vpop.xlane.xlu1 %1223  ;;  %vm1461_vm7 = vcmp.eq.s32.totalorder %v3477_v33, %v4396_v59  ;;  %v1339_v40 = vshll.u32 %v1338_v49, 16 }
 0x3c8   : > { %v1225_v46 = vcvt.f32.s32 %v1224_v22  ;;  %v4411_v10 = vsel %vm1461_vm7, -1.0, %v3944_v37  ;;  %vm1452_vm8 = vcmp.eq.s32.totalorder %v3477_v33, %v4401_v55  ;;  %v1255_v37 = vshll.u32 %v1254_v16, 16  ;;  %v3182_v16 = vpop.eup %3181 }
 0x3c9   : > { %6659 = vst [vmem:[#allocation85_spill] sm:$0xff] %v4411_v10  ;;  %v4414_v12 = vadd.s32 %v1353_v9, %v1351_v47  ;;  %1505 = vmax.xlane.f32.xlu0 %v4411_v10  ;;  %v4422_v1 = vsel %vm1452_vm8, -1.0, %v3949_v18  ;;  %v661_v9 = vmul.f32 %v3180_v15, %v3840_v0 }
 0x3ca   : > { %v4419_v8 = vadd.s32 %v1227_v50, %v1225_v46  ;;  %6660 = vst [vmem:[#allocation86_spill] sm:$0xff] %v4422_v1  ;;  %1487 = vmax.xlane.f32.xlu1 %v4422_v1 }
 0x3cb   : > { %v1252_v19 = vpop.xlane.xlu1 %1251  ;;  %vm1463_vm9 = vcmp.eq.s32.totalorder %v3477_v33, %v4414_v12  ;;  %v677_v22 = vsub.f32 2.0, %v661_v9 }
 0x3cc   : > { %v1253_v21 = vcvt.f32.s32 %v1252_v19  ;;  %v4429_v57 = vsel %vm1463_vm9, -1.0, %v3960_v14  ;;  %vm1454_vm10 = vcmp.eq.s32.totalorder %v3477_v33, %v4419_v8 }
 0x3cd   : > { %6661 = vst [vmem:[#allocation87_spill] sm:$0xff] %v4429_v57  ;;  %1509 = vmax.xlane.f32.xlu0 %v4429_v57  ;;  %v4437_v7 = vsel %vm1454_vm10, -1.0, %v3964_v48  ;;  %v1311_v48 = vshll.u32 %v1310_v32, 16  ;;  %v693_v50 = vmul.f32 %v3180_v15, %v677_v22 }
 0x3ce   : > { %v4434_v18 = vadd.s32 %v1255_v37, %v1253_v21  ;;  %6662 = vst [vmem:[#allocation88_spill] sm:$0xff] %v4437_v7  ;;  %1491 = vmax.xlane.f32.xlu1 %v4437_v7 }
 0x3cf   : > { %v1280_v54 = vpop.xlane.xlu1 %1279 }
 0x3d0   : > { %v1281_v6 = vcvt.f32.s32 %v1280_v54  ;;  %vm1456_vm11 = vcmp.eq.s32.totalorder %v3477_v33, %v4434_v18 }
 0x3d1   : > { %v4444_v14 = vsel %vm1456_vm11, -1.0, %v3973_v30 }
 0x3d2   : > { %6663 = vst [vmem:[#allocation89_spill] sm:$0xff] %v4444_v14  ;;  %v4446_v4 = vadd.s32 %v1283_v62, %v1281_v6  ;;  %1495 = vmax.xlane.f32.xlu1 %v4444_v14  ;;  %v4488_v6 = vpop.permute.xlu0 %735 }
 0x3d3   : > { %v1308_v2 = vpop.xlane.xlu1 %1307  ;;  %6672 = vst [vmem:[#allocation98_spill] sm:$0xff] %v4488_v6 }
 0x3d4   : > { %6664 = vst [vmem:[#allocation90_spill] sm:$0xff] %v4446_v4  ;;  %v1309_v44 = vcvt.f32.s32 %v1308_v2  ;;  %vm1458_vm12 = vcmp.eq.s32.totalorder %v3477_v33, %v4446_v4 }
 0x3d5   : > { %v4453_v36 = vsel %vm1458_vm12, -1.0, %v3982_v45 }
 0x3d6   : > { %6665 = vst [vmem:[#allocation91_spill] sm:$0xff] %v4453_v36  ;;  %v4456_v30 = vadd.s32 %v1311_v48, %v1309_v44  ;;  %1499 = vmax.xlane.f32.xlu1 %v4453_v36 }
 0x3d7   : > { %v1336_v43 = vpop.xlane.xlu1 %1335 }
 0x3d8   : > { %6666 = vst [vmem:[#allocation92_spill] sm:$0xff] %v4456_v30  ;;  %v1337_v20 = vcvt.f32.s32 %v1336_v43  ;;  %vm1460_vm13 = vcmp.eq.s32.totalorder %v3477_v33, %v4456_v30 }
 0x3d9   : > { %v4462_v52 = vsel %vm1460_vm13, -1.0, %v3990_v63  ;;  %v662_v63 = vmul.f32 %v3182_v16, %v3850_v56 }
 0x3da   : > { %6667 = vst [vmem:[#allocation93_spill] sm:$0xff] %v4462_v52  ;;  %v4465_v45 = vadd.s32 %v1339_v40, %v1337_v20  ;;  %1503 = vmax.xlane.f32.xlu1 %v4462_v52 }
 0x3db   : > { %v678_v46 = vsub.f32 2.0, %v662_v63  ;;  %v4477_v37 = vpop.permute.xlu1 %737 }
 0x3dc   : > { %6668 = vst [vmem:[#allocation94_spill] sm:$0xff] %v4465_v45  ;;  %vm1462_vm14 = vcmp.eq.s32.totalorder %v3477_v33, %v4465_v45  ;;  %6670 = vst [vmem:[#allocation96_spill] sm:$0xff] %v4477_v37 }
 0x3dd   : > { %v4471_v47 = vsel %vm1462_vm14, -1.0, %v3997_v35  ;;  %v694_v19 = vmul.f32 %v3182_v16, %v678_v46  ;;  %v1367_v35 = vshll.u32 %v1366_v29, 16 }
 0x3de   : > { %6669 = vst [vmem:[#allocation95_spill] sm:$0xff] %v4471_v47  ;;  %1507 = vmax.xlane.f32.xlu1 %v4471_v47 }
 0x3e3   : > { %739 = vrot.lane.b32.xlu0 %v693_v50, %s3284_s15 }
 0x3ef   : > { %741 = vrot.lane.b32.xlu1 %v694_v19, %s3284_s15 }
 0x40c   : > { %v1364_v21 = vpop.xlane.xlu1 %1363 }
 0x40d   : > { %v1365_v54 = vcvt.f32.s32 %v1364_v21 }
 0x40f   : > { %v4480_v62 = vadd.s32 %v1367_v35, %v1365_v54 }
 0x411   : > { %6671 = vst [vmem:[#allocation97_spill] sm:$0xff] %v4480_v62  ;;  %vm1464_vm15 = vcmp.eq.s32.totalorder %v3477_v33, %v4480_v62 }
 0x412   : > { %v4485_v32 = vsel %vm1464_vm15, -1.0, %v4025_v53 }
 0x413   : > { %1511 = vmax.xlane.f32.xlu1 %v4485_v32 }
 0x43a   : > { %v4490_v2 = vpop.xlane.xlu0 %1481 }
 0x43b   : > { %6673 = vst [vmem:[#allocation99_spill] sm:$0xff] %v4490_v2  ;;  %vm1513_vm0 = vcmp.eq.f32.partialorder %v4344_v23, %v4490_v2 }
 0x43c   : > { %v4495_v11 = vsel %vm1513_vm0, %v3477_v33, 128 }
 0x43d   : > { %v1546_v48 = vshra.s32 %v4495_v11, 16 }
 0x43e   : > { %v4498_v49 = vpop.xlane.xlu0 %1485 }
 0x43f   : > { %6674 = vst [vmem:[#allocation100_spill] sm:$0xff] %v4498_v49  ;;  %vm1515_vm1 = vcmp.eq.f32.partialorder %v4353_v39, %v4498_v49  ;;  %v4502_v53 = vcvt.s32.f32 %v1546_v48 }
 0x440   : > { %v4505_v44 = vsel %vm1515_vm1, %v3477_v33, 128 }
 0x441   : > { %1549 = vmin.xlane.f32.xlu0 %v4502_v53  ;;  %v1574_v15 = vshra.s32 %v4505_v44, 16 }
 0x442   : > { %v4509_v43 = vpop.xlane.xlu0 %1489 }
 0x443   : > { %6675 = vst [vmem:[#allocation101_spill] sm:$0xff] %v4509_v43  ;;  %vm1517_vm2 = vcmp.eq.f32.partialorder %v4362_v58, %v4509_v43  ;;  %v4513_v40 = vcvt.s32.f32 %v1574_v15 }
 0x444   : > { %v4516_v20 = vsel %vm1517_vm2, %v3477_v33, 128 }
 0x445   : > { %1577 = vmin.xlane.f32.xlu0 %v4513_v40  ;;  %v1602_v9 = vshra.s32 %v4516_v20, 16 }
 0x446   : > { %v4520_v22 = vpop.xlane.xlu0 %1493 }
 0x447   : > { %6676 = vst [vmem:[#allocation102_spill] sm:$0xff] %v4520_v22  ;;  %vm1519_vm3 = vcmp.eq.f32.partialorder %v4372_v41, %v4520_v22  ;;  %v4524_v50 = vcvt.s32.f32 %v1602_v9 }
 0x448   : > { %v4527_v16 = vsel %vm1519_vm3, %v3477_v33, 128 }
 0x449   : > { %1605 = vmin.xlane.f32.xlu0 %v4524_v50  ;;  %v1630_v63 = vshra.s32 %v4527_v16, 16 }
 0x44a   : > { %v4531_v46 = vpop.xlane.xlu0 %1497 }
 0x44b   : > { %6677 = vst [vmem:[#allocation103_spill] sm:$0xff] %v4531_v46  ;;  %vm1521_vm4 = vcmp.eq.f32.partialorder %v4382_v26, %v4531_v46  ;;  %v4535_v19 = vcvt.s32.f32 %v1630_v63 }
 0x44c   : > { %v4538_v29 = vsel %vm1521_vm4, %v3477_v33, 128 }
 0x44d   : > { %1633 = vmin.xlane.f32.xlu0 %v4535_v19  ;;  %v1658_v21 = vshra.s32 %v4538_v29, 16 }
 0x44e   : > { %v4542_v35 = vpop.xlane.xlu0 %1501 }
 0x44f   : > { %6678 = vst [vmem:[#allocation104_spill] sm:$0xff] %v4542_v35  ;;  %vm1523_vm5 = vcmp.eq.f32.partialorder %v4394_v24, %v4542_v35  ;;  %v4546_v54 = vcvt.s32.f32 %v1658_v21  ;;  %v4551_v15 = vpop.xlane.xlu1 %1483 }
 0x450   : > { %v4549_v48 = vsel %vm1523_vm5, %v3477_v33, 128  ;;  %6679 = vst [vmem:[#allocation105_spill] sm:$0xff] %v4551_v15  ;;  %vm1514_vm6 = vcmp.eq.f32.partialorder %v4404_v28, %v4551_v15 }
 0x451   : > { %1661 = vmin.xlane.f32.xlu0 %v4546_v54  ;;  %v1686_v9 = vshra.s32 %v4549_v48, 16  ;;  %v4558_v63 = vsel %vm1514_vm6, %v3477_v33, 128 }
 0x452   : > { %v4560_v46 = vpop.xlane.xlu0 %1505  ;;  %v1560_v35 = vshra.s32 %v4558_v63, 16 }
 0x453   : > { %6680 = vst [vmem:[#allocation106_spill] sm:$0xff] %v4560_v46  ;;  %vm1525_vm7 = vcmp.eq.f32.partialorder %v4411_v10, %v4560_v46  ;;  %v4564_v21 = vcvt.s32.f32 %v1686_v9  ;;  %v4570_v15 = vpop.xlane.xlu1 %1487  ;;  %v6694_v10 = vld [vmem:[#allocation17_spill] sm:$0xff] }
 0x454   : > { %v4568_v22 = vsel %vm1525_vm7, %v3477_v33, 128  ;;  %6681 = vst [vmem:[#allocation107_spill] sm:$0xff] %v4570_v15  ;;  %vm1516_vm8 = vcmp.eq.f32.partialorder %v4422_v1, %v4570_v15  ;;  %v4575_v43 = vcvt.s32.f32 %v1560_v35  ;;  %v6693_v1 = vld [vmem:[#allocation42_spill] sm:$0xff] }
 0x455   : > { %1689 = vmin.xlane.f32.xlu0 %v4564_v21  ;;  %v1714_v49 = vshra.s32 %v4568_v22, 16  ;;  %v4579_v2 = vsel %vm1516_vm8, %v3477_v33, 128  ;;  %v617_v28 = vadd.f32 %v6694_v10, %v6693_v1 }
 0x456   : > { %v4581_v9 = vpop.xlane.xlu0 %1509  ;;  %1563 = vmin.xlane.f32.xlu1 %v4575_v43  ;;  %v1588_v15 = vshra.s32 %v4579_v2, 16 }
 0x457   : > { %6682 = vst [vmem:[#allocation108_spill] sm:$0xff] %v4581_v9  ;;  %vm1527_vm9 = vcmp.eq.f32.partialorder %v4429_v57, %v4581_v9  ;;  %v4586_v56 = vcvt.s32.f32 %v1714_v49  ;;  %v4592_v35 = vpop.xlane.xlu1 %1491 }
 0x458   : > { %v4590_v0 = vsel %vm1527_vm9, %v3477_v33, 128  ;;  %6683 = vst [vmem:[#allocation109_spill] sm:$0xff] %v4592_v35  ;;  %vm1518_vm10 = vcmp.eq.f32.partialorder %v4437_v7, %v4592_v35  ;;  %v4597_v6 = vcvt.s32.f32 %v1588_v15  ;;  %v6692_v7 = vld [vmem:[#allocation53_spill] sm:$0xff] }
 0x459   : > { %1717 = vmin.xlane.f32.xlu0 %v4586_v56  ;;  %v1742_v60 = vshra.s32 %v4590_v0, 16  ;;  %v4601_v9 = vsel %vm1518_vm10, %v3477_v33, 128 }
 0x45a   : > { %1591 = vmin.xlane.f32.xlu1 %v4597_v6  ;;  %v1616_v37 = vshra.s32 %v4601_v9, 16  ;;  %v4680_v1 = vpop.permute.xlu0 %739 }
 0x45b   : > { %v4604_v49 = vcvt.s32.f32 %v1742_v60  ;;  %v4607_v34 = vpop.xlane.xlu1 %1495  ;;  %6698 = vst [vmem:[#allocation53_spill] sm:$0xff] %v4680_v1 }
 0x45c   : > { %6684 = vst [vmem:[#allocation110_spill] sm:$0xff] %v4607_v34  ;;  %vm1520_vm11 = vcmp.eq.f32.partialorder %v4444_v14, %v4607_v34  ;;  %v4612_v15 = vcvt.s32.f32 %v1616_v37  ;;  %v6689_v14 = vld [vmem:[#allocation50_spill] sm:$0xff] }
 0x45d   : > { %1745 = vmin.xlane.f32.xlu0 %v4604_v49  ;;  %v4615_v35 = vsel %vm1520_vm11, %v3477_v33, 128 }
 0x45e   : > { %1619 = vmin.xlane.f32.xlu1 %v4612_v15  ;;  %v1644_v46 = vshra.s32 %v4615_v35, 16 }
 0x45f   : > { %v4619_v60 = vpop.xlane.xlu1 %1499 }
 0x460   : > { %6685 = vst [vmem:[#allocation111_spill] sm:$0xff] %v4619_v60  ;;  %vm1522_vm12 = vcmp.eq.f32.partialorder %v4453_v36, %v4619_v60  ;;  %v4623_v51 = vcvt.s32.f32 %v1644_v46 }
 0x461   : > { %v4626_v34 = vsel %vm1522_vm12, %v3477_v33, 128 }
 0x462   : > { %1647 = vmin.xlane.f32.xlu1 %v4623_v51  ;;  %v1672_v37 = vshra.s32 %v4626_v34, 16 }
 0x463   : > { %v4630_v3 = vpop.xlane.xlu1 %1503 }
 0x464   : > { %6686 = vst [vmem:[#allocation112_spill] sm:$0xff] %v4630_v3  ;;  %vm1524_vm13 = vcmp.eq.f32.partialorder %v4462_v52, %v4630_v3  ;;  %v4634_v38 = vcvt.s32.f32 %v1672_v37  ;;  %v6688_v52 = vld [vmem:[#allocation12_spill] sm:$0xff] }
 0x465   : > { %v4637_v62 = vsel %vm1524_vm13, %v3477_v33, 128  ;;  %v615_v30 = vadd.f32 %v6688_v52, %v4007_v13 }
 0x466   : > { %1675 = vmin.xlane.f32.xlu1 %v4634_v38  ;;  %v1700_v46 = vshra.s32 %v4637_v62, 16 }
 0x467   : > { %v4641_v60 = vpop.xlane.xlu1 %1507  ;;  %v759_v4 = vmul.f32 %v6689_v14, %v615_v30  ;;  %v1573_v30 = vand.u32 65535, %v4505_v44  ;;  %v1629_v44 = vand.u32 65535, %v4527_v16  ;;  %v1685_v16 = vand.u32 65535, %v4549_v48 }
 0x468   : > { %6687 = vst [vmem:[#allocation113_spill] sm:$0xff] %v4641_v60  ;;  %vm1526_vm14 = vcmp.eq.f32.partialorder %v4471_v47, %v4641_v60  ;;  %v4645_v45 = vcvt.s32.f32 %v1700_v46  ;;  %v6690_v46 = vld [vmem:[#allocation11_spill] sm:$0xff]  ;;  %v6691_v60 = vld [vmem:[#allocation13_spill] sm:$0xff]  ;;  %v1587_v48 = vand.u32 65535, %v4579_v2  ;;  %v1615_v2 = vand.u32 65535, %v4601_v9 }
 0x469   : > { %v4648_v36 = vsel %vm1526_vm14, %v3477_v33, 128  ;;  %v616_v47 = vadd.f32 %v6691_v60, %v6690_v46 }
 0x46a   : > { %1703 = vmin.xlane.f32.xlu1 %v4645_v45  ;;  %v1728_v37 = vshra.s32 %v4648_v36, 16 }
 0x46b   : > { %v760_v57 = vmul.f32 %v6692_v7, %v616_v47  ;;  %v4667_v13 = vpop.permute.xlu1 %741 }
 0x46c   : > { %v4652_v3 = vcvt.s32.f32 %v1728_v37  ;;  %v6695_v37 = vld [vmem:[#allocation59_spill] sm:$0xff]  ;;  %6696 = vst [vmem:[#allocation50_spill] sm:$0xff] %v4667_v13 }
 0x46d   : > { %v761_v24 = vmul.f32 %v6695_v37, %v617_v28  ;;  %v1575_v37 = vcvt.s32.f32 %v1573_v30  ;;  %v1631_v30 = vcvt.s32.f32 %v1629_v44 }
 0x46e   : > { %1731 = vmin.xlane.f32.xlu1 %v4652_v3 }
 0x473   : > { %2777 = vrot.lane.b32.xlu0 %v759_v4, %s3283_s14 }
 0x47f   : > { %2779 = vrot.lane.b32.xlu1 %v760_v57, %s3283_s14 }
 0x483   : > { %2781 = vrot.lane.b32.xlu1 %v761_v24, %s3283_s14  ;;  %v1545_v24 = vand.u32 65535, %v4495_v11 }
 0x485   : > { %v1547_v57 = vcvt.s32.f32 %v1545_v24 }
 0x49c   : > { %v4669_v52 = vpop.xlane.xlu1 %1511 }
 0x49d   : > { %6697 = vst [vmem:[#allocation11_spill] sm:$0xff] %v4669_v52  ;;  %vm1528_vm15 = vcmp.eq.f32.partialorder %v4485_v32, %v4669_v52 }
 0x49e   : > { %v4674_v14 = vsel %vm1528_vm15, %v3477_v33, 128 }
 0x49f   : > { %v1756_v7 = vshra.s32 %v4674_v14, 16 }
 0x4a1   : > { %v4677_v4 = vcvt.s32.f32 %v1756_v7  ;;  %v1601_v7 = vand.u32 65535, %v4516_v20  ;;  %v1657_v20 = vand.u32 65535, %v4538_v29  ;;  %v1687_v29 = vcvt.s32.f32 %v1685_v16 }
 0x4a3   : > { %v1603_v24 = vcvt.s32.f32 %v1601_v7 }
 0x4a7   : > { %1759 = vmin.xlane.f32.xlu1 %v4677_v4 }
 0x4ca   : > { %v4683_v28 = vpop.xlane.xlu0 %1549 }
 0x4cb   : > { %vm1551_vm0 = vcmp.eq.f32.partialorder %v4502_v53, %v4683_v28 }
 0x4cc   : > { %v1552_v47 = vsel %vm1551_vm0, %v1547_v57, inf }
 0x4cd   : > { %1553 = vmin.xlane.f32.xlu0 %v1552_v47  ;;  %v1659_v47 = vcvt.s32.f32 %v1657_v20  ;;  %v1741_v20 = vand.u32 65535, %v4590_v0 }
 0x4ce   : > { %v4688_v46 = vpop.xlane.xlu0 %1577 }
 0x4cf   : > { %vm1579_vm1 = vcmp.eq.f32.partialorder %v4513_v40, %v4688_v46  ;;  %v1743_v16 = vcvt.s32.f32 %v1741_v20 }
 0x4d0   : > { %v1580_v60 = vsel %vm1579_vm1, %v1575_v37, inf  ;;  %v1559_v37 = vand.u32 65535, %v4558_v63 }
 0x4d1   : > { %1581 = vmin.xlane.f32.xlu0 %v1580_v60 }
 0x4d2   : > { %v4693_v11 = vpop.xlane.xlu0 %1605 }
 0x4d3   : > { %vm1607_vm2 = vcmp.eq.f32.partialorder %v4524_v50, %v4693_v11 }
 0x4d4   : > { %v1608_v53 = vsel %vm1607_vm2, %v1603_v24, inf  ;;  %v1713_v24 = vand.u32 65535, %v4568_v22 }
 0x4d5   : > { %1609 = vmin.xlane.f32.xlu0 %v1608_v53  ;;  %v1561_v53 = vcvt.s32.f32 %v1559_v37  ;;  %v1643_v37 = vand.u32 65535, %v4615_v35  ;;  %v1699_v35 = vand.u32 65535, %v4637_v62 }
 0x4d6   : > { %v4698_v57 = vpop.xlane.xlu0 %1633 }
 0x4d7   : > { %vm1635_vm3 = vcmp.eq.f32.partialorder %v4535_v19, %v4698_v57 }
 0x4d8   : > { %v1636_v40 = vsel %vm1635_vm3, %v1631_v30, inf  ;;  %v1715_v30 = vcvt.s32.f32 %v1713_v24  ;;  %v1671_v24 = vand.u32 65535, %v4626_v34  ;;  %v1727_v34 = vand.u32 65535, %v4648_v36 }
 0x4d9   : > { %1637 = vmin.xlane.f32.xlu0 %v1636_v40  ;;  %v1589_v40 = vcvt.s32.f32 %v1587_v48 }
 0x4da   : > { %v4703_v60 = vpop.xlane.xlu0 %1661  ;;  %v1729_v20 = vcvt.s32.f32 %v1727_v34  ;;  %v6712_v34 = vld [vmem:[#allocation32_spill] sm:$0xff] }
 0x4db   : > { %vm1663_vm4 = vcmp.eq.f32.partialorder %v4546_v54, %v4703_v60 }
 0x4dc   : > { %v1664_v50 = vsel %vm1663_vm4, %v1659_v47, inf }
 0x4dd   : > { %1665 = vmin.xlane.f32.xlu0 %v1664_v50  ;;  %v1617_v50 = vcvt.s32.f32 %v1615_v2  ;;  %v6701_v2 = vld [vmem:[#allocation56_spill] sm:$0xff] }
 0x4de   : > { %v4709_v7 = vpop.xlane.xlu0 %1689 }
 0x4df   : > { %vm1691_vm5 = vcmp.eq.f32.partialorder %v4564_v21, %v4709_v7  ;;  %v4714_v19 = vpop.xlane.xlu1 %1563 }
 0x4e0   : > { %v1692_v44 = vsel %vm1691_vm5, %v1687_v29, inf  ;;  %vm1565_vm6 = vcmp.eq.f32.partialorder %v4575_v43, %v4714_v19  ;;  %v1645_v29 = vcvt.s32.f32 %v1643_v37  ;;  %v6704_v37 = vld [vmem:[#allocation45_spill] sm:$0xff] }
 0x4e1   : > { %1693 = vmin.xlane.f32.xlu0 %v1692_v44  ;;  %v1566_v54 = vsel %vm1565_vm6, %v1561_v53, inf  ;;  %v1673_v53 = vcvt.s32.f32 %v1671_v24  ;;  %v6706_v24 = vld [vmem:[#allocation62_spill] sm:$0xff] }
 0x4e2   : > { %v4719_v63 = vpop.xlane.xlu0 %1717  ;;  %1567 = vmin.xlane.f32.xlu1 %v1566_v54  ;;  %v1701_v54 = vcvt.s32.f32 %v1699_v35 }
 0x4e3   : > { %vm1719_vm7 = vcmp.eq.f32.partialorder %v4586_v56, %v4719_v63  ;;  %v4724_v22 = vpop.xlane.xlu1 %1591 }
 0x4e4   : > { %v1720_v21 = vsel %vm1719_vm7, %v1715_v30, inf  ;;  %vm1593_vm8 = vcmp.eq.f32.partialorder %v4597_v6, %v4724_v22 }
 0x4e5   : > { %1721 = vmin.xlane.f32.xlu0 %v1720_v21  ;;  %v1594_v43 = vsel %vm1593_vm8, %v1589_v40, inf  ;;  %v6700_v21 = vld [vmem:[#allocation16_spill] sm:$0xff]  ;;  %vm1401_vm8 = vcmp.lt.s32.totalorder %v6712_v34, %v4374_v42 }
 0x4e6   : > { %v4729_v47 = vpop.xlane.xlu0 %1745  ;;  %1595 = vmin.xlane.f32.xlu1 %v1594_v43 }
 0x4e7   : > { %vm1747_vm9 = vcmp.eq.f32.partialorder %v4604_v49, %v4729_v47  ;;  %v4733_v0 = vpop.xlane.xlu1 %1619 }
 0x4e8   : > { %v1748_v56 = vsel %vm1747_vm9, %v1743_v16, inf  ;;  %vm1621_vm10 = vcmp.eq.f32.partialorder %v4612_v15, %v4733_v0  ;;  %v1755_v16 = vand.u32 65535, %v4674_v14  ;;  %v1556_v14 = vcvt.f32.s32 %v4683_v28  ;;  %v6711_v28 = vld [vmem:[#allocation31_spill] sm:$0xff] }
 0x4e9   : > { %1749 = vmin.xlane.f32.xlu0 %v1748_v56  ;;  %v1622_v9 = vsel %vm1621_vm10, %v1617_v50, inf  ;;  %vm1397_vm6 = vcmp.lt.s32.totalorder %v6711_v28, %v4364_v27  ;;  %vm1429_vm7 = vcmp.gt.s32.totalorder %v6711_v28, %v4364_v27  ;;  %vm1433_vm9 = vcmp.gt.s32.totalorder %v6712_v34, %v4374_v42 }
 0x4ea   : > { %1623 = vmin.xlane.f32.xlu1 %v1622_v9  ;;  %v1757_v50 = vcvt.s32.f32 %v1755_v16  ;;  %v6705_v9 = vld [vmem:[#allocation19_spill] sm:$0xff]  ;;  %v4776_v35 = vpop.permute.xlu0 %2777 }
 0x4eb   : > { %v4738_v6 = vpop.xlane.xlu1 %1647 }
 0x4ec   : > { %vm1649_vm11 = vcmp.eq.f32.partialorder %v4623_v51, %v4738_v6 }
 0x4ed   : > { %v1650_v49 = vsel %vm1649_vm11, %v1645_v29, inf  ;;  %v618_v29 = vadd.f32 %v6705_v9, %v6704_v37  ;;  %v4820_v37 = vsel %vm1401_vm8, %v6712_v34, %v4374_v42  ;;  %v6762_v9 = vld [vmem:[#allocation97_spill] sm:$0xff] }
 0x4ee   : > { %1651 = vmin.xlane.f32.xlu1 %v1650_v49 }
 0x4ef   : > { %v4743_v44 = vpop.xlane.xlu1 %1675  ;;  %v762_v49 = vmul.f32 %v6706_v24, %v618_v29  ;;  %v6713_v29 = vld [vmem:[#allocation34_spill] sm:$0xff]  ;;  %v1612_v24 = vcvt.f32.s32 %v4693_v11 }
 0x4f0   : > { %vm1677_vm12 = vcmp.eq.f32.partialorder %v4634_v38, %v4743_v44  ;;  %v6699_v38 = vld [vmem:[#allocation46_spill] sm:$0xff]  ;;  %vm1387_vm10 = vcmp.lt.s32.totalorder %v6713_v29, %v4387_v5  ;;  %vm1419_vm11 = vcmp.gt.s32.totalorder %v6713_v29, %v4387_v5 }
 0x4f1   : > { %v1678_v15 = vsel %vm1677_vm12, %v1673_v53, inf  ;;  %v619_v40 = vadd.f32 %v6700_v21, %v6699_v38  ;;  %v6707_v53 = vld [vmem:[#allocation28_spill] sm:$0xff]  ;;  %6708 = vst [vmem:[#allocation46_spill] sm:$0xff] %v4776_v35 }
 0x4f2   : > { %1679 = vmin.xlane.f32.xlu1 %v1678_v15  ;;  %vm1385_vm0 = vcmp.lt.s32.totalorder %v6707_v53, %v4338_v31  ;;  %vm1417_vm1 = vcmp.gt.s32.totalorder %v6707_v53, %v4338_v31 }
 0x4f3   : > { %v4748_v48 = vpop.xlane.xlu1 %1703  ;;  %v763_v43 = vmul.f32 %v6701_v2, %v619_v40  ;;  %v1386_v15 = vsel %vm1385_vm0, %v6707_v53, %v4338_v31  ;;  %v1418_v40 = vsel %vm1417_vm1, %v6707_v53, %v4338_v31  ;;  %v4816_v31 = vsel %vm1429_vm7, %v6711_v28, %v4364_v27  ;;  %v6714_v53 = vld [vmem:[#allocation33_spill] sm:$0xff] }
 0x4f4   : > { %vm1705_vm13 = vcmp.eq.f32.partialorder %v4645_v45, %v4748_v48  ;;  %vm1437_vm0 = vcmp.gt.s32.totalorder %v6714_v53, %v4384_v61 }
 0x4f5   : > { %v1706_v51 = vsel %vm1705_vm13, %v1701_v54, inf  ;;  %v6710_v54 = vld [vmem:[#allocation30_spill] sm:$0xff] }
 0x4f6   : > { %1707 = vmin.xlane.f32.xlu1 %v1706_v51  ;;  %vm1393_vm4 = vcmp.lt.s32.totalorder %v6710_v54, %v4355_v25  ;;  %vm1425_vm5 = vcmp.gt.s32.totalorder %v6710_v54, %v4355_v25  ;;  %v1584_v51 = vcvt.f32.s32 %v4688_v46  ;;  %v4812_v46 = vsel %vm1397_vm6, %v6711_v28, %v4364_v27 }
 0x4f7   : > { %v4753_v30 = vpop.xlane.xlu1 %1731  ;;  %v1394_v16 = vsel %vm1393_vm4, %v6710_v54, %v4355_v25  ;;  %v1613_v28 = vshll.u32 %v1612_v24, 16 }
 0x4f8   : > { %vm1733_vm14 = vcmp.eq.f32.partialorder %v4652_v3, %v4753_v30 }
 0x4f9   : > { %v1734_v62 = vsel %vm1733_vm14, %v1729_v20, inf }
 0x4fa   : > { %1735 = vmin.xlane.f32.xlu1 %v1734_v62  ;;  %v1557_v62 = vshll.u32 %v1556_v14, 16 }
 0x4fb   : > { %v4761_v36 = vpop.permute.xlu1 %2779 }
 0x4fc   : > { %6702 = vst [vmem:[#allocation42_spill] sm:$0xff] %v4761_v36 }
 0x4ff   : > { %2785 = vrot.lane.b32.xlu0 %v763_v43, %s3283_s14  ;;  %v4763_v45 = vpop.permute.xlu1 %2781 }
 0x500   : > { %6703 = vst [vmem:[#allocation59_spill] sm:$0xff] %v4763_v45  ;;  %v6753_v45 = vld [vmem:[#allocation10_spill] sm:$0xff] }
 0x530   : > { %v4766_v56 = vpop.xlane.xlu1 %1759 }
 0x531   : > { %vm1761_vm15 = vcmp.eq.f32.partialorder %v4677_v4, %v4766_v56  ;;  %v6709_v4 = vld [vmem:[#allocation29_spill] sm:$0xff] }
 0x532   : > { %v1762_v3 = vsel %vm1761_vm15, %v1757_v50, inf  ;;  %vm1389_vm2 = vcmp.lt.s32.totalorder %v6709_v4, %v4346_v17  ;;  %vm1421_vm3 = vcmp.gt.s32.totalorder %v6709_v4, %v4346_v17  ;;  %v1426_v50 = vsel %vm1425_vm5, %v6710_v54, %v4355_v25 }
 0x533   : > { %1763 = vmin.xlane.f32.xlu1 %v1762_v3  ;;  %v1390_v2 = vsel %vm1389_vm2, %v6709_v4, %v4346_v17  ;;  %v1422_v43 = vsel %vm1421_vm3, %v6709_v4, %v4346_v17  ;;  %v4824_v17 = vsel %vm1433_vm9, %v6712_v34, %v4374_v42  ;;  %v1585_v25 = vshll.u32 %v1584_v51, 16 }
 0x534   : > { %vm1405_vm15 = vcmp.lt.s32.totalorder %v6714_v53, %v4384_v61  ;;  %v4849_v54 = vsel %vm1387_vm10, %v6713_v29, %v4387_v5  ;;  %v1640_v34 = vcvt.f32.s32 %v4698_v57  ;;  %v6716_v57 = vld [vmem:[#allocation35_spill] sm:$0xff] }
 0x535   : > { %vm1409_vm6 = vcmp.lt.s32.totalorder %v6716_v57, %v4396_v59  ;;  %vm1441_vm7 = vcmp.gt.s32.totalorder %v6716_v57, %v4396_v59 }
 0x544   : > { %2783 = vrot.lane.b32.xlu1 %v762_v49, %s3283_s14 }
 0x556   : > { %v1554_v20 = vpop.xlane.xlu0 %1553 }
 0x557   : > { %v1555_v38 = vcvt.f32.s32 %v1554_v20 }
 0x559   : > { %v1558_v3 = vadd.s32 %v1557_v62, %v1555_v38 }
 0x55a   : > { %v1582_v49 = vpop.xlane.xlu0 %1581 }
 0x55b   : > { %v1583_v27 = vcvt.f32.s32 %v1582_v49  ;;  %vm1849_vm12 = vcmp.eq.s32.totalorder %v3477_v33, %v1558_v3  ;;  %vm1785_vm13 = vcmp.lt.s32.totalorder %v1386_v15, %v1558_v3  ;;  %vm1817_vm14 = vcmp.gt.s32.totalorder %v1418_v40, %v1558_v3 }
 0x55c   : > { %v4835_v42 = vsel %vm1849_vm12, -1.0, %v4344_v23  ;;  %v4837_v14 = vsel %vm1785_vm13, %v1386_v15, %v1558_v3  ;;  %v4839_v4 = vsel %vm1817_vm14, %v1418_v40, %v1558_v3  ;;  %v4856_v23 = vsel %vm1419_vm11, %v6713_v29, %v4387_v5  ;;  %v6715_v15 = vld [vmem:[#allocation36_spill] sm:$0xff] }
 0x55d   : > { %v1586_v11 = vadd.s32 %v1585_v25, %v1583_v27  ;;  %1881 = vmax.xlane.f32.xlu0 %v4835_v42  ;;  %vm1391_vm1 = vcmp.lt.s32.totalorder %v6715_v15, %v4401_v55  ;;  %vm1423_vm2 = vcmp.gt.s32.totalorder %v6715_v15, %v4401_v55  ;;  %v4876_v40 = vsel %vm1405_vm15, %v6714_v53, %v4384_v61 }
 0x55e   : > { %v1610_v51 = vpop.xlane.xlu0 %1609  ;;  %v4896_v25 = vsel %vm1391_vm1, %v6715_v15, %v4401_v55  ;;  %v4903_v24 = vsel %vm1423_vm2, %v6715_v15, %v4401_v55  ;;  %v6717_v55 = vld [vmem:[#allocation38_spill] sm:$0xff] }
 0x55f   : > { %v1611_v20 = vcvt.f32.s32 %v1610_v51  ;;  %vm1851_vm3 = vcmp.eq.s32.totalorder %v3477_v33, %v1586_v11  ;;  %vm1789_vm4 = vcmp.lt.s32.totalorder %v1390_v2, %v1586_v11  ;;  %vm1821_vm5 = vcmp.gt.s32.totalorder %v1422_v43, %v1586_v11 }
 0x560   : > { %v4865_v62 = vsel %vm1851_vm3, -1.0, %v4353_v39  ;;  %v4867_v5 = vsel %vm1789_vm4, %v1390_v2, %v1586_v11  ;;  %v4869_v38 = vsel %vm1821_vm5, %v1422_v43, %v1586_v11  ;;  %v4888_v39 = vsel %vm1437_vm0, %v6714_v53, %v4384_v61 }
 0x561   : > { %v1614_v3 = vadd.s32 %v1613_v28, %v1611_v20  ;;  %1885 = vmax.xlane.f32.xlu0 %v4865_v62  ;;  %v1641_v2 = vshll.u32 %v1640_v34, 16  ;;  %v1668_v43 = vcvt.f32.s32 %v4703_v60  ;;  %v4918_v53 = vsel %vm1409_vm6, %v6716_v57, %v4396_v59  ;;  %v6718_v28 = vld [vmem:[#allocation37_spill] sm:$0xff] }
 0x562   : > { %v1638_v29 = vpop.xlane.xlu0 %1637  ;;  %vm1395_vm11 = vcmp.lt.s32.totalorder %v6717_v55, %v4419_v8  ;;  %v1696_v11 = vcvt.f32.s32 %v4709_v7  ;;  %vm1427_vm12 = vcmp.gt.s32.totalorder %v6717_v55, %v4419_v8  ;;  %vm1413_vm13 = vcmp.lt.s32.totalorder %v6718_v28, %v4414_v12 }
 0x563   : > { %v1639_v61 = vcvt.f32.s32 %v1638_v29  ;;  %vm1853_vm8 = vcmp.eq.s32.totalorder %v3477_v33, %v1614_v3  ;;  %vm1793_vm9 = vcmp.lt.s32.totalorder %v1394_v16, %v1614_v3  ;;  %vm1825_vm10 = vcmp.gt.s32.totalorder %v1426_v50, %v1614_v3 }
 0x564   : > { %v4907_v60 = vsel %vm1853_vm8, -1.0, %v4362_v58  ;;  %v4909_v49 = vsel %vm1793_vm9, %v1394_v16, %v1614_v3  ;;  %v4911_v27 = vsel %vm1825_vm10, %v1426_v50, %v1614_v3  ;;  %v4929_v58 = vsel %vm1441_vm7, %v6716_v57, %v4396_v59 }
 0x565   : > { %v1642_v15 = vadd.s32 %v1641_v2, %v1639_v61  ;;  %1889 = vmax.xlane.f32.xlu0 %v4907_v60  ;;  %v1669_v16 = vshll.u32 %v1668_v43, 16  ;;  %vm1445_vm14 = vcmp.gt.s32.totalorder %v6718_v28, %v4414_v12  ;;  %v4945_v34 = vsel %vm1395_vm11, %v6717_v55, %v4419_v8 }
 0x566   : > { %v1666_v50 = vpop.xlane.xlu0 %1665  ;;  %v1697_v57 = vshll.u32 %v1696_v11, 16  ;;  %v1570_v3 = vcvt.f32.s32 %v4714_v19  ;;  %v1724_v43 = vcvt.f32.s32 %v4719_v63  ;;  %v1626_v29 = vcvt.f32.s32 %v4733_v0 }
 0x567   : > { %v1667_v7 = vcvt.f32.s32 %v1666_v50  ;;  %vm1855_vm15 = vcmp.eq.s32.totalorder %v3477_v33, %v1642_v15  ;;  %vm1797_vm0 = vcmp.lt.s32.totalorder %v4812_v46, %v1642_v15  ;;  %vm1829_vm1 = vcmp.gt.s32.totalorder %v4816_v31, %v1642_v15 }
 0x568   : > { %v4941_v59 = vsel %vm1855_vm15, -1.0, %v4372_v41  ;;  %v4948_v51 = vsel %vm1797_vm0, %v4812_v46, %v1642_v15  ;;  %v4951_v20 = vsel %vm1829_vm1, %v4816_v31, %v1642_v15  ;;  %v4960_v41 = vsel %vm1427_vm12, %v6717_v55, %v4419_v8 }
 0x569   : > { %v1670_v2 = vadd.s32 %v1669_v16, %v1667_v7  ;;  %1893 = vmax.xlane.f32.xlu0 %v4941_v59  ;;  %v1598_v46 = vcvt.f32.s32 %v4724_v22  ;;  %v1752_v31 = vcvt.f32.s32 %v4729_v47  ;;  %v4983_v47 = vsel %vm1413_vm13, %v6718_v28, %v4414_v12 }
 0x56a   : > { %v1694_v61 = vpop.xlane.xlu0 %1693  ;;  %v1571_v0 = vshll.u32 %v1570_v3, 16  ;;  %v1627_v50 = vshll.u32 %v1626_v29, 16  ;;  %v6720_v3 = vld [vmem:[#allocation83_spill] sm:$0xff] }
 0x56b   : > { %v1695_v19 = vcvt.f32.s32 %v1694_v61  ;;  %vm1857_vm2 = vcmp.eq.s32.totalorder %v3477_v33, %v1670_v2  ;;  %vm1801_vm3 = vcmp.lt.s32.totalorder %v4820_v37, %v1670_v2  ;;  %vm1833_vm4 = vcmp.gt.s32.totalorder %v4824_v17, %v1670_v2  ;;  %v1568_v11 = vpop.xlane.xlu1 %1567 }
 0x56c   : > { %v4970_v8 = vsel %vm1857_vm2, -1.0, %v4382_v26  ;;  %v4973_v63 = vsel %vm1801_vm3, %v4820_v37, %v1670_v2  ;;  %v4976_v22 = vsel %vm1833_vm4, %v4824_v17, %v1670_v2  ;;  %v1569_v15 = vcvt.f32.s32 %v1568_v11 }
 0x56d   : > { %v1698_v55 = vadd.s32 %v1697_v57, %v1695_v19  ;;  %1897 = vmax.xlane.f32.xlu0 %v4970_v8  ;;  %v4991_v26 = vsel %vm1445_vm14, %v6718_v28, %v4414_v12  ;;  %v1725_v37 = vshll.u32 %v1724_v43, 16  ;;  %v1599_v17 = vshll.u32 %v1598_v46, 16  ;;  %v6719_v57 = vld [vmem:[#allocation8_spill] sm:$0xff] }
 0x56e   : > { %v1753_v16 = vshll.u32 %v1752_v31, 16  ;;  %v1722_v7 = vpop.xlane.xlu0 %1721  ;;  %v1572_v2 = vadd.s32 %v1571_v0, %v1569_v15  ;;  %vm1399_vm7 = vcmp.lt.s32.totalorder %v6719_v57, %v4434_v18  ;;  %vm1431_vm8 = vcmp.gt.s32.totalorder %v6719_v57, %v4434_v18  ;;  %v6721_v19 = vld [vmem:[#allocation84_spill] sm:$0xff] }
 0x56f   : > { %v1723_v61 = vcvt.f32.s32 %v1722_v7  ;;  %vm1859_vm5 = vcmp.eq.s32.totalorder %v3477_v33, %v1698_v55  ;;  %vm1805_vm6 = vcmp.lt.s32.totalorder %v4876_v40, %v1698_v55  ;;  %v1654_v12 = vcvt.f32.s32 %v4738_v6  ;;  %v1596_v28 = vpop.xlane.xlu1 %1595 }
 0x570   : > { %v5001_v43 = vsel %vm1859_vm5, -1.0, %v6720_v3  ;;  %v5004_v46 = vsel %vm1805_vm6, %v4876_v40, %v1698_v55  ;;  %vm1837_vm9 = vcmp.gt.s32.totalorder %v4888_v39, %v1698_v55  ;;  %v1597_v29 = vcvt.f32.s32 %v1596_v28  ;;  %v6724_v3 = vld [vmem:[#allocation85_spill] sm:$0xff] }
 0x571   : > { %v1726_v31 = vadd.s32 %v1725_v37, %v1723_v61  ;;  %1901 = vmax.xlane.f32.xlu0 %v5001_v43  ;;  %vm1850_vm10 = vcmp.eq.s32.totalorder %v3477_v33, %v1572_v2  ;;  %vm1787_vm11 = vcmp.lt.s32.totalorder %v4849_v54, %v1572_v2  ;;  %vm1819_vm12 = vcmp.gt.s32.totalorder %v4856_v23, %v1572_v2 }
 0x572   : > { %v5011_v11 = vsel %vm1850_vm10, -1.0, %v6721_v19  ;;  %v1750_v6 = vpop.xlane.xlu0 %1749  ;;  %v5014_v0 = vsel %vm1787_vm11, %v4849_v54, %v1572_v2  ;;  %v5018_v40 = vsel %vm1837_vm9, %v4888_v39, %v1698_v55  ;;  %v1600_v15 = vadd.s32 %v1599_v17, %v1597_v29  ;;  %v6726_v55 = vld [vmem:[#allocation86_spill] sm:$0xff] }
 0x573   : > { %6722 = vst [vmem:[#allocation56_spill] sm:$0xff] %v5011_v11  ;;  %1883 = vmax.xlane.f32.xlu1 %v5011_v11  ;;  %v1751_v37 = vcvt.f32.s32 %v1750_v6  ;;  %vm1861_vm13 = vcmp.eq.s32.totalorder %v3477_v33, %v1726_v31  ;;  %v5023_v7 = vsel %vm1819_vm12, %v4856_v23, %v1572_v2  ;;  %v1655_v61 = vshll.u32 %v1654_v12, 16  ;;  %v1624_v28 = vpop.xlane.xlu1 %1623 }
 0x574   : > { %6723 = vst [vmem:[#allocation45_spill] sm:$0xff] %v5023_v7  ;;  %v5026_v19 = vsel %vm1861_vm13, -1.0, %v6724_v3  ;;  %vm1809_vm14 = vcmp.lt.s32.totalorder %v4918_v53, %v1726_v31  ;;  %vm1841_vm15 = vcmp.gt.s32.totalorder %v4929_v58, %v1726_v31  ;;  %v1625_v39 = vcvt.f32.s32 %v1624_v28 }
 0x575   : > { %6725 = vst [vmem:[#allocation62_spill] sm:$0xff] %v5026_v19  ;;  %v1754_v54 = vadd.s32 %v1753_v16, %v1751_v37  ;;  %1905 = vmax.xlane.f32.xlu0 %v5026_v19  ;;  %vm1852_vm0 = vcmp.eq.s32.totalorder %v3477_v33, %v1600_v15  ;;  %vm1791_vm1 = vcmp.lt.s32.totalorder %v4896_v25, %v1600_v15  ;;  %v1682_v6 = vcvt.f32.s32 %v4743_v44  ;;  %v6732_v37 = vld [vmem:[#allocation87_spill] sm:$0xff] }
 0x576   : > { %v5034_v23 = vsel %vm1852_vm0, -1.0, %v6726_v55  ;;  %v5037_v17 = vsel %vm1791_vm1, %v4896_v25, %v1600_v15  ;;  %vm1823_vm2 = vcmp.gt.s32.totalorder %v4903_v24, %v1600_v15  ;;  %v5041_v2 = vsel %vm1809_vm14, %v4918_v53, %v1726_v31 }
 0x577   : > { %6727 = vst [vmem:[#allocation28_spill] sm:$0xff] %v5034_v23  ;;  %6728 = vst [vmem:[#allocation29_spill] sm:$0xff] %v5037_v17  ;;  %v1628_v12 = vadd.s32 %v1627_v50, %v1625_v39  ;;  %1887 = vmax.xlane.f32.xlu1 %v5034_v23  ;;  %vm1863_vm3 = vcmp.eq.s32.totalorder %v3477_v33, %v1754_v54  ;;  %v5046_v16 = vsel %vm1823_vm2, %v4903_v24, %v1600_v15  ;;  %v1652_v25 = vpop.xlane.xlu1 %1651  ;;  %v6734_v24 = vld [vmem:[#allocation88_spill] sm:$0xff]  ;;  %v6741_v39 = vld [vmem:[#allocation9_spill] sm:$0xff] }
 0x578   : > { %6729 = vst [vmem:[#allocation30_spill] sm:$0xff] %v5041_v2  ;;  %6730 = vst [vmem:[#allocation31_spill] sm:$0xff] %v5046_v16  ;;  %v5049_v29 = vsel %vm1841_vm15, %v4929_v58, %v1726_v31  ;;  %v5053_v28 = vsel %vm1863_vm3, -1.0, %v6732_v37  ;;  %vm1813_vm4 = vcmp.lt.s32.totalorder %v4983_v47, %v1754_v54  ;;  %vm1845_vm5 = vcmp.gt.s32.totalorder %v4991_v26, %v1754_v54  ;;  %v6742_v37 = vld [vmem:[#allocation89_spill] sm:$0xff]  ;;  %v6789_v17 = vld [vmem:[#allocation58_spill] sm:$0xff] }
 0x579   : > { %6731 = vst [vmem:[#allocation32_spill] sm:$0xff] %v5049_v29  ;;  %6733 = vst [vmem:[#allocation34_spill] sm:$0xff] %v5053_v28  ;;  %v1653_v53 = vcvt.f32.s32 %v1652_v25  ;;  %1909 = vmax.xlane.f32.xlu0 %v5053_v28  ;;  %vm1854_vm6 = vcmp.eq.s32.totalorder %v3477_v33, %v1628_v12  ;;  %vm1795_vm9 = vcmp.lt.s32.totalorder %v4945_v34, %v1628_v12  ;;  %v1710_v55 = vcvt.f32.s32 %v4748_v48 }
 0x57a   : > { %vm1827_vm10 = vcmp.gt.s32.totalorder %v4960_v41, %v1628_v12  ;;  %v5062_v58 = vsel %vm1854_vm6, -1.0, %v6734_v24  ;;  %v5065_v44 = vsel %vm1795_vm9, %v4945_v34, %v1628_v12  ;;  %v5071_v31 = vsel %vm1813_vm4, %v4983_v47, %v1754_v54  ;;  %v6740_v47 = vld [vmem:[#allocation90_spill] sm:$0xff]  ;;  %v6747_v24 = vld [vmem:[#allocation39_spill] sm:$0xff] }
 0x57b   : > { %6735 = vst [vmem:[#allocation33_spill] sm:$0xff] %v5062_v58  ;;  %6736 = vst [vmem:[#allocation36_spill] sm:$0xff] %v5065_v44  ;;  %v5068_v50 = vsel %vm1827_vm10, %v4960_v41, %v1628_v12  ;;  %v1656_v15 = vadd.s32 %v1655_v61, %v1653_v53  ;;  %1891 = vmax.xlane.f32.xlu1 %v5062_v58  ;;  %v1400_v3 = vsel %vm1399_vm7, %v6719_v57, %v4434_v18  ;;  %v1680_v12 = vpop.xlane.xlu1 %1679  ;;  %v6746_v53 = vld [vmem:[#allocation92_spill] sm:$0xff] }
 0x57c   : > { %6737 = vst [vmem:[#allocation35_spill] sm:$0xff] %v5068_v50  ;;  %6738 = vst [vmem:[#allocation38_spill] sm:$0xff] %v5071_v31  ;;  %v1432_v34 = vsel %vm1431_vm8, %v6719_v57, %v4434_v18  ;;  %v5085_v41 = vsel %vm1845_vm5, %v4991_v26, %v1754_v54  ;;  %vm1403_vm11 = vcmp.lt.s32.totalorder %v6741_v39, %v6740_v47  ;;  %v1683_v61 = vshll.u32 %v1682_v6, 16 }
 0x57d   : > { %6739 = vst [vmem:[#allocation37_spill] sm:$0xff] %v5085_v41  ;;  %vm1435_vm12 = vcmp.gt.s32.totalorder %v6741_v39, %v6740_v47  ;;  %v1681_v25 = vcvt.f32.s32 %v1680_v12  ;;  %vm1856_vm7 = vcmp.eq.s32.totalorder %v3477_v33, %v1656_v15  ;;  %vm1799_vm13 = vcmp.lt.s32.totalorder %v1400_v3, %v1656_v15 }
 0x57e   : > { %vm1831_vm14 = vcmp.gt.s32.totalorder %v1432_v34, %v1656_v15  ;;  %v5094_v18 = vsel %vm1856_vm7, -1.0, %v6742_v37  ;;  %v5096_v26 = vsel %vm1799_vm13, %v1400_v3, %v1656_v15  ;;  %v1404_v6 = vsel %vm1403_vm11, %v6741_v39, %v6740_v47 }
 0x57f   : > { %6743 = vst [vmem:[#allocation8_spill] sm:$0xff] %v5094_v18  ;;  %6744 = vst [vmem:[#allocation83_spill] sm:$0xff] %v5096_v26  ;;  %v5098_v57 = vsel %vm1831_vm14, %v1432_v34, %v1656_v15  ;;  %v1684_v54 = vadd.s32 %v1683_v61, %v1681_v25  ;;  %1895 = vmax.xlane.f32.xlu1 %v5094_v18  ;;  %v1436_v48 = vsel %vm1435_vm12, %v6741_v39, %v6740_v47  ;;  %v1708_v15 = vpop.xlane.xlu1 %1707  ;;  %v6748_v61 = vld [vmem:[#allocation91_spill] sm:$0xff] }
 0x580   : > { %6745 = vst [vmem:[#allocation84_spill] sm:$0xff] %v5098_v57  ;;  %vm1407_vm8 = vcmp.lt.s32.totalorder %v6747_v24, %v6746_v53  ;;  %vm1439_vm15 = vcmp.gt.s32.totalorder %v6747_v24, %v6746_v53  ;;  %v1711_v12 = vshll.u32 %v1710_v55, 16  ;;  %v1738_v3 = vcvt.f32.s32 %v4753_v30  ;;  %v6752_v30 = vld [vmem:[#allocation94_spill] sm:$0xff] }
 0x581   : > { %v1709_v34 = vcvt.f32.s32 %v1708_v15  ;;  %vm1858_vm0 = vcmp.eq.s32.totalorder %v3477_v33, %v1684_v54  ;;  %vm1803_vm1 = vcmp.lt.s32.totalorder %v1404_v6, %v1684_v54  ;;  %vm1835_vm2 = vcmp.gt.s32.totalorder %v1436_v48, %v1684_v54 }
 0x582   : > { %v5112_v25 = vsel %vm1858_vm0, -1.0, %v6748_v61  ;;  %v5114_v37 = vsel %vm1803_vm1, %v1404_v6, %v1684_v54  ;;  %v5116_v47 = vsel %vm1835_vm2, %v1436_v48, %v1684_v54  ;;  %v1408_v55 = vsel %vm1407_vm8, %v6747_v24, %v6746_v53  ;;  %v6754_v48 = vld [vmem:[#allocation93_spill] sm:$0xff] }
 0x583   : > { %6749 = vst [vmem:[#allocation85_spill] sm:$0xff] %v5112_v25  ;;  %6750 = vst [vmem:[#allocation86_spill] sm:$0xff] %v5114_v37  ;;  %v1712_v39 = vadd.s32 %v1711_v12, %v1709_v34  ;;  %1899 = vmax.xlane.f32.xlu1 %v5112_v25  ;;  %vm1411_vm3 = vcmp.lt.s32.totalorder %v6753_v45, %v6752_v30  ;;  %vm1443_vm4 = vcmp.gt.s32.totalorder %v6753_v45, %v6752_v30  ;;  %v1736_v36 = vpop.xlane.xlu1 %1735 }
 0x584   : > { %6751 = vst [vmem:[#allocation87_spill] sm:$0xff] %v5116_v47  ;;  %v1739_v15 = vshll.u32 %v1738_v3, 16  ;;  %v1440_v54 = vsel %vm1439_vm15, %v6747_v24, %v6746_v53  ;;  %v1737_v6 = vcvt.f32.s32 %v1736_v36  ;;  %v1412_v35 = vsel %vm1411_vm3, %v6753_v45, %v6752_v30  ;;  %v6758_v53 = vld [vmem:[#allocation95_spill] sm:$0xff] }
 0x585   : > { %vm1860_vm5 = vcmp.eq.s32.totalorder %v3477_v33, %v1712_v39  ;;  %vm1807_vm6 = vcmp.lt.s32.totalorder %v1408_v55, %v1712_v39  ;;  %vm1839_vm9 = vcmp.gt.s32.totalorder %v1440_v54, %v1712_v39  ;;  %v1444_v36 = vsel %vm1443_vm4, %v6753_v45, %v6752_v30  ;;  %v6763_v45 = vld [vmem:[#allocation43_spill] sm:$0xff] }
 0x586   : > { %v5132_v12 = vsel %vm1860_vm5, -1.0, %v6754_v48  ;;  %v5134_v34 = vsel %vm1807_vm6, %v1408_v55, %v1712_v39  ;;  %v5136_v61 = vsel %vm1839_vm9, %v1440_v54, %v1712_v39  ;;  %v1740_v3 = vadd.s32 %v1739_v15, %v1737_v6 }
 0x587   : > { %6755 = vst [vmem:[#allocation88_spill] sm:$0xff] %v5132_v12  ;;  %6756 = vst [vmem:[#allocation90_spill] sm:$0xff] %v5134_v34  ;;  %1903 = vmax.xlane.f32.xlu1 %v5132_v12  ;;  %v1766_v15 = vcvt.f32.s32 %v4766_v56  ;;  %vm1415_vm7 = vcmp.lt.s32.totalorder %v6763_v45, %v6762_v9  ;;  %vm1447_vm13 = vcmp.gt.s32.totalorder %v6763_v45, %v6762_v9 }
 0x588   : > { %6757 = vst [vmem:[#allocation9_spill] sm:$0xff] %v5136_v61  ;;  %vm1862_vm10 = vcmp.eq.s32.totalorder %v3477_v33, %v1740_v3  ;;  %vm1811_vm11 = vcmp.lt.s32.totalorder %v1412_v35, %v1740_v3  ;;  %vm1843_vm12 = vcmp.gt.s32.totalorder %v1444_v36, %v1740_v3 }
 0x589   : > { %v5145_v24 = vsel %vm1862_vm10, -1.0, %v6758_v53  ;;  %v5147_v55 = vsel %vm1811_vm11, %v1412_v35, %v1740_v3  ;;  %v5149_v39 = vsel %vm1843_vm12, %v1444_v36, %v1740_v3  ;;  %v1767_v6 = vshll.u32 %v1766_v15, 16  ;;  %v6767_v15 = vld [vmem:[#allocation49_spill] sm:$0xff] }
 0x58a   : > { %6759 = vst [vmem:[#allocation89_spill] sm:$0xff] %v5145_v24  ;;  %6760 = vst [vmem:[#allocation92_spill] sm:$0xff] %v5147_v55  ;;  %v1416_v35 = vsel %vm1415_vm7, %v6763_v45, %v6762_v9  ;;  %v1448_v3 = vsel %vm1447_vm13, %v6763_v45, %v6762_v9  ;;  %v5174_v9 = vpop.permute.xlu0 %2785 }
 0x58b   : > { %6761 = vst [vmem:[#allocation39_spill] sm:$0xff] %v5149_v39  ;;  %1907 = vmax.xlane.f32.xlu1 %v5145_v24  ;;  %6770 = vst [vmem:[#allocation93_spill] sm:$0xff] %v5174_v9 }
 0x5bc   : > { %v1764_v54 = vpop.xlane.xlu1 %1763 }
 0x5bd   : > { %v1765_v48 = vcvt.f32.s32 %v1764_v54  ;;  %v6768_v54 = vld [vmem:[#allocation23_spill] sm:$0xff] }
 0x5bf   : > { %v1768_v30 = vadd.s32 %v1767_v6, %v1765_v48  ;;  %v620_v6 = vadd.f32 %v6768_v54, %v6767_v15  ;;  %v6769_v48 = vld [vmem:[#allocation64_spill] sm:$0xff] }
 0x5c0   : > { %v5223_v13 = vpop.permute.xlu1 %2783 }
 0x5c1   : > { %vm1864_vm14 = vcmp.eq.s32.totalorder %v3477_v33, %v1768_v30  ;;  %vm1815_vm8 = vcmp.lt.s32.totalorder %v1416_v35, %v1768_v30  ;;  %vm1847_vm15 = vcmp.gt.s32.totalorder %v1448_v3, %v1768_v30  ;;  %v764_v21 = vmul.f32 %v6769_v48, %v620_v6  ;;  %6776 = vst [vmem:[#allocation114_spill] sm:$0xff] %v5223_v13 }
 0x5c2   : > { %v5163_v56 = vsel %vm1864_vm14, -1.0, %v4485_v32  ;;  %v5165_v36 = vsel %vm1815_vm8, %v1416_v35, %v1768_v30  ;;  %v5167_v53 = vsel %vm1847_vm15, %v1448_v3, %v1768_v30 }
 0x5c3   : > { %6764 = vst [vmem:[#allocation91_spill] sm:$0xff] %v5163_v56  ;;  %6765 = vst [vmem:[#allocation94_spill] sm:$0xff] %v5165_v36  ;;  %1911 = vmax.xlane.f32.xlu1 %v5163_v56 }
 0x5c4   : > { %6766 = vst [vmem:[#allocation10_spill] sm:$0xff] %v5167_v53 }
 0x5d4   : > { %2787 = vrot.lane.b32.xlu1 %v764_v21, %s3283_s14 }
 0x5e6   : > { %v5176_v45 = vpop.xlane.xlu0 %1881 }
 0x5e7   : > { %6771 = vst [vmem:[#allocation95_spill] sm:$0xff] %v5176_v45  ;;  %vm1913_vm0 = vcmp.eq.f32.partialorder %v4835_v42, %v5176_v45 }
 0x5e8   : > { %v5181_v32 = vsel %vm1913_vm0, %v3477_v33, 128 }
 0x5e9   : > { %v1946_v30 = vshra.s32 %v5181_v32, 16 }
 0x5ea   : > { %v5184_v35 = vpop.xlane.xlu0 %1885 }
 0x5eb   : > { %6772 = vst [vmem:[#allocation97_spill] sm:$0xff] %v5184_v35  ;;  %vm1915_vm1 = vcmp.eq.f32.partialorder %v4865_v62, %v5184_v35  ;;  %v5188_v3 = vcvt.s32.f32 %v1946_v30 }
 0x5ec   : > { %v5191_v21 = vsel %vm1915_vm1, %v3477_v33, 128 }
 0x5ed   : > { %1949 = vmin.xlane.f32.xlu0 %v5188_v3  ;;  %v1974_v15 = vshra.s32 %v5191_v21, 16 }
 0x5ee   : > { %v5195_v6 = vpop.xlane.xlu0 %1889 }
 0x5ef   : > { %6773 = vst [vmem:[#allocation43_spill] sm:$0xff] %v5195_v6  ;;  %vm1917_vm2 = vcmp.eq.f32.partialorder %v4907_v60, %v5195_v6  ;;  %v5199_v48 = vcvt.s32.f32 %v1974_v15 }
 0x5f0   : > { %v5202_v9 = vsel %vm1917_vm2, %v3477_v33, 128 }
 0x5f1   : > { %1977 = vmin.xlane.f32.xlu0 %v5199_v48  ;;  %v2002_v30 = vshra.s32 %v5202_v9, 16 }
 0x5f2   : > { %v5206_v35 = vpop.xlane.xlu0 %1893 }
 0x5f3   : > { %6774 = vst [vmem:[#allocation49_spill] sm:$0xff] %v5206_v35  ;;  %vm1919_vm3 = vcmp.eq.f32.partialorder %v4941_v59, %v5206_v35  ;;  %v5210_v45 = vcvt.s32.f32 %v2002_v30 }
 0x5f4   : > { %v5213_v54 = vsel %vm1919_vm3, %v3477_v33, 128 }
 0x5f5   : > { %2005 = vmin.xlane.f32.xlu0 %v5210_v45  ;;  %v2030_v15 = vshra.s32 %v5213_v54, 16 }
 0x5f6   : > { %v5217_v6 = vpop.xlane.xlu0 %1897 }
 0x5f7   : > { %6775 = vst [vmem:[#allocation64_spill] sm:$0xff] %v5217_v6  ;;  %vm1921_vm4 = vcmp.eq.f32.partialorder %v4970_v8, %v5217_v6  ;;  %v5221_v10 = vcvt.s32.f32 %v2030_v15 }
 0x5f8   : > { %v5226_v35 = vsel %vm1921_vm4, %v3477_v33, 128 }
 0x5f9   : > { %2033 = vmin.xlane.f32.xlu0 %v5221_v10  ;;  %v2058_v30 = vshra.s32 %v5226_v35, 16 }
 0x5fa   : > { %v5230_v1 = vpop.xlane.xlu0 %1901 }
 0x5fb   : > { %6777 = vst [vmem:[#allocation115_spill] sm:$0xff] %v5230_v1  ;;  %vm1923_vm5 = vcmp.eq.f32.partialorder %v5001_v43, %v5230_v1  ;;  %v5234_v52 = vcvt.s32.f32 %v2058_v30 }
 0x5fc   : > { %v5237_v6 = vsel %vm1923_vm5, %v3477_v33, 128  ;;  %v5239_v15 = vpop.xlane.xlu1 %1883 }
 0x5fd   : > { %6778 = vst [vmem:[#allocation116_spill] sm:$0xff] %v5239_v15  ;;  %vm1914_vm6 = vcmp.eq.f32.partialorder %v5011_v11, %v5239_v15  ;;  %2061 = vmin.xlane.f32.xlu0 %v5234_v52  ;;  %v2086_v13 = vshra.s32 %v5237_v6, 16 }
 0x5fe   : > { %v5246_v53 = vsel %vm1914_vm6, %v3477_v33, 128  ;;  %v5248_v36 = vpop.xlane.xlu0 %1905 }
 0x5ff   : > { %6779 = vst [vmem:[#allocation117_spill] sm:$0xff] %v5248_v36  ;;  %vm1925_vm9 = vcmp.eq.f32.partialorder %v5026_v19, %v5248_v36  ;;  %v5252_v30 = vcvt.s32.f32 %v2086_v13  ;;  %v1960_v1 = vshra.s32 %v5246_v53, 16 }
 0x600   : > { %v5256_v39 = vsel %vm1925_vm9, %v3477_v33, 128  ;;  %v5258_v15 = vpop.xlane.xlu1 %1887 }
 0x601   : > { %6780 = vst [vmem:[#allocation118_spill] sm:$0xff] %v5258_v15  ;;  %v2114_v55 = vshra.s32 %v5256_v39, 16  ;;  %vm1916_vm10 = vcmp.eq.f32.partialorder %v5034_v23, %v5258_v15  ;;  %2089 = vmin.xlane.f32.xlu0 %v5252_v30  ;;  %v5267_v36 = vcvt.s32.f32 %v1960_v1  ;;  %v6788_v23 = vld [vmem:[#allocation20_spill] sm:$0xff] }
 0x602   : > { %v5265_v61 = vsel %vm1916_vm10, %v3477_v33, 128  ;;  %v5269_v13 = vpop.xlane.xlu0 %1909 }
 0x603   : > { %6781 = vst [vmem:[#allocation119_spill] sm:$0xff] %v5269_v13  ;;  %vm1927_vm11 = vcmp.eq.f32.partialorder %v5053_v28, %v5269_v13  ;;  %v5273_v34 = vcvt.s32.f32 %v2114_v55  ;;  %v1988_v47 = vshra.s32 %v5265_v61, 16  ;;  %1963 = vmin.xlane.f32.xlu1 %v5267_v36 }
 0x604   : > { %v5278_v15 = vsel %vm1927_vm11, %v3477_v33, 128  ;;  %v5280_v37 = vpop.xlane.xlu1 %1891 }
 0x605   : > { %6782 = vst [vmem:[#allocation120_spill] sm:$0xff] %v5280_v37  ;;  %v2142_v57 = vshra.s32 %v5278_v15, 16  ;;  %vm1918_vm12 = vcmp.eq.f32.partialorder %v5062_v58, %v5280_v37  ;;  %2117 = vmin.xlane.f32.xlu0 %v5273_v34  ;;  %v5289_v55 = vcvt.s32.f32 %v1988_v47 }
 0x606   : > { %v5287_v1 = vsel %vm1918_vm12, %v3477_v33, 128 }
 0x607   : > { %v5291_v13 = vcvt.s32.f32 %v2142_v57  ;;  %v2016_v26 = vshra.s32 %v5287_v1, 16  ;;  %1991 = vmin.xlane.f32.xlu1 %v5289_v55 }
 0x608   : > { %v5295_v50 = vpop.xlane.xlu1 %1895 }
 0x609   : > { %6783 = vst [vmem:[#allocation121_spill] sm:$0xff] %v5295_v50  ;;  %vm1920_vm7 = vcmp.eq.f32.partialorder %v5094_v18, %v5295_v50  ;;  %2145 = vmin.xlane.f32.xlu0 %v5291_v13  ;;  %v5300_v37 = vcvt.s32.f32 %v2016_v26 }
 0x60a   : > { %v5303_v58 = vsel %vm1920_vm7, %v3477_v33, 128 }
 0x60b   : > { %v2044_v47 = vshra.s32 %v5303_v58, 16  ;;  %2019 = vmin.xlane.f32.xlu1 %v5300_v37 }
 0x60c   : > { %v5307_v57 = vpop.xlane.xlu1 %1899 }
 0x60d   : > { %6784 = vst [vmem:[#allocation122_spill] sm:$0xff] %v5307_v57  ;;  %vm1922_vm13 = vcmp.eq.f32.partialorder %v5112_v25, %v5307_v57  ;;  %v5311_v44 = vcvt.s32.f32 %v2044_v47 }
 0x60e   : > { %v5314_v50 = vsel %vm1922_vm13, %v3477_v33, 128 }
 0x60f   : > { %v2072_v26 = vshra.s32 %v5314_v50, 16  ;;  %2047 = vmin.xlane.f32.xlu1 %v5311_v44 }
 0x610   : > { %v5318_v18 = vpop.xlane.xlu1 %1903 }
 0x611   : > { %6785 = vst [vmem:[#allocation123_spill] sm:$0xff] %v5318_v18  ;;  %vm1924_vm14 = vcmp.eq.f32.partialorder %v5132_v12, %v5318_v18  ;;  %v5322_v41 = vcvt.s32.f32 %v2072_v26  ;;  %v6787_v12 = vld [vmem:[#allocation52_spill] sm:$0xff] }
 0x612   : > { %v5325_v31 = vsel %vm1924_vm14, %v3477_v33, 128  ;;  %v621_v16 = vadd.f32 %v6788_v23, %v6787_v12  ;;  %v6791_v12 = vld [vmem:[#allocation55_spill] sm:$0xff]  ;;  %v6792_v23 = vld [vmem:[#allocation24_spill] sm:$0xff] }
 0x613   : > { %v2100_v47 = vshra.s32 %v5325_v31, 16  ;;  %2075 = vmin.xlane.f32.xlu1 %v5322_v41  ;;  %v622_v2 = vadd.f32 %v6792_v23, %v6791_v12  ;;  %v2001_v12 = vand.u32 65535, %v5202_v9  ;;  %v2057_v9 = vand.u32 65535, %v5226_v35 }
 0x614   : > { %v5329_v57 = vpop.xlane.xlu1 %1907  ;;  %v765_v29 = vmul.f32 %v6789_v17, %v621_v16  ;;  %v6793_v17 = vld [vmem:[#allocation67_spill] sm:$0xff]  ;;  %v2113_v35 = vand.u32 65535, %v5256_v39 }
 0x615   : > { %6786 = vst [vmem:[#allocation124_spill] sm:$0xff] %v5329_v57  ;;  %vm1926_vm8 = vcmp.eq.f32.partialorder %v5145_v24, %v5329_v57  ;;  %v5333_v25 = vcvt.s32.f32 %v2100_v47  ;;  %v766_v16 = vmul.f32 %v6793_v17, %v622_v2  ;;  %v2003_v17 = vcvt.s32.f32 %v2001_v12 }
 0x616   : > { %v5336_v28 = vsel %vm1926_vm8, %v3477_v33, 128  ;;  %v2115_v39 = vcvt.s32.f32 %v2113_v35 }
 0x617   : > { %v2128_v26 = vshra.s32 %v5336_v28, 16  ;;  %2103 = vmin.xlane.f32.xlu1 %v5333_v25 }
 0x619   : > { %v5340_v18 = vcvt.s32.f32 %v2128_v26 }
 0x61b   : > { %2131 = vmin.xlane.f32.xlu1 %v5340_v18 }
 0x61f   : > { %2789 = vrot.lane.b32.xlu0 %v765_v29, %s3283_s14  ;;  %v1945_v29 = vand.u32 65535, %v5181_v32 }
 0x64c   : > { %v5347_v47 = vpop.xlane.xlu1 %1911 }
 0x64d   : > { %6790 = vst [vmem:[#allocation52_spill] sm:$0xff] %v5347_v47  ;;  %vm1928_vm15 = vcmp.eq.f32.partialorder %v5163_v56, %v5347_v47  ;;  %v1947_v47 = vcvt.s32.f32 %v1945_v29  ;;  %v1973_v56 = vand.u32 65535, %v5191_v21  ;;  %v2029_v21 = vand.u32 65535, %v5213_v54 }
 0x64e   : > { %v5352_v57 = vsel %vm1928_vm15, %v3477_v33, 128  ;;  %v2085_v54 = vand.u32 65535, %v5237_v6 }
 0x64f   : > { %v2156_v26 = vshra.s32 %v5352_v57, 16  ;;  %v1975_v7 = vcvt.s32.f32 %v1973_v56  ;;  %v2031_v56 = vcvt.s32.f32 %v2029_v21  ;;  %v2141_v21 = vand.u32 65535, %v5278_v15 }
 0x650   : > { %v5388_v29 = vpop.permute.xlu1 %2787 }
 0x651   : > { %v5355_v24 = vcvt.s32.f32 %v2156_v26  ;;  %6794 = vst [vmem:[#allocation58_spill] sm:$0xff] %v5388_v29 }
 0x653   : > { %2159 = vmin.xlane.f32.xlu1 %v5355_v24 }
 0x664   : > { %2791 = vrot.lane.b32.xlu1 %v766_v16, %s3283_s14  ;;  %v2059_v16 = vcvt.s32.f32 %v2057_v9 }
 0x676   : > { %v5363_v19 = vpop.xlane.xlu0 %1949 }
 0x677   : > { %vm1951_vm0 = vcmp.eq.f32.partialorder %v5188_v3, %v5363_v19 }
 0x678   : > { %v1952_v26 = vsel %vm1951_vm0, %v1947_v47, inf }
 0x679   : > { %1953 = vmin.xlane.f32.xlu0 %v1952_v26  ;;  %v1959_v26 = vand.u32 65535, %v5246_v53 }
 0x67a   : > { %v5368_v11 = vpop.xlane.xlu0 %1977 }
 0x67b   : > { %vm1979_vm1 = vcmp.eq.f32.partialorder %v5199_v48, %v5368_v11  ;;  %v1961_v6 = vcvt.s32.f32 %v1959_v26 }
 0x67c   : > { %v1980_v2 = vsel %vm1979_vm1, %v1975_v7, inf }
 0x67d   : > { %1981 = vmin.xlane.f32.xlu0 %v1980_v2 }
 0x67e   : > { %v5373_v32 = vpop.xlane.xlu0 %2005 }
 0x67f   : > { %vm2007_vm2 = vcmp.eq.f32.partialorder %v5210_v45, %v5373_v32 }
 0x680   : > { %v2008_v3 = vsel %vm2007_vm2, %v2003_v17, inf }
 0x681   : > { %2009 = vmin.xlane.f32.xlu0 %v2008_v3 }
 0x682   : > { %v5378_v47 = vpop.xlane.xlu0 %2033 }
 0x683   : > { %vm2035_vm3 = vcmp.eq.f32.partialorder %v5221_v10, %v5378_v47  ;;  %v2087_v10 = vcvt.s32.f32 %v2085_v54 }
 0x684   : > { %v2036_v7 = vsel %vm2035_vm3, %v2031_v56, inf }
 0x685   : > { %2037 = vmin.xlane.f32.xlu0 %v2036_v7 }
 0x686   : > { %v5383_v48 = vpop.xlane.xlu0 %2061 }
 0x687   : > { %vm2063_vm4 = vcmp.eq.f32.partialorder %v5234_v52, %v5383_v48  ;;  %v1987_v52 = vand.u32 65535, %v5265_v61  ;;  %v2015_v61 = vand.u32 65535, %v5287_v1 }
 0x688   : > { %v2064_v45 = vsel %vm2063_vm4, %v2059_v16, inf  ;;  %v2043_v16 = vand.u32 65535, %v5303_v58  ;;  %v2099_v58 = vand.u32 65535, %v5325_v31 }
 0x689   : > { %2065 = vmin.xlane.f32.xlu0 %v2064_v45  ;;  %v1989_v9 = vcvt.s32.f32 %v1987_v52  ;;  %v2017_v45 = vcvt.s32.f32 %v2015_v61  ;;  %v2155_v61 = vand.u32 65535, %v5352_v57  ;;  %v1984_v57 = vcvt.f32.s32 %v5368_v11 }
 0x68a   : > { %v5392_v12 = vpop.xlane.xlu0 %2089  ;;  %v2045_v35 = vcvt.s32.f32 %v2043_v16  ;;  %v2101_v52 = vcvt.s32.f32 %v2099_v58 }
 0x68b   : > { %vm2091_vm5 = vcmp.eq.f32.partialorder %v5252_v30, %v5392_v12 }
 0x68c   : > { %v2092_v2 = vsel %vm2091_vm5, %v2087_v10, inf  ;;  %v5396_v17 = vpop.xlane.xlu1 %1963 }
 0x68d   : > { %2093 = vmin.xlane.f32.xlu0 %v2092_v2  ;;  %vm1965_vm6 = vcmp.eq.f32.partialorder %v5267_v36, %v5396_v17  ;;  %v2143_v36 = vcvt.s32.f32 %v2141_v21 }
 0x68e   : > { %v5402_v53 = vpop.xlane.xlu0 %2117  ;;  %v1966_v3 = vsel %vm1965_vm6, %v1961_v6, inf }
 0x68f   : > { %vm2119_vm9 = vcmp.eq.f32.partialorder %v5273_v34, %v5402_v53  ;;  %1967 = vmin.xlane.f32.xlu1 %v1966_v3 }
 0x690   : > { %v2120_v30 = vsel %vm2119_vm9, %v2115_v39, inf  ;;  %v5406_v56 = vpop.xlane.xlu1 %1991  ;;  %v6795_v39 = vld [vmem:[#allocation41_spill] sm:$0xff] }
 0x691   : > { %2121 = vmin.xlane.f32.xlu0 %v2120_v30  ;;  %vm1993_vm10 = vcmp.eq.f32.partialorder %v5289_v55, %v5406_v56  ;;  %v2071_v55 = vand.u32 65535, %v5314_v50  ;;  %v2127_v50 = vand.u32 65535, %v5336_v28  ;;  %v6797_v28 = vld [vmem:[#allocation80_spill] sm:$0xff] }
 0x692   : > { %v5411_v15 = vpop.xlane.xlu0 %2145  ;;  %v1994_v7 = vsel %vm1993_vm10, %v1989_v9, inf }
 0x693   : > { %vm2147_vm11 = vcmp.eq.f32.partialorder %v5291_v13, %v5411_v15  ;;  %1995 = vmin.xlane.f32.xlu1 %v1994_v7  ;;  %v2073_v2 = vcvt.s32.f32 %v2071_v55  ;;  %v2129_v31 = vcvt.s32.f32 %v2127_v50  ;;  %v2012_v50 = vcvt.f32.s32 %v5373_v32 }
 0x694   : > { %v2148_v34 = vsel %vm2147_vm11, %v2143_v36, inf  ;;  %v5416_v54 = vpop.xlane.xlu1 %2019  ;;  %v2157_v36 = vcvt.s32.f32 %v2155_v61  ;;  %v2068_v61 = vcvt.f32.s32 %v5383_v48 }
 0x695   : > { %2149 = vmin.xlane.f32.xlu0 %v2148_v34  ;;  %vm2021_vm12 = vcmp.eq.f32.partialorder %v5300_v37, %v5416_v54  ;;  %v6799_v34 = vld [vmem:[#allocation15_spill] sm:$0xff]  ;;  %v2013_v32 = vshll.u32 %v2012_v50, 16 }
 0x696   : > { %v2022_v1 = vsel %vm2021_vm12, %v2017_v45, inf  ;;  %v6800_v45 = vld [vmem:[#allocation78_spill] sm:$0xff]  ;;  %v5452_v55 = vpop.permute.xlu0 %2789  ;;  %v2069_v48 = vshll.u32 %v2068_v61, 16 }
 0x697   : > { %2023 = vmin.xlane.f32.xlu1 %v2022_v1  ;;  %6801 = vst [vmem:[#allocation55_spill] sm:$0xff] %v5452_v55 }
 0x698   : > { %v5421_v26 = vpop.xlane.xlu1 %2047 }
 0x699   : > { %vm2049_vm7 = vcmp.eq.f32.partialorder %v5311_v44, %v5421_v26 }
 0x69a   : > { %v2050_v13 = vsel %vm2049_vm7, %v2045_v35, inf  ;;  %v1956_v35 = vcvt.f32.s32 %v5363_v19 }
 0x69b   : > { %2051 = vmin.xlane.f32.xlu1 %v2050_v13 }
 0x69c   : > { %v5426_v10 = vpop.xlane.xlu1 %2075  ;;  %v1957_v58 = vshll.u32 %v1956_v35, 16 }
 0x69d   : > { %vm2077_vm13 = vcmp.eq.f32.partialorder %v5322_v41, %v5426_v10  ;;  %v6796_v41 = vld [vmem:[#allocation14_spill] sm:$0xff] }
 0x69e   : > { %v2078_v37 = vsel %vm2077_vm13, %v2073_v2, inf  ;;  %v623_v3 = vadd.f32 %v6796_v41, %v6795_v39 }
 0x69f   : > { %2079 = vmin.xlane.f32.xlu1 %v2078_v37 }
 0x6a0   : > { %v5431_v6 = vpop.xlane.xlu1 %2103  ;;  %v767_v9 = vmul.f32 %v6797_v28, %v623_v3  ;;  %v2040_v3 = vcvt.f32.s32 %v5378_v47 }
 0x6a1   : > { %vm2105_vm14 = vcmp.eq.f32.partialorder %v5333_v25, %v5431_v6 }
 0x6a2   : > { %v2106_v44 = vsel %vm2105_vm14, %v2101_v52, inf  ;;  %v2041_v47 = vshll.u32 %v2040_v3, 16 }
 0x6a3   : > { %2107 = vmin.xlane.f32.xlu1 %v2106_v44 }
 0x6a4   : > { %v5435_v21 = vpop.xlane.xlu1 %2131 }
 0x6a5   : > { %vm2133_vm8 = vcmp.eq.f32.partialorder %v5340_v18, %v5435_v21  ;;  %v6798_v18 = vld [vmem:[#allocation40_spill] sm:$0xff] }
 0x6a6   : > { %v2134_v30 = vsel %vm2133_vm8, %v2129_v31, inf  ;;  %v624_v16 = vadd.f32 %v6799_v34, %v6798_v18 }
 0x6a7   : > { %2135 = vmin.xlane.f32.xlu1 %v2134_v30 }
 0x6a8   : > { %v768_v1 = vmul.f32 %v6800_v45, %v624_v16  ;;  %v2096_v16 = vcvt.f32.s32 %v5392_v12 }
 0x6ab   : > { %2793 = vrot.lane.b32.xlu0 %v767_v9, %s3283_s14 }
 0x6dc   : > { %v5444_v25 = vpop.xlane.xlu1 %2159 }
 0x6dd   : > { %vm2161_vm15 = vcmp.eq.f32.partialorder %v5355_v24, %v5444_v25  ;;  %v1985_v24 = vshll.u32 %v1984_v57, 16  ;;  %v2097_v57 = vshll.u32 %v2096_v16, 16  ;;  %v6815_v16 = vld [vmem:[#allocation62_spill] sm:$0xff] }
 0x6de   : > { %v2162_v7 = vsel %vm2161_vm15, %v2157_v36, inf }
 0x6df   : > { %2163 = vmin.xlane.f32.xlu1 %v2162_v7 }
 0x6e0   : > { %v5511_v35 = vpop.permute.xlu1 %2791 }
 0x6e1   : > { %6808 = vst [vmem:[#allocation15_spill] sm:$0xff] %v5511_v35 }
 0x6f0   : > { %2795 = vrot.lane.b32.xlu1 %v768_v1, %s3283_s14 }
 0x702   : > { %v1954_v13 = vpop.xlane.xlu0 %1953 }
 0x703   : > { %v1955_v2 = vcvt.f32.s32 %v1954_v13  ;;  %v1970_v13 = vcvt.f32.s32 %v5396_v17  ;;  %v1998_v17 = vcvt.f32.s32 %v5406_v56 }
 0x705   : > { %v1958_v37 = vadd.s32 %v1957_v58, %v1955_v2  ;;  %v2124_v58 = vcvt.f32.s32 %v5402_v53  ;;  %v2152_v53 = vcvt.f32.s32 %v5411_v15 }
 0x706   : > { %v1982_v52 = vpop.xlane.xlu0 %1981 }
 0x707   : > { %v1983_v44 = vcvt.f32.s32 %v1982_v52  ;;  %vm2249_vm0 = vcmp.eq.s32.totalorder %v3477_v33, %v1958_v37  ;;  %vm2185_vm1 = vcmp.lt.s32.totalorder %v4837_v14, %v1958_v37  ;;  %vm2217_vm2 = vcmp.gt.s32.totalorder %v4839_v4, %v1958_v37 }
 0x708   : > { %v5461_v31 = vsel %vm2249_vm0, -1.0, %v4835_v42  ;;  %v5464_v11 = vsel %vm2185_vm1, %v4837_v14, %v1958_v37  ;;  %v5467_v19 = vsel %vm2217_vm2, %v4839_v4, %v1958_v37 }
 0x709   : > { %v1986_v39 = vadd.s32 %v1985_v24, %v1983_v44  ;;  %2281 = vmax.xlane.f32.xlu0 %v5461_v31  ;;  %v2026_v24 = vcvt.f32.s32 %v5416_v54  ;;  %v1971_v44 = vshll.u32 %v1970_v13, 16  ;;  %v1999_v54 = vshll.u32 %v1998_v17, 16  ;;  %v6819_v17 = vld [vmem:[#allocation29_spill] sm:$0xff] }
 0x70a   : > { %v2010_v30 = vpop.xlane.xlu0 %2009 }
 0x70b   : > { %v2011_v28 = vcvt.f32.s32 %v2010_v30  ;;  %vm2251_vm3 = vcmp.eq.s32.totalorder %v3477_v33, %v1986_v39  ;;  %vm2189_vm4 = vcmp.lt.s32.totalorder %v4867_v5, %v1986_v39  ;;  %vm2221_vm5 = vcmp.gt.s32.totalorder %v4869_v38, %v1986_v39 }
 0x70c   : > { %v5475_v42 = vsel %vm2251_vm3, -1.0, %v4865_v62  ;;  %v5478_v14 = vsel %vm2189_vm4, %v4867_v5, %v1986_v39  ;;  %v5481_v4 = vsel %vm2221_vm5, %v4869_v38, %v1986_v39  ;;  %v2125_v39 = vshll.u32 %v2124_v58, 16 }
 0x70d   : > { %6802 = vst [vmem:[#allocation24_spill] sm:$0xff] %v5478_v14  ;;  %6803 = vst [vmem:[#allocation67_spill] sm:$0xff] %v5481_v4  ;;  %v2014_v9 = vadd.s32 %v2013_v32, %v2011_v28  ;;  %2285 = vmax.xlane.f32.xlu0 %v5475_v42  ;;  %v2153_v30 = vshll.u32 %v2152_v53, 16  ;;  %v2027_v28 = vshll.u32 %v2026_v24, 16  ;;  %v6820_v53 = vld [vmem:[#allocation31_spill] sm:$0xff]  ;;  %v6821_v24 = vld [vmem:[#allocation28_spill] sm:$0xff] }
 0x70e   : > { %v2038_v36 = vpop.xlane.xlu0 %2037  ;;  %v6894_v4 = vld [vmem:[#allocation52_spill] sm:$0xff] }
 0x70f   : > { %v2039_v7 = vcvt.f32.s32 %v2038_v36  ;;  %vm2253_vm6 = vcmp.eq.s32.totalorder %v3477_v33, %v2014_v9  ;;  %vm2193_vm9 = vcmp.lt.s32.totalorder %v4909_v49, %v2014_v9  ;;  %vm2225_vm10 = vcmp.gt.s32.totalorder %v4911_v27, %v2014_v9 }
 0x710   : > { %v5489_v62 = vsel %vm2253_vm6, -1.0, %v4907_v60  ;;  %v5492_v5 = vsel %vm2193_vm9, %v4909_v49, %v2014_v9  ;;  %v5495_v38 = vsel %vm2225_vm10, %v4911_v27, %v2014_v9 }
 0x711   : > { %6804 = vst [vmem:[#allocation41_spill] sm:$0xff] %v5492_v5  ;;  %6805 = vst [vmem:[#allocation14_spill] sm:$0xff] %v5495_v38  ;;  %v2042_v18 = vadd.s32 %v2041_v47, %v2039_v7  ;;  %2289 = vmax.xlane.f32.xlu0 %v5489_v62 }
 0x712   : > { %v2066_v45 = vpop.xlane.xlu0 %2065 }
 0x713   : > { %v2067_v1 = vcvt.f32.s32 %v2066_v45  ;;  %vm2255_vm11 = vcmp.eq.s32.totalorder %v3477_v33, %v2042_v18  ;;  %vm2197_vm12 = vcmp.lt.s32.totalorder %v4948_v51, %v2042_v18  ;;  %vm2229_vm7 = vcmp.gt.s32.totalorder %v4951_v20, %v2042_v18 }
 0x714   : > { %v5503_v60 = vsel %vm2255_vm11, -1.0, %v4941_v59  ;;  %v5506_v49 = vsel %vm2197_vm12, %v4948_v51, %v2042_v18  ;;  %v5509_v27 = vsel %vm2229_vm7, %v4951_v20, %v2042_v18 }
 0x715   : > { %6806 = vst [vmem:[#allocation80_spill] sm:$0xff] %v5506_v49  ;;  %6807 = vst [vmem:[#allocation40_spill] sm:$0xff] %v5509_v27  ;;  %v2070_v12 = vadd.s32 %v2069_v48, %v2067_v1  ;;  %2293 = vmax.xlane.f32.xlu0 %v5503_v60  ;;  %v6876_v49 = vld [vmem:[#allocation121_spill] sm:$0xff] }
 0x716   : > { %v2094_v2 = vpop.xlane.xlu0 %2093 }
 0x717   : > { %v2095_v37 = vcvt.f32.s32 %v2094_v2  ;;  %vm2257_vm13 = vcmp.eq.s32.totalorder %v3477_v33, %v2070_v12  ;;  %vm2201_vm14 = vcmp.lt.s32.totalorder %v4973_v63, %v2070_v12  ;;  %vm2233_vm8 = vcmp.gt.s32.totalorder %v4976_v22, %v2070_v12  ;;  %v6818_v2 = vld [vmem:[#allocation32_spill] sm:$0xff] }
 0x718   : > { %v5520_v59 = vsel %vm2257_vm13, -1.0, %v4970_v8  ;;  %v5523_v51 = vsel %vm2201_vm14, %v4973_v63, %v2070_v12  ;;  %v5526_v20 = vsel %vm2233_vm8, %v4976_v22, %v2070_v12  ;;  %v1968_v52 = vpop.xlane.xlu1 %1967  ;;  %v6816_v12 = vld [vmem:[#allocation30_spill] sm:$0xff] }
 0x719   : > { %6809 = vst [vmem:[#allocation78_spill] sm:$0xff] %v5523_v51  ;;  %6810 = vst [vmem:[#allocation125_spill] sm:$0xff] %v5526_v20  ;;  %v2098_v50 = vadd.s32 %v2097_v57, %v2095_v37  ;;  %2297 = vmax.xlane.f32.xlu0 %v5520_v59  ;;  %v1969_v8 = vcvt.f32.s32 %v1968_v52  ;;  %v2054_v57 = vcvt.f32.s32 %v5421_v26 }
 0x71a   : > { %v2122_v32 = vpop.xlane.xlu0 %2121 }
 0x71b   : > { %v2123_v3 = vcvt.f32.s32 %v2122_v32  ;;  %vm2259_vm15 = vcmp.eq.s32.totalorder %v3477_v33, %v2098_v50  ;;  %vm2205_vm0 = vcmp.lt.s32.totalorder %v5004_v46, %v2098_v50  ;;  %vm2237_vm1 = vcmp.gt.s32.totalorder %v5018_v40, %v2098_v50 }
 0x71c   : > { %v1972_v63 = vadd.s32 %v1971_v44, %v1969_v8  ;;  %v5536_v22 = vsel %vm2259_vm15, -1.0, %v5001_v43  ;;  %v5539_v56 = vsel %vm2205_vm0, %v5004_v46, %v2098_v50  ;;  %v5542_v15 = vsel %vm2237_vm1, %v5018_v40, %v2098_v50  ;;  %v1996_v47 = vpop.xlane.xlu1 %1995  ;;  %v6813_v43 = vld [vmem:[#allocation45_spill] sm:$0xff]  ;;  %v6814_v46 = vld [vmem:[#allocation56_spill] sm:$0xff] }
 0x71d   : > { %6811 = vst [vmem:[#allocation126_spill] sm:$0xff] %v5539_v56  ;;  %6812 = vst [vmem:[#allocation127_spill] sm:$0xff] %v5542_v15  ;;  %v2126_v9 = vadd.s32 %v2125_v39, %v2123_v3  ;;  %2301 = vmax.xlane.f32.xlu0 %v5536_v22  ;;  %v1997_v61 = vcvt.f32.s32 %v1996_v47  ;;  %v6824_v39 = vld [vmem:[#allocation34_spill] sm:$0xff] }
 0x71e   : > { %vm2250_vm2 = vcmp.eq.s32.totalorder %v3477_v33, %v1972_v63  ;;  %v2150_v36 = vpop.xlane.xlu0 %2149  ;;  %vm2187_vm3 = vcmp.lt.s32.totalorder %v5014_v0, %v1972_v63  ;;  %vm2219_vm4 = vcmp.gt.s32.totalorder %v6813_v43, %v1972_v63  ;;  %v6826_v3 = vld [vmem:[#allocation38_spill] sm:$0xff] }
 0x71f   : > { %v5549_v7 = vsel %vm2250_vm2, -1.0, %v6814_v46  ;;  %v2151_v40 = vcvt.f32.s32 %v2150_v36  ;;  %vm2261_vm5 = vcmp.eq.s32.totalorder %v3477_v33, %v2126_v9  ;;  %v5553_v18 = vsel %vm2187_vm3, %v5014_v0, %v1972_v63  ;;  %v6829_v36 = vld [vmem:[#allocation36_spill] sm:$0xff] }
 0x720   : > { %v2000_v48 = vadd.s32 %v1999_v54, %v1997_v61  ;;  %2283 = vmax.xlane.f32.xlu1 %v5549_v7  ;;  %v5557_v45 = vsel %vm2261_vm5, -1.0, %v6815_v16  ;;  %v5560_v1 = vsel %vm2219_vm4, %v6813_v43, %v1972_v63  ;;  %vm2209_vm6 = vcmp.lt.s32.totalorder %v6816_v12, %v2126_v9  ;;  %v2024_v58 = vpop.xlane.xlu1 %2023  ;;  %v6831_v43 = vld [vmem:[#allocation33_spill] sm:$0xff] }
 0x721   : > { %v2154_v13 = vadd.s32 %v2153_v30, %v2151_v40  ;;  %2305 = vmax.xlane.f32.xlu0 %v5557_v45  ;;  %v5566_v0 = vsel %vm2209_vm6, %v6816_v12, %v2126_v9  ;;  %vm2241_vm9 = vcmp.gt.s32.totalorder %v6818_v2, %v2126_v9  ;;  %v2025_v37 = vcvt.f32.s32 %v2024_v58 }
 0x722   : > { %6817 = vst [vmem:[#allocation45_spill] sm:$0xff] %v5566_v0  ;;  %vm2252_vm10 = vcmp.eq.s32.totalorder %v3477_v33, %v2000_v48  ;;  %vm2191_vm11 = vcmp.lt.s32.totalorder %v6819_v17, %v2000_v48  ;;  %vm2223_vm12 = vcmp.gt.s32.totalorder %v6820_v53, %v2000_v48  ;;  %v5587_v32 = vsel %vm2241_vm9, %v6818_v2, %v2126_v9  ;;  %v6830_v9 = vld [vmem:[#allocation35_spill] sm:$0xff] }
 0x723   : > { %v5573_v50 = vsel %vm2252_vm10, -1.0, %v6821_v24  ;;  %vm2263_vm7 = vcmp.eq.s32.totalorder %v3477_v33, %v2154_v13  ;;  %v5577_v26 = vsel %vm2191_vm11, %v6819_v17, %v2000_v48  ;;  %v5580_v52 = vsel %vm2223_vm12, %v6820_v53, %v2000_v48  ;;  %6825 = vst [vmem:[#allocation30_spill] sm:$0xff] %v5587_v32  ;;  %v6836_v17 = vld [vmem:[#allocation84_spill] sm:$0xff] }
 0x724   : > { %6822 = vst [vmem:[#allocation56_spill] sm:$0xff] %v5577_v26  ;;  %6823 = vst [vmem:[#allocation62_spill] sm:$0xff] %v5580_v52  ;;  %v2028_v44 = vadd.s32 %v2027_v28, %v2025_v37  ;;  %2287 = vmax.xlane.f32.xlu1 %v5573_v50  ;;  %v5584_v8 = vsel %vm2263_vm7, -1.0, %v6824_v39  ;;  %vm2213_vm13 = vcmp.lt.s32.totalorder %v6826_v3, %v2154_v13  ;;  %v2055_v63 = vshll.u32 %v2054_v57, 16  ;;  %v2052_v30 = vpop.xlane.xlu1 %2051  ;;  %v6828_v28 = vld [vmem:[#allocation37_spill] sm:$0xff]  ;;  %v6835_v37 = vld [vmem:[#allocation83_spill] sm:$0xff] }
 0x725   : > { %v2082_v54 = vcvt.f32.s32 %v5426_v10  ;;  %2309 = vmax.xlane.f32.xlu0 %v5584_v8  ;;  %v5593_v47 = vsel %vm2213_vm13, %v6826_v3, %v2154_v13  ;;  %vm2245_vm14 = vcmp.gt.s32.totalorder %v6828_v28, %v2154_v13  ;;  %v2053_v61 = vcvt.f32.s32 %v2052_v30  ;;  %v6837_v53 = vld [vmem:[#allocation8_spill] sm:$0xff]  ;;  %v6840_v30 = vld [vmem:[#allocation86_spill] sm:$0xff] }
 0x726   : > { %6827 = vst [vmem:[#allocation32_spill] sm:$0xff] %v5593_v47  ;;  %vm2254_vm8 = vcmp.eq.s32.totalorder %v3477_v33, %v2028_v44  ;;  %vm2195_vm15 = vcmp.lt.s32.totalorder %v6829_v36, %v2028_v44  ;;  %vm2227_vm0 = vcmp.gt.s32.totalorder %v6830_v9, %v2028_v44  ;;  %v5609_v48 = vsel %vm2245_vm14, %v6828_v28, %v2154_v13  ;;  %v6841_v28 = vld [vmem:[#allocation87_spill] sm:$0xff] }
 0x727   : > { %v5600_v46 = vsel %vm2254_vm8, -1.0, %v6831_v43  ;;  %v5603_v10 = vsel %vm2195_vm15, %v6829_v36, %v2028_v44  ;;  %v5606_v40 = vsel %vm2227_vm0, %v6830_v9, %v2028_v44  ;;  %6834 = vst [vmem:[#allocation28_spill] sm:$0xff] %v5609_v48  ;;  %v2056_v16 = vadd.s32 %v2055_v63, %v2053_v61  ;;  %v6842_v61 = vld [vmem:[#allocation85_spill] sm:$0xff] }
 0x728   : > { %6832 = vst [vmem:[#allocation29_spill] sm:$0xff] %v5603_v10  ;;  %6833 = vst [vmem:[#allocation31_spill] sm:$0xff] %v5606_v40  ;;  %2291 = vmax.xlane.f32.xlu1 %v5600_v46  ;;  %v2083_v12 = vshll.u32 %v2082_v54, 16  ;;  %v2110_v57 = vcvt.f32.s32 %v5431_v6  ;;  %v2080_v58 = vpop.xlane.xlu1 %2079  ;;  %v2138_v3 = vcvt.f32.s32 %v5435_v21  ;;  %v6881_v40 = vld [vmem:[#allocation112_spill] sm:$0xff] }
 0x729   : > { %v2081_v2 = vcvt.f32.s32 %v2080_v58  ;;  %vm2256_vm1 = vcmp.eq.s32.totalorder %v3477_v33, %v2056_v16  ;;  %vm2199_vm2 = vcmp.lt.s32.totalorder %v6835_v37, %v2056_v16  ;;  %vm2231_vm3 = vcmp.gt.s32.totalorder %v6836_v17, %v2056_v16  ;;  %v6845_v58 = vld [vmem:[#allocation90_spill] sm:$0xff] }
 0x72a   : > { %v5617_v24 = vsel %vm2256_vm1, -1.0, %v6837_v53  ;;  %v5620_v13 = vsel %vm2199_vm2, %v6835_v37, %v2056_v16  ;;  %v5623_v44 = vsel %vm2231_vm3, %v6836_v17, %v2056_v16  ;;  %v2111_v6 = vshll.u32 %v2110_v57, 16  ;;  %v6847_v37 = vld [vmem:[#allocation88_spill] sm:$0xff] }
 0x72b   : > { %6838 = vst [vmem:[#allocation34_spill] sm:$0xff] %v5620_v13  ;;  %6839 = vst [vmem:[#allocation38_spill] sm:$0xff] %v5623_v44  ;;  %v2084_v39 = vadd.s32 %v2083_v12, %v2081_v2  ;;  %v2139_v21 = vshll.u32 %v2138_v3, 16  ;;  %v6846_v2 = vld [vmem:[#allocation9_spill] sm:$0xff]  ;;  %v6850_v3 = vld [vmem:[#allocation92_spill] sm:$0xff] }
 0x72c   : > { %2295 = vmax.xlane.f32.xlu1 %v5617_v24  ;;  %v2108_v63 = vpop.xlane.xlu1 %2107  ;;  %v6879_v13 = vld [vmem:[#allocation76_spill] sm:$0xff] }
 0x72d   : > { %v2109_v54 = vcvt.f32.s32 %v2108_v63  ;;  %vm2258_vm4 = vcmp.eq.s32.totalorder %v3477_v33, %v2084_v39  ;;  %vm2203_vm5 = vcmp.lt.s32.totalorder %v6840_v30, %v2084_v39  ;;  %vm2235_vm6 = vcmp.gt.s32.totalorder %v6841_v28, %v2084_v39  ;;  %v6851_v63 = vld [vmem:[#allocation39_spill] sm:$0xff] }
 0x72e   : > { %v5631_v36 = vsel %vm2258_vm4, -1.0, %v6842_v61  ;;  %v5634_v9 = vsel %vm2203_vm5, %v6840_v30, %v2084_v39  ;;  %v5637_v43 = vsel %vm2235_vm6, %v6841_v28, %v2084_v39  ;;  %v6853_v30 = vld [vmem:[#allocation18_spill] sm:$0xff]  ;;  %v6854_v61 = vld [vmem:[#allocation89_spill] sm:$0xff] }
 0x72f   : > { %6843 = vst [vmem:[#allocation37_spill] sm:$0xff] %v5634_v9  ;;  %6844 = vst [vmem:[#allocation36_spill] sm:$0xff] %v5637_v43  ;;  %v2112_v16 = vadd.s32 %v2111_v6, %v2109_v54  ;;  %v6852_v54 = vld [vmem:[#allocation44_spill] sm:$0xff] }
 0x730   : > { %2299 = vmax.xlane.f32.xlu1 %v5631_v36  ;;  %v2136_v12 = vpop.xlane.xlu1 %2135  ;;  %v625_v28 = vadd.f32 %v6853_v30, %v6852_v54 }
 0x731   : > { %v2137_v57 = vcvt.f32.s32 %v2136_v12  ;;  %vm2260_vm9 = vcmp.eq.s32.totalorder %v3477_v33, %v2112_v16  ;;  %vm2207_vm10 = vcmp.lt.s32.totalorder %v6845_v58, %v2112_v16  ;;  %vm2239_vm11 = vcmp.gt.s32.totalorder %v6846_v2, %v2112_v16 }
 0x732   : > { %v5644_v17 = vsel %vm2260_vm9, -1.0, %v6847_v37  ;;  %v5647_v53 = vsel %vm2207_vm10, %v6845_v58, %v2112_v16  ;;  %v5650_v39 = vsel %vm2239_vm11, %v6846_v2, %v2112_v16  ;;  %v2166_v2 = vcvt.f32.s32 %v5444_v25  ;;  %v6863_v25 = vld [vmem:[#allocation47_spill] sm:$0xff] }
 0x733   : > { %6848 = vst [vmem:[#allocation35_spill] sm:$0xff] %v5647_v53  ;;  %6849 = vst [vmem:[#allocation33_spill] sm:$0xff] %v5650_v39  ;;  %v2140_v6 = vadd.s32 %v2139_v21, %v2137_v57  ;;  %v6857_v21 = vld [vmem:[#allocation82_spill] sm:$0xff] }
 0x734   : > { %2303 = vmax.xlane.f32.xlu1 %v5644_v17  ;;  %v769_v57 = vmul.f32 %v6857_v21, %v625_v28  ;;  %v2167_v48 = vshll.u32 %v2166_v2, 16  ;;  %v6864_v21 = vld [vmem:[#allocation21_spill] sm:$0xff] }
 0x735   : > { %vm2262_vm12 = vcmp.eq.s32.totalorder %v3477_v33, %v2140_v6  ;;  %vm2211_vm7 = vcmp.lt.s32.totalorder %v6850_v3, %v2140_v6  ;;  %vm2243_vm13 = vcmp.gt.s32.totalorder %v6851_v63, %v2140_v6 }
 0x736   : > { %v5659_v12 = vsel %vm2262_vm12, -1.0, %v6854_v61  ;;  %v5662_v58 = vsel %vm2211_vm7, %v6850_v3, %v2140_v6  ;;  %v5665_v16 = vsel %vm2243_vm13, %v6851_v63, %v2140_v6  ;;  %v6858_v61 = vld [vmem:[#allocation94_spill] sm:$0xff]  ;;  %v6860_v6 = vld [vmem:[#allocation91_spill] sm:$0xff] }
 0x737   : > { %6855 = vst [vmem:[#allocation83_spill] sm:$0xff] %v5662_v58  ;;  %6856 = vst [vmem:[#allocation84_spill] sm:$0xff] %v5665_v16  ;;  %v6859_v3 = vld [vmem:[#allocation10_spill] sm:$0xff] }
 0x738   : > { %2307 = vmax.xlane.f32.xlu1 %v5659_v12 }
 0x73b   : > { %2797 = vrot.lane.b32.xlu0 %v769_v57, %s3283_s14  ;;  %v6865_v57 = vld [vmem:[#allocation81_spill] sm:$0xff] }
 0x768   : > { %v2164_v37 = vpop.xlane.xlu1 %2163 }
 0x769   : > { %v2165_v54 = vcvt.f32.s32 %v2164_v37  ;;  %v5688_v37 = vpop.permute.xlu0 %2793 }
 0x76a   : > { %6866 = vst [vmem:[#allocation87_spill] sm:$0xff] %v5688_v37 }
 0x76b   : > { %v2168_v47 = vadd.s32 %v2167_v48, %v2165_v54  ;;  %v626_v48 = vadd.f32 %v6864_v21, %v6863_v25 }
 0x76c   : > { %v5720_v0 = vpop.permute.xlu1 %2795 }
 0x76d   : > { %vm2264_vm14 = vcmp.eq.s32.totalorder %v3477_v33, %v2168_v47  ;;  %vm2215_vm8 = vcmp.lt.s32.totalorder %v6858_v61, %v2168_v47  ;;  %vm2247_vm15 = vcmp.gt.s32.totalorder %v6859_v3, %v2168_v47  ;;  %v770_v2 = vmul.f32 %v6865_v57, %v626_v48  ;;  %6868 = vst [vmem:[#allocation85_spill] sm:$0xff] %v5720_v0  ;;  %v6870_v0 = vld [vmem:[#allocation117_spill] sm:$0xff] }
 0x76e   : > { %v5675_v63 = vsel %vm2264_vm14, -1.0, %v6860_v6  ;;  %v5678_v32 = vsel %vm2215_vm8, %v6858_v61, %v2168_v47  ;;  %v5681_v28 = vsel %vm2247_vm15, %v6859_v3, %v2168_v47 }
 0x76f   : > { %6861 = vst [vmem:[#allocation8_spill] sm:$0xff] %v5678_v32  ;;  %6862 = vst [vmem:[#allocation86_spill] sm:$0xff] %v5681_v28  ;;  %2311 = vmax.xlane.f32.xlu1 %v5675_v63 }
 0x780   : > { %2799 = vrot.lane.b32.xlu1 %v770_v2, %s3283_s14 }
 0x792   : > { %v5690_v54 = vpop.xlane.xlu0 %2281 }
 0x793   : > { %vm2313_vm0 = vcmp.eq.f32.partialorder %v5461_v31, %v5690_v54 }
 0x794   : > { %v5699_v61 = vsel %vm2313_vm0, %v3477_v33, 128 }
 0x795   : > { %v2346_v25 = vshra.s32 %v5699_v61, 16 }
 0x796   : > { %v5692_v6 = vpop.xlane.xlu0 %2285 }
 0x797   : > { %v5714_v2 = vcvt.s32.f32 %v2346_v25  ;;  %vm2315_vm4 = vcmp.eq.f32.partialorder %v5475_v42, %v5692_v6 }
 0x79a   : > { %v5696_v47 = vpop.xlane.xlu0 %2289 }
 0x79b   : > { %vm2317_vm1 = vcmp.eq.f32.partialorder %v5489_v62, %v5696_v47  ;;  %v6867_v62 = vld [vmem:[#allocation70_spill] sm:$0xff] }
 0x79c   : > { %v5707_v48 = vsel %vm2317_vm1, %v3477_v33, 128  ;;  %v1381_v32 = vadd.f32 1.0, %v6867_v62 }
 0x79d   : > { %v2402_v31 = vshra.s32 %v5707_v48, 16 }
 0x79e   : > { %v5703_v3 = vpop.xlane.xlu0 %2293 }
 0x79f   : > { %vm2319_vm2 = vcmp.eq.f32.partialorder %v5503_v60, %v5703_v3  ;;  %v6869_v60 = vld [vmem:[#allocation106_spill] sm:$0xff]  ;;  %v5731_v37 = vcvt.s32.f32 %v2402_v31 }
 0x7a0   : > { %v5717_v28 = vsel %vm2319_vm2, %v3477_v33, 128  ;;  %v1781_v58 = vadd.f32 %v6869_v60, %v1381_v32  ;;  %v5743_v32 = vsel %vm2315_vm4, %v3477_v33, 128 }
 0x7a1   : > { %v2430_v25 = vshra.s32 %v5717_v28, 16 }
 0x7a2   : > { %v5711_v57 = vpop.xlane.xlu0 %2297  ;;  %v2181_v15 = vadd.f32 %v6870_v0, %v1781_v58 }
 0x7a3   : > { %vm2321_vm3 = vcmp.eq.f32.partialorder %v5520_v59, %v5711_v57  ;;  %v5753_v58 = vcvt.s32.f32 %v2430_v25 }
 0x7a4   : > { %2349 = vmin.xlane.f32.xlu1 %v5714_v2  ;;  %v5734_v62 = vsel %vm2321_vm3, %v3477_v33, 128 }
 0x7a5   : > { %v2458_v31 = vshra.s32 %v5734_v62, 16 }
 0x7a6   : > { %v5725_v16 = vpop.xlane.xlu0 %2301 }
 0x7a7   : > { %vm2323_vm5 = vcmp.eq.f32.partialorder %v5536_v22, %v5725_v16  ;;  %v5774_v55 = vcvt.s32.f32 %v2458_v31 }
 0x7a8   : > { %2405 = vmin.xlane.f32.xlu1 %v5731_v37  ;;  %v5756_v22 = vsel %vm2323_vm5, %v3477_v33, 128 }
 0x7a9   : > { %v5739_v59 = vpop.xlane.xlu1 %2283 }
 0x7aa   : > { %vm2314_vm6 = vcmp.eq.f32.partialorder %v5549_v7, %v5739_v59  ;;  %v2306_v42 = vpop.xlane.xlu0 %2305  ;;  %v2374_v7 = vshra.s32 %v5743_v32, 16 }
 0x7ab   : > { %v5749_v60 = vsel %vm2314_vm6, %v3477_v33, 128  ;;  %v5751_v0 = vadd.f32 %v2306_v42, %v2181_v15  ;;  %vm2325_vm9 = vcmp.eq.f32.partialorder %v5557_v45, %v2306_v42  ;;  %v6872_v45 = vld [vmem:[#allocation74_spill] sm:$0xff] }
 0x7ac   : > { %v2360_v56 = vshra.s32 %v5749_v60, 16  ;;  %2433 = vmin.xlane.f32.xlu1 %v5753_v58  ;;  %v1376_v42 = vadd.f32 1.0, %v6872_v45  ;;  %v5778_v20 = vsel %vm2325_vm9, %v3477_v33, 128  ;;  %v5790_v31 = vcvt.s32.f32 %v2374_v7  ;;  %v6875_v45 = vld [vmem:[#allocation75_spill] sm:$0xff] }
 0x7ad   : > { %6871 = vst [vmem:[#allocation90_spill] sm:$0xff] %v5751_v0  ;;  %v5760_v39 = vpop.xlane.xlu1 %2287  ;;  %v2486_v0 = vshra.s32 %v5756_v22, 16  ;;  %v1378_v43 = vadd.f32 1.0, %v6875_v45  ;;  %v2514_v9 = vshra.s32 %v5778_v20, 16 }
 0x7ae   : > { %vm2316_vm10 = vcmp.eq.f32.partialorder %v5573_v50, %v5760_v39  ;;  %v5766_v15 = vcvt.s32.f32 %v2360_v56  ;;  %v5768_v25 = vpop.xlane.xlu0 %2309  ;;  %v6874_v50 = vld [vmem:[#allocation110_spill] sm:$0xff] }
 0x7af   : > { %v5772_v53 = vsel %vm2316_vm10, %v3477_v33, 128  ;;  %vm2327_vm11 = vcmp.eq.f32.partialorder %v5584_v8, %v5768_v25  ;;  %v1776_v51 = vadd.f32 %v6874_v50, %v1376_v42  ;;  %v5797_v8 = vcvt.s32.f32 %v2486_v0  ;;  %v6877_v50 = vld [vmem:[#allocation111_spill] sm:$0xff] }
 0x7b0   : > { %2363 = vmin.xlane.f32.xlu0 %v5766_v15  ;;  %2461 = vmin.xlane.f32.xlu1 %v5774_v55  ;;  %v2388_v35 = vshra.s32 %v5772_v53, 16  ;;  %v5801_v42 = vsel %vm2327_vm11, %v3477_v33, 128  ;;  %v5817_v5 = vcvt.s32.f32 %v2514_v9 }
 0x7b1   : > { %v5783_v56 = vpop.xlane.xlu1 %2291  ;;  %v2176_v29 = vadd.f32 %v6876_v49, %v1776_v51  ;;  %v1380_v49 = vadd.f32 1.0, %v6879_v13  ;;  %v2542_v51 = vshra.s32 %v5801_v42, 16 }
 0x7b2   : > { %6873 = vst [vmem:[#allocation9_spill] sm:$0xff] %v5783_v56  ;;  %vm2318_vm12 = vcmp.eq.f32.partialorder %v5600_v46, %v5783_v56  ;;  %v1778_v46 = vadd.f32 %v6877_v50, %v1378_v43  ;;  %v5810_v0 = vcvt.s32.f32 %v2388_v35  ;;  %v6880_v43 = vld [vmem:[#allocation122_spill] sm:$0xff] }
 0x7b3   : > { %v5795_v27 = vsel %vm2318_vm12, %v3477_v33, 128  ;;  %v1780_v10 = vadd.f32 %v6881_v40, %v1380_v49  ;;  %v6885_v49 = vld [vmem:[#allocation113_spill] sm:$0xff] }
 0x7b4   : > { %2377 = vmin.xlane.f32.xlu0 %v5790_v31  ;;  %2489 = vmin.xlane.f32.xlu1 %v5797_v8  ;;  %v2416_v45 = vshra.s32 %v5795_v27, 16  ;;  %v2178_v50 = vadd.f32 %v6880_v43, %v1778_v46  ;;  %v5833_v46 = vcvt.s32.f32 %v2542_v51  ;;  %v6884_v43 = vld [vmem:[#allocation123_spill] sm:$0xff] }
 0x7b5   : > { %v2296_v7 = vpop.xlane.xlu1 %2295  ;;  %v2180_v40 = vadd.f32 %v6884_v43, %v1780_v10 }
 0x7b6   : > { %vm2320_vm7 = vcmp.eq.f32.partialorder %v5617_v24, %v2296_v7  ;;  %v5808_v44 = vadd.f32 %v2296_v7, %v2176_v29  ;;  %v5827_v13 = vcvt.s32.f32 %v2416_v45  ;;  %v6883_v7 = vld [vmem:[#allocation77_spill] sm:$0xff] }
 0x7b7   : > { %v5815_v38 = vsel %vm2320_vm7, %v3477_v33, 128  ;;  %v1382_v9 = vadd.f32 1.0, %v6883_v7 }
 0x7b8   : > { %6878 = vst [vmem:[#allocation88_spill] sm:$0xff] %v5808_v44  ;;  %2391 = vmin.xlane.f32.xlu0 %v5810_v0  ;;  %2517 = vmin.xlane.f32.xlu1 %v5817_v5  ;;  %v2444_v29 = vshra.s32 %v5815_v38, 16 }
 0x7b9   : > { %v2300_v24 = vpop.xlane.xlu1 %2299  ;;  %v1782_v52 = vadd.f32 %v6885_v49, %v1382_v9 }
 0x7ba   : > { %vm2322_vm13 = vcmp.eq.f32.partialorder %v5631_v36, %v2300_v24  ;;  %v5825_v35 = vadd.f32 %v2300_v24, %v2178_v50  ;;  %v5843_v50 = vcvt.s32.f32 %v2444_v29  ;;  %v6887_v24 = vld [vmem:[#allocation124_spill] sm:$0xff] }
 0x7bb   : > { %v5831_v44 = vsel %vm2322_vm13, %v3477_v33, 128  ;;  %v2182_v10 = vadd.f32 %v6887_v24, %v1782_v52  ;;  %v6889_v52 = vld [vmem:[#allocation51_spill] sm:$0xff] }
 0x7bc   : > { %6882 = vst [vmem:[#allocation92_spill] sm:$0xff] %v5825_v35  ;;  %2419 = vmin.xlane.f32.xlu0 %v5827_v13  ;;  %2545 = vmin.xlane.f32.xlu1 %v5833_v46  ;;  %v2472_v36 = vshra.s32 %v5831_v44, 16 }
 0x7bd   : > { %v2304_v26 = vpop.xlane.xlu1 %2303 }
 0x7be   : > { %vm2324_vm14 = vcmp.eq.f32.partialorder %v5644_v17, %v2304_v26  ;;  %v5841_v45 = vadd.f32 %v2304_v26, %v2180_v40  ;;  %v5854_v49 = vcvt.s32.f32 %v2472_v36  ;;  %v6890_v40 = vld [vmem:[#allocation25_spill] sm:$0xff]  ;;  %v6892_v36 = vld [vmem:[#allocation79_spill] sm:$0xff] }
 0x7bf   : > { %v5846_v51 = vsel %vm2324_vm14, %v3477_v33, 128  ;;  %v628_v24 = vadd.f32 %v6890_v40, %v6889_v52 }
 0x7c0   : > { %6886 = vst [vmem:[#allocation39_spill] sm:$0xff] %v5841_v45  ;;  %2447 = vmin.xlane.f32.xlu0 %v5843_v50  ;;  %v2500_v9 = vshra.s32 %v5846_v51, 16 }
 0x7c1   : > { %v2308_v7 = vpop.xlane.xlu1 %2307 }
 0x7c2   : > { %vm2326_vm8 = vcmp.eq.f32.partialorder %v5659_v12, %v2308_v7  ;;  %v5852_v43 = vadd.f32 %v2308_v7, %v2182_v10  ;;  %v5861_v29 = vcvt.s32.f32 %v2500_v9  ;;  %v6891_v12 = vld [vmem:[#allocation96_spill] sm:$0xff]  ;;  %v1384_v7 = vadd.f32 1.0, %v6892_v36 }
 0x7c3   : > { %v5857_v26 = vsel %vm2326_vm8, %v3477_v33, 128  ;;  %v772_v10 = vmul.f32 %v6891_v12, %v628_v24  ;;  %v6896_v12 = vld [vmem:[#allocation48_spill] sm:$0xff] }
 0x7c4   : > { %6888 = vst [vmem:[#allocation44_spill] sm:$0xff] %v5852_v43  ;;  %2475 = vmin.xlane.f32.xlu0 %v5854_v49  ;;  %v2528_v17 = vshra.s32 %v5857_v26, 16  ;;  %v6893_v43 = vld [vmem:[#allocation11_spill] sm:$0xff] }
 0x7c5   : > { %v1784_v35 = vadd.f32 %v6893_v43, %v1384_v7  ;;  %v6898_v43 = vld [vmem:[#allocation98_spill] sm:$0xff] }
 0x7c6   : > { %v5866_v45 = vcvt.s32.f32 %v2528_v17 }
 0x7c7   : > { %v2184_v9 = vadd.f32 %v6894_v4, %v1784_v35 }
 0x7c8   : > { %2503 = vmin.xlane.f32.xlu0 %v5861_v29 }
 0x7cc   : > { %2531 = vmin.xlane.f32.xlu0 %v5866_v45 }
 0x7cd   : > { %2803 = vrot.lane.b32.xlu1 %v772_v10, %s3283_s14  ;;  %v6897_v10 = vld [vmem:[#allocation22_spill] sm:$0xff] }
 0x7ce   : > { %v627_v36 = vadd.f32 %v6897_v10, %v6896_v12 }
 0x7d0   : > { %v771_v7 = vmul.f32 %v6898_v43, %v627_v36  ;;  %v2373_v36 = vand.u32 65535, %v5743_v32  ;;  %v2401_v32 = vand.u32 65535, %v5707_v48 }
 0x7f8   : > { %v2312_v14 = vpop.xlane.xlu1 %2311 }
 0x7f9   : > { %vm2328_vm15 = vcmp.eq.f32.partialorder %v5675_v63, %v2312_v14  ;;  %v5875_v56 = vadd.f32 %v2312_v14, %v2184_v9  ;;  %v2345_v14 = vand.u32 65535, %v5699_v61  ;;  %v2359_v9 = vand.u32 65535, %v5749_v60 }
 0x7fa   : > { %v5878_v17 = vsel %vm2328_vm15, %v3477_v33, 128 }
 0x7fb   : > { %6895 = vst [vmem:[#allocation18_spill] sm:$0xff] %v5875_v56  ;;  %v2556_v52 = vshra.s32 %v5878_v17, 16  ;;  %v2347_v33 = vcvt.s32.f32 %v2345_v14 }
 0x7fc   : > { %v5888_v4 = vpop.permute.xlu1 %2799 }
 0x7fd   : > { %v5881_v24 = vcvt.s32.f32 %v2556_v52  ;;  %6899 = vst [vmem:[#allocation89_spill] sm:$0xff] %v5888_v4  ;;  %v5896_v52 = vpop.permute.xlu0 %2797  ;;  %v6937_v4 = vld [vmem:[#allocation102_spill] sm:$0xff] }
 0x7fe   : > { %6900 = vst [vmem:[#allocation82_spill] sm:$0xff] %v5896_v52 }
 0x7ff   : > { %2559 = vmin.xlane.f32.xlu0 %v5881_v24 }
 0x815   : > { %2801 = vrot.lane.b32.xlu0 %v771_v7, %s3283_s14  ;;  %v2361_v7 = vcvt.s32.f32 %v2359_v9  ;;  %v2415_v9 = vand.u32 65535, %v5795_v27  ;;  %v2403_v27 = vcvt.s32.f32 %v2401_v32 }
 0x82d   : > { %v5891_v63 = vpop.xlane.xlu1 %2349 }
 0x82e   : > { %vm2351_vm0 = vcmp.eq.f32.partialorder %v5714_v2, %v5891_v63  ;;  %v2387_v2 = vand.u32 65535, %v5772_v53 }
 0x82f   : > { %v2352_v35 = vsel %vm2351_vm0, %v2347_v33, inf  ;;  %v2375_v33 = vcvt.s32.f32 %v2373_v36  ;;  %v2443_v36 = vand.u32 65535, %v5815_v38 }
 0x831   : > { %v5898_v12 = vpop.xlane.xlu1 %2405  ;;  %v2445_v32 = vcvt.s32.f32 %v2443_v36 }
 0x832   : > { %vm2407_vm4 = vcmp.eq.f32.partialorder %v5731_v37, %v5898_v12  ;;  %v2457_v37 = vand.u32 65535, %v5734_v62  ;;  %v2485_v62 = vand.u32 65535, %v5756_v22  ;;  %v2527_v22 = vand.u32 65535, %v5857_v26 }
 0x834   : > { %2353 = vmin.xlane.f32.xlu0 %v2352_v35 }
 0x835   : > { %v5906_v14 = vpop.xlane.xlu1 %2433 }
 0x836   : > { %vm2435_vm6 = vcmp.eq.f32.partialorder %v5753_v58, %v5906_v14 }
 0x839   : > { %v5901_v43 = vpop.xlane.xlu0 %2363  ;;  %v5918_v53 = vpop.xlane.xlu1 %2461 }
 0x83a   : > { %vm2365_vm1 = vcmp.eq.f32.partialorder %v5766_v15, %v5901_v43  ;;  %v2389_v15 = vcvt.s32.f32 %v2387_v2  ;;  %v2408_v2 = vsel %vm2407_vm4, %v2403_v27, inf  ;;  %vm2463_vm10 = vcmp.eq.f32.partialorder %v5774_v55, %v5918_v53 }
 0x83b   : > { %v2366_v61 = vsel %vm2365_vm1, %v2361_v7, inf  ;;  %v2513_v55 = vand.u32 65535, %v5778_v20  ;;  %v2487_v27 = vcvt.s32.f32 %v2485_v62 }
 0x83c   : > { %2367 = vmin.xlane.f32.xlu1 %v2366_v61  ;;  %v2417_v61 = vcvt.s32.f32 %v2415_v9 }
 0x83d   : > { %v5908_v60 = vpop.xlane.xlu0 %2377  ;;  %v2515_v26 = vcvt.s32.f32 %v2513_v55  ;;  %v6908_v55 = vld [vmem:[#allocation50_spill] sm:$0xff] }
 0x83e   : > { %vm2379_vm2 = vcmp.eq.f32.partialorder %v5790_v31, %v5908_v60  ;;  %v2429_v31 = vand.u32 65535, %v5717_v28  ;;  %v2471_v28 = vand.u32 65535, %v5831_v44  ;;  %v2499_v44 = vand.u32 65535, %v5846_v51 }
 0x83f   : > { %v2380_v35 = vsel %vm2379_vm2, %v2375_v33, inf  ;;  %v5932_v33 = vpop.xlane.xlu1 %2489 }
 0x840   : > { %2381 = vmin.xlane.f32.xlu0 %v2380_v35  ;;  %v2431_v35 = vcvt.s32.f32 %v2429_v31  ;;  %vm2491_vm12 = vcmp.eq.f32.partialorder %v5797_v8, %v5932_v33  ;;  %v2541_v8 = vand.u32 65535, %v5801_v42  ;;  %v6902_v42 = vld [vmem:[#allocation54_spill] sm:$0xff] }
 0x841   : > { %v5914_v56 = vpop.xlane.xlu0 %2391 }
 0x842   : > { %vm2393_vm3 = vcmp.eq.f32.partialorder %v5810_v0, %v5914_v56 }
 0x843   : > { %v2394_v7 = vsel %vm2393_vm3, %v2389_v15, inf  ;;  %v2459_v15 = vcvt.s32.f32 %v2457_v37  ;;  %v5946_v31 = vpop.xlane.xlu1 %2517  ;;  %v2529_v37 = vcvt.s32.f32 %v2527_v22 }
 0x844   : > { %2395 = vmin.xlane.f32.xlu0 %v2394_v7  ;;  %v2473_v7 = vcvt.s32.f32 %v2471_v28  ;;  %vm2519_vm13 = vcmp.eq.f32.partialorder %v5817_v5, %v5946_v31  ;;  %v2543_v5 = vcvt.s32.f32 %v2541_v8 }
 0x845   : > { %v5924_v48 = vpop.xlane.xlu0 %2419  ;;  %v2520_v28 = vsel %vm2519_vm13, %v2515_v26, inf  ;;  %v6913_v26 = vld [vmem:[#allocation16_spill] sm:$0xff] }
 0x846   : > { %vm2421_vm5 = vcmp.eq.f32.partialorder %v5827_v13, %v5924_v48  ;;  %v2436_v13 = vsel %vm2435_vm6, %v2431_v35, inf  ;;  %vm2841_vm6 = vcmask 7168  }
 0x847   : > { %v2422_v0 = vsel %vm2421_vm5, %v2417_v61, inf  ;;  %v2501_v61 = vcvt.s32.f32 %v2499_v44  ;;  %v2555_v44 = vand.u32 65535, %v5878_v17  ;;  %v6910_v17 = vld [vmem:[#allocation17_spill] sm:$0xff] }
 0x848   : > { %2409 = vmin.xlane.f32.xlu0 %v2408_v2  ;;  %2423 = vmin.xlane.f32.xlu1 %v2422_v0  ;;  %v5959_v0 = vpop.xlane.xlu1 %2545 }
 0x849   : > { %v5934_v38 = vpop.xlane.xlu0 %2447  ;;  %vm2547_vm8 = vcmp.eq.f32.partialorder %v5833_v46, %v5959_v0 }
 0x84a   : > { %vm2449_vm9 = vcmp.eq.f32.partialorder %v5843_v50, %v5934_v38  ;;  %v2464_v50 = vsel %vm2463_vm10, %v2459_v15, inf  ;;  %v2548_v35 = vsel %vm2547_vm8, %v2543_v5, inf  ;;  %v2557_v15 = vcvt.s32.f32 %v2555_v44 }
 0x84b   : > { %v2450_v9 = vsel %vm2449_vm9, %v2445_v32, inf  ;;  %v6903_v32 = vld [vmem:[#allocation26_spill] sm:$0xff]  ;;  %v5999_v5 = vmul.f32 0.7, %v6799_v34  ;;  %v6014_v44 = vmul.f32 0.7, %v6897_v10 }
 0x84c   : > { %2437 = vmin.xlane.f32.xlu0 %v2436_v13  ;;  %2451 = vmin.xlane.f32.xlu1 %v2450_v9  ;;  %v629_v13 = vadd.f32 %v6903_v32, %v6902_v42  ;;  %v6904_v9 = vld [vmem:[#allocation53_spill] sm:$0xff]  ;;  %v6917_v42 = vld [vmem:[#allocation23_spill] sm:$0xff]  ;;  %v6923_v34 = vld [vmem:[#allocation60_spill] sm:$0xff] }
 0x84d   : > { %v5942_v58 = vpop.xlane.xlu0 %2475  ;;  %6915 = vst [vmem:[#allocation47_spill] sm:$0xff] %v5999_v5  ;;  %6921 = vst [vmem:[#allocation106_spill] sm:$0xff] %v6014_v44  ;;  %v6926_v10 = vld [vmem:[#allocation63_spill] sm:$0xff] }
 0x84e   : > { %vm2477_vm11 = vcmp.eq.f32.partialorder %v5854_v49, %v5942_v58  ;;  %v2492_v49 = vsel %vm2491_vm12, %v2487_v27, inf  ;;  %v773_v62 = vmul.f32 %v6904_v9, %v629_v13  ;;  %v6909_v27 = vld [vmem:[#allocation12_spill] sm:$0xff]  ;;  %v6005_v13 = vmul.f32 0.7, %v6917_v42 }
 0x84f   : > { %v2478_v36 = vsel %vm2477_vm11, %v2473_v7, inf  ;;  %v6906_v7 = vld [vmem:[#allocation57_spill] sm:$0xff]  ;;  %v6919_v9 = vld [vmem:[#allocation20_spill] sm:$0xff] }
 0x850   : > { %2465 = vmin.xlane.f32.xlu0 %v2464_v50  ;;  %2479 = vmin.xlane.f32.xlu1 %v2478_v36  ;;  %v6907_v50 = vld [vmem:[#allocation27_spill] sm:$0xff] }
 0x851   : > { %v5952_v51 = vpop.xlane.xlu0 %2503  ;;  %v630_v36 = vadd.f32 %v6907_v50, %v6906_v7  ;;  %v2356_v7 = vcvt.f32.s32 %v5891_v63  ;;  %v6931_v50 = vld [vmem:[#allocation71_spill] sm:$0xff] }
 0x852   : > { %vm2505_vm7 = vcmp.eq.f32.partialorder %v5861_v29, %v5952_v51  ;;  %v6934_v63 = vld [vmem:[#allocation99_spill] sm:$0xff] }
 0x853   : > { %v2506_v2 = vsel %vm2505_vm7, %v2501_v61, inf  ;;  %v774_v22 = vmul.f32 %v6908_v55, %v630_v36  ;;  %v5981_v61 = vmul.f32 0.7, %v6909_v27  ;;  %v6925_v36 = vld [vmem:[#allocation61_spill] sm:$0xff] }
 0x854   : > { %2493 = vmin.xlane.f32.xlu0 %v2492_v49  ;;  %2507 = vmin.xlane.f32.xlu1 %v2506_v2  ;;  %v5984_v49 = vmul.f32 0.7, %v6910_v17  ;;  %v5987_v2 = vmul.f32 0.7, %v6796_v41  ;;  %v6008_v41 = vmul.f32 0.7, %v6864_v21 }
 0x855   : > { %v5961_v20 = vpop.xlane.xlu0 %2531  ;;  %v6027_v21 = vmul.f32 0.7, %v6890_v40  ;;  %v1371_v55 = vadd.f32 1.0, %v6925_v36  ;;  %v6927_v27 = vld [vmem:[#allocation65_spill] sm:$0xff]  ;;  %v6935_v36 = vld [vmem:[#allocation100_spill] sm:$0xff]  ;;  %vm2665_vm0 = vcmp.lt.f32.partialorder %v5981_v61, 1.0 }
 0x856   : > { %6901 = vst [vmem:[#allocation94_spill] sm:$0xff] %v5961_v20  ;;  %vm2533_vm14 = vcmp.eq.f32.partialorder %v5866_v45, %v5961_v20  ;;  %6911 = vst [vmem:[#allocation91_spill] sm:$0xff] %v5987_v2  ;;  %v1375_v17 = vadd.f32 1.0, %v6927_v27  ;;  %v6933_v40 = vld [vmem:[#allocation73_spill] sm:$0xff] }
 0x857   : > { %v2534_v29 = vsel %vm2533_vm14, %v2529_v37, inf  ;;  %v5993_v37 = vmul.f32 0.7, %v6913_v26  ;;  %6918 = vst [vmem:[#allocation81_spill] sm:$0xff] %v6008_v41  ;;  %6924 = vst [vmem:[#allocation74_spill] sm:$0xff] %v6027_v21  ;;  %v1374_v44 = vadd.f32 1.0, %v6933_v40  ;;  %v1771_v52 = vadd.f32 %v6935_v36, %v1371_v55 }
 0x858   : > { %2521 = vmin.xlane.f32.xlu0 %v2520_v28  ;;  %2535 = vmin.xlane.f32.xlu1 %v2534_v29  ;;  %v6914_v28 = vld [vmem:[#allocation19_spill] sm:$0xff]  ;;  %v6939_v41 = vld [vmem:[#allocation104_spill] sm:$0xff]  ;;  %v6940_v2 = vld [vmem:[#allocation105_spill] sm:$0xff]  ;;  %vm2667_vm14 = vcmp.lt.f32.partialorder %v5984_v49, 1.0 }
 0x859   : > { %v5996_v29 = vmul.f32 0.7, %v6914_v28  ;;  %v6929_v28 = vld [vmem:[#allocation68_spill] sm:$0xff]  ;;  %v6938_v21 = vld [vmem:[#allocation103_spill] sm:$0xff]  ;;  %v6943_v55 = vld [vmem:[#allocation109_spill] sm:$0xff] }
 0x85a   : > { %v1379_v42 = vadd.f32 1.0, %v6929_v28  ;;  %v1775_v28 = vadd.f32 %v6937_v4, %v1375_v17  ;;  %v6941_v40 = vld [vmem:[#allocation107_spill] sm:$0xff]  ;;  %v1774_v36 = vadd.f32 %v6943_v55, %v1374_v44  ;;  %v6053_v17 = vpop.permute.xlu1 %2803  ;;  %v6949_v44 = vld [vmem:[#allocation116_spill] sm:$0xff] }
 0x85c   : > { %2549 = vmin.xlane.f32.xlu0 %v2548_v35  ;;  %v6002_v35 = vmul.f32 0.7, %v6853_v30  ;;  %v1369_v30 = vadd.f32 1.0, %v6923_v34 }
 0x85e   : > { %6916 = vst [vmem:[#allocation21_spill] sm:$0xff] %v6002_v35  ;;  %v1769_v32 = vadd.f32 %v6934_v63, %v1369_v30  ;;  %v2357_v35 = vshll.u32 %v2356_v7, 16  ;;  %v6942_v30 = vld [vmem:[#allocation108_spill] sm:$0xff]  ;;  %v6947_v7 = vld [vmem:[#allocation49_spill] sm:$0xff] }
 0x872   : > { %2805 = vrot.lane.b32.xlu0 %v773_v62, %s3283_s14  ;;  %v6011_v62 = vmul.f32 0.7, %v6919_v9  ;;  %v6930_v9 = vld [vmem:[#allocation69_spill] sm:$0xff] }
 0x873   : > { %v1370_v34 = vadd.f32 1.0, %v6930_v9 }
 0x874   : > { %6920 = vst [vmem:[#allocation70_spill] sm:$0xff] %v6011_v62  ;;  %v6945_v62 = vld [vmem:[#allocation97_spill] sm:$0xff] }
 0x875   : > { %v1770_v20 = vadd.f32 %v6940_v2, %v1370_v34  ;;  %v2171_v4 = vadd.f32 %v6945_v62, %v1771_v52  ;;  %v2370_v34 = vcvt.f32.s32 %v5901_v43  ;;  %v6950_v52 = vld [vmem:[#allocation115_spill] sm:$0xff] }
 0x888   : > { %v5972_v45 = vpop.xlane.xlu0 %2559 }
 0x889   : > { %6905 = vst [vmem:[#allocation10_spill] sm:$0xff] %v5972_v45  ;;  %vm2561_vm15 = vcmp.eq.f32.partialorder %v5881_v24, %v5972_v45  ;;  %v6912_v24 = vld [vmem:[#allocation13_spill] sm:$0xff]  ;;  %v6932_v45 = vld [vmem:[#allocation72_spill] sm:$0xff] }
 0x88a   : > { %v2562_v46 = vsel %vm2561_vm15, %v2557_v15, inf  ;;  %v5990_v8 = vmul.f32 0.7, %v6912_v24  ;;  %v6928_v24 = vld [vmem:[#allocation66_spill] sm:$0xff] }
 0x88b   : > { %2563 = vmin.xlane.f32.xlu1 %v2562_v46  ;;  %v6024_v46 = vmul.f32 0.7, %v6792_v23  ;;  %v1377_v26 = vadd.f32 1.0, %v6928_v24  ;;  %v1372_v23 = vadd.f32 1.0, %v6931_v50 }
 0x88c   : > { %v6016_v15 = vpop.permute.xlu0 %2801  ;;  %vm2666_vm4 = vcmp.lt.f32.partialorder %v5990_v8, 1.0 }
 0x88d   : > { %6922 = vst [vmem:[#allocation117_spill] sm:$0xff] %v6016_v15  ;;  %v1383_v15 = vadd.f32 1.0, %v6932_v45  ;;  %v1777_v9 = vadd.f32 %v6938_v21, %v1377_v26  ;;  %v1779_v45 = vadd.f32 %v6939_v41, %v1379_v42  ;;  %v1772_v5 = vadd.f32 %v6941_v40, %v1372_v23  ;;  %v6946_v21 = vld [vmem:[#allocation43_spill] sm:$0xff] }
 0x88e   : > { %v2175_v26 = vadd.f32 %v6947_v7, %v1775_v28  ;;  %v2170_v23 = vadd.f32 %v6949_v44, %v1770_v20  ;;  %v2384_v20 = vcvt.f32.s32 %v5908_v60 }
 0x88f   : > { %v1783_v63 = vadd.f32 %v6942_v30, %v1383_v15  ;;  %v6948_v15 = vld [vmem:[#allocation64_spill] sm:$0xff]  ;;  %v2179_v62 = vadd.f32 %v6950_v52, %v1779_v45  ;;  %v2371_v45 = vshll.u32 %v2370_v34, 16 }
 0x890   : > { %v2177_v42 = vadd.f32 %v6948_v15, %v1777_v9  ;;  %v2570_v43 = vadd.f32 %v5739_v59, %v2170_v23  ;;  %v6953_v30 = vld [vmem:[#allocation120_spill] sm:$0xff]  ;;  %v2468_v15 = vcvt.f32.s32 %v5918_v53  ;;  %v2524_v53 = vcvt.f32.s32 %v5946_v31 }
 0x891   : > { %v2174_v55 = vadd.f32 %v6953_v30, %v1774_v36  ;;  %v6092_v60 = vadd.f32 %v5725_v16, %v2179_v62 }
 0x892   : > { %v6089_v59 = vadd.f32 %v5711_v57, %v2177_v42  ;;  %vm2682_vm10 = vcmp.gt.f32.partialorder %v2570_v43, %v5990_v8  ;;  %v2398_v57 = vcvt.f32.s32 %v5914_v56  ;;  %v2412_v56 = vcvt.f32.s32 %v5898_v12  ;;  %v6960_v8 = vld [vmem:[#allocation62_spill] sm:$0xff] }
 0x893   : > { %v2426_v12 = vcvt.f32.s32 %v5924_v48 }
 0x894   : > { %v2399_v42 = vshll.u32 %v2398_v57, 16  ;;  %v6961_v57 = vld [vmem:[#allocation59_spill] sm:$0xff] }
 0x89c   : > { %2807 = vrot.lane.b32.xlu1 %v774_v22, %s3283_s14  ;;  %v1373_v22 = vadd.f32 1.0, %v6926_v10  ;;  %v6936_v10 = vld [vmem:[#allocation101_spill] sm:$0xff] }
 0x89e   : > { %v1773_v27 = vadd.f32 %v6936_v10, %v1373_v22  ;;  %v6944_v22 = vld [vmem:[#allocation95_spill] sm:$0xff] }
 0x89f   : > { %v2169_v10 = vadd.f32 %v6944_v22, %v1769_v32  ;;  %v6078_v22 = vadd.f32 %v5692_v6, %v2171_v4 }
 0x8a0   : > { %v2173_v2 = vadd.f32 %v6946_v21, %v1773_v27 }
 0x8a1   : > { %v2569_v32 = vadd.f32 %v5690_v54, %v2169_v10  ;;  %vm2683_vm12 = vcmp.gt.f32.partialorder %v6078_v22, %v5984_v49  ;;  %v2482_v22 = vcvt.f32.s32 %v5942_v58  ;;  %v6963_v49 = vld [vmem:[#allocation29_spill] sm:$0xff] }
 0x8a3   : > { %vm2681_vm3 = vcmp.gt.f32.partialorder %v2569_v32, %v5981_v61  ;;  %v2454_v32 = vcvt.f32.s32 %v5934_v38  ;;  %v6959_v38 = vld [vmem:[#allocation56_spill] sm:$0xff] }
 0x8bd   : > { %v2354_v24 = vpop.xlane.xlu0 %2353 }
 0x8be   : > { %v2355_v50 = vcvt.f32.s32 %v2354_v24 }
 0x8c0   : > { %v2358_v41 = vadd.s32 %v2357_v35, %v2355_v50  ;;  %v6951_v35 = vld [vmem:[#allocation118_spill] sm:$0xff]  ;;  %v6952_v50 = vld [vmem:[#allocation119_spill] sm:$0xff] }
 0x8c1   : > { %v2172_v24 = vadd.f32 %v6951_v35, %v1772_v5  ;;  %v2183_v9 = vadd.f32 %v6952_v50, %v1783_v63  ;;  %v6954_v63 = vld [vmem:[#allocation46_spill] sm:$0xff]  ;;  %v6142_v35 = vshll.u32 %v2468_v15, 16 }
 0x8c2   : > { %vm2585_vm1 = vcmp.lt.s32.totalorder %v5464_v11, %v2358_v41  ;;  %vm2617_vm2 = vcmp.gt.s32.totalorder %v5467_v19, %v2358_v41 }
 0x8c3   : > { %v2586_v27 = vsel %vm2585_vm1, %v5464_v11, %v2358_v41  ;;  %v2618_v28 = vsel %vm2617_vm2, %v5467_v19, %v2358_v41  ;;  %v6082_v11 = vadd.f32 %v5696_v47, %v2173_v2  ;;  %v6085_v19 = vadd.f32 %v5703_v3, %v2175_v26  ;;  %v6955_v41 = vld [vmem:[#allocation9_spill] sm:$0xff] }
 0x8c4   : > { %v2697_v54 = vsub.s32 %v2618_v28, %v2586_v27  ;;  %v6101_v47 = vadd.f32 %v5760_v39, %v2172_v24  ;;  %v2385_v3 = vshll.u32 %v2384_v20, 16  ;;  %v6113_v39 = vadd.f32 %v5768_v25, %v2183_v9  ;;  %v6958_v27 = vld [vmem:[#allocation42_spill] sm:$0xff] }
 0x8c5   : > { %v2368_v40 = vpop.xlane.xlu1 %2367  ;;  %v6121_v21 = vadd.f32 %v6955_v41, %v2174_v55  ;;  %v2440_v2 = vcvt.f32.s32 %v5906_v14  ;;  %v2496_v25 = vcvt.f32.s32 %v5932_v33  ;;  %vm2668_vm2 = vcmp.lt.f32.partialorder %v5996_v29, 1.0  ;;  %v6965_v41 = vld [vmem:[#allocation41_spill] sm:$0xff] }
 0x8c6   : > { %v2369_v5 = vcvt.f32.s32 %v2368_v40  ;;  %vm2713_vm5 = vcmp.lt.s32.totalorder %v2697_v54, 6  ;;  %vm2684_vm8 = vcmp.gt.f32.partialorder %v6101_v47, %v5996_v29  ;;  %v2413_v14 = vshll.u32 %v2412_v56, 16  ;;  %v6962_v56 = vld [vmem:[#allocation88_spill] sm:$0xff]  ;;  %v6967_v47 = vld [vmem:[#allocation70_spill] sm:$0xff] }
 0x8c7   : > { %vm2729_vm9 = vmand %vm2681_vm3, %vm2713_vm5  ;;  %v6137_v23 = vshll.u32 %v2440_v2, 16  ;;  %v6144_v31 = vshll.u32 %v2496_v25, 16  ;;  %v2427_v24 = vshll.u32 %v2426_v12, 16  ;;  %v6154_v20 = vshll.u32 %v2524_v53, 16  ;;  %v6966_v2 = vld [vmem:[#allocation14_spill] sm:$0xff] }
 0x8c8   : > { %v2372_v6 = vadd.s32 %v2371_v45, %v2369_v5  ;;  %vm2745_vm11 = vmor %vm2665_vm0, %vm2729_vm9  ;;  %vm2686_vm9 = vcmp.gt.f32.partialorder %v6121_v21, %v6005_v13  ;;  %v2552_v55 = vcvt.f32.s32 %v5959_v0  ;;  %v2455_v45 = vshll.u32 %v2454_v32, 16  ;;  %v6968_v12 = vld [vmem:[#allocation114_spill] sm:$0xff]  ;;  %v6972_v32 = vld [vmem:[#allocation92_spill] sm:$0xff] }
 0x8c9   : > { %v2382_v16 = vpop.xlane.xlu0 %2381  ;;  %v2825_v36 = vsel %vm2745_vm11, %v6954_v63, 0.0  ;;  %v6969_v29 = vld [vmem:[#allocation34_spill] sm:$0xff] }
 0x8ca   : > { %vm2587_vm7 = vcmp.lt.s32.totalorder %v5553_v18, %v2372_v6  ;;  %vm2619_vm13 = vcmp.gt.s32.totalorder %v5560_v1, %v2372_v6  ;;  %v2383_v10 = vcvt.f32.s32 %v2382_v16  ;;  %2842 = vst.msk [vmem:[%s6097_s8] sm:$0xff] %vm2841_vm6, %v2825_v36  ;;  %v6970_v53 = vld [vmem:[#allocation38_spill] sm:$0xff] }
 0x8cb   : > { %v2588_v61 = vsel %vm2587_vm7, %v5553_v18, %v2372_v6  ;;  %v2620_v4 = vsel %vm2619_vm13, %v5560_v1, %v2372_v6  ;;  %v6956_v18 = vld [vmem:[#allocation24_spill] sm:$0xff]  ;;  %v6957_v1 = vld [vmem:[#allocation67_spill] sm:$0xff]  ;;  %vm2670_vm7 = vcmp.lt.f32.partialorder %v6005_v13, 1.0 }
 0x8cc   : > { %v2698_v7 = vsub.s32 %v2620_v4, %v2588_v61  ;;  %v2386_v26 = vadd.s32 %v2385_v3, %v2383_v10  ;;  %v2510_v3 = vcvt.f32.s32 %v5952_v51  ;;  %v6964_v61 = vld [vmem:[#allocation31_spill] sm:$0xff] }
 0x8cd   : > { %v2396_v34 = vpop.xlane.xlu0 %2395  ;;  %v6977_v13 = vld [vmem:[#allocation91_spill] sm:$0xff] }
 0x8ce   : > { %vm2714_vm15 = vcmp.lt.s32.totalorder %v2698_v7, 6  ;;  %vm2589_vm0 = vcmp.lt.s32.totalorder %v6956_v18, %v2386_v26  ;;  %vm2621_vm1 = vcmp.gt.s32.totalorder %v6957_v1, %v2386_v26  ;;  %v2397_v44 = vcvt.f32.s32 %v2396_v34 }
 0x8cf   : > { %vm2730_vm3 = vmand %vm2682_vm10, %vm2714_vm15  ;;  %v2590_v48 = vsel %vm2589_vm0, %v6956_v18, %v2386_v26  ;;  %v2622_v33 = vsel %vm2621_vm1, %v6957_v1, %v2386_v26  ;;  %vm2685_vm15 = vcmp.gt.f32.partialorder %v6082_v11, %v5993_v37  ;;  %vm2669_vm1 = vcmp.lt.f32.partialorder %v5993_v37, 1.0  ;;  %v6980_v37 = vld [vmem:[#allocation36_spill] sm:$0xff] }
 0x8d0   : > { %vm2746_vm5 = vmor %vm2666_vm4, %vm2730_vm3  ;;  %v2699_v52 = vsub.s32 %v2622_v33, %v2590_v48  ;;  %v2400_v62 = vadd.s32 %v2399_v42, %v2397_v44  ;;  %v2483_v42 = vshll.u32 %v2482_v22, 16  ;;  %v6971_v33 = vld [vmem:[#allocation47_spill] sm:$0xff] }
 0x8d1   : > { %v2826_v28 = vsel %vm2746_vm5, %v6958_v27, 0.0  ;;  %v2424_v50 = vpop.xlane.xlu1 %2423  ;;  %v2410_v9 = vpop.xlane.xlu0 %2409  ;;  %v2511_v27 = vshll.u32 %v2510_v3, 16 }
 0x8d2   : > { %2843 = vst.msk [vmem:[%s6097_s8 + $0x8] sm:$0xff] %vm2841_vm6, %v2826_v28  ;;  %vm2715_vm10 = vcmp.lt.s32.totalorder %v2699_v52, 6  ;;  %vm2591_vm11 = vcmp.lt.s32.totalorder %v6959_v38, %v2400_v62  ;;  %vm2623_vm4 = vcmp.gt.s32.totalorder %v6960_v8, %v2400_v62  ;;  %v2425_v43 = vcvt.f32.s32 %v2424_v50 }
 0x8d3   : > { %vm2731_vm13 = vmand %vm2683_vm12, %vm2715_vm10  ;;  %v2592_v54 = vsel %vm2591_vm11, %v6959_v38, %v2400_v62  ;;  %v2624_v40 = vsel %vm2623_vm4, %v6960_v8, %v2400_v62  ;;  %v2411_v30 = vcvt.f32.s32 %v2410_v9  ;;  %vm2688_vm12 = vcmp.gt.f32.partialorder %v6962_v56, %v6024_v46  ;;  %v6973_v38 = vld [vmem:[#allocation94_spill] sm:$0xff] }
 0x8d4   : > { %vm2747_vm0 = vmor %vm2667_vm14, %vm2731_vm13  ;;  %v2700_v5 = vsub.s32 %v2624_v40, %v2592_v54  ;;  %v2428_v6 = vadd.s32 %v2427_v24, %v2425_v43  ;;  %vm2672_vm10 = vcmp.lt.f32.partialorder %v6024_v46, 1.0  ;;  %v2538_v21 = vcvt.f32.s32 %v6973_v38  ;;  %v6974_v8 = vld [vmem:[#allocation58_spill] sm:$0xff]  ;;  %v6975_v54 = vld [vmem:[#allocation80_spill] sm:$0xff] }
 0x8d5   : > { %v2827_v16 = vsel %vm2747_vm0, %v6961_v57, 0.0  ;;  %v2414_v63 = vadd.s32 %v2413_v14, %v2411_v30  ;;  %v2452_v36 = vpop.xlane.xlu1 %2451  ;;  %v2438_v10 = vpop.xlane.xlu0 %2437  ;;  %v6985_v46 = vld [vmem:[#allocation78_spill] sm:$0xff]  ;;  %v2553_v38 = vshll.u32 %v2552_v55, 16 }
 0x8d6   : > { %2844 = vst.msk [vmem:[%s6097_s8 + $0x10] sm:$0xff] %vm2841_vm6, %v2827_v16  ;;  %vm2716_vm3 = vcmp.lt.s32.totalorder %v2700_v5, 6  ;;  %vm2595_vm14 = vcmp.lt.s32.totalorder %v6963_v49, %v2428_v6  ;;  %vm2627_vm5 = vcmp.gt.s32.totalorder %v6964_v61, %v2428_v6  ;;  %v2453_v4 = vcvt.f32.s32 %v2452_v36  ;;  %v6978_v5 = vld [vmem:[#allocation37_spill] sm:$0xff] }
 0x8d7   : > { %vm2732_vm11 = vmand %vm2684_vm8, %vm2716_vm3  ;;  %v2596_v58 = vsel %vm2595_vm14, %v6963_v49, %v2428_v6  ;;  %v2628_v51 = vsel %vm2627_vm5, %v6964_v61, %v2428_v6  ;;  %vm2593_vm4 = vcmp.lt.s32.totalorder %v6965_v41, %v2414_v63  ;;  %vm2625_vm13 = vcmp.gt.s32.totalorder %v6966_v2, %v2414_v63  ;;  %v6979_v6 = vld [vmem:[#allocation93_spill] sm:$0xff] }
 0x8d8   : > { %vm2748_vm0 = vmor %vm2668_vm2, %vm2732_vm11  ;;  %v2702_v7 = vsub.s32 %v2628_v51, %v2596_v58  ;;  %v2594_v26 = vsel %vm2593_vm4, %v6965_v41, %v2414_v63  ;;  %v2626_v15 = vsel %vm2625_vm13, %v6966_v2, %v2414_v63  ;;  %v2456_v25 = vadd.s32 %v2455_v45, %v2453_v4  ;;  %v6981_v16 = vld [vmem:[#allocation81_spill] sm:$0xff]  ;;  %v6982_v63 = vld [vmem:[#allocation39_spill] sm:$0xff] }
 0x8d9   : > { %vm2687_vm8 = vcmp.gt.f32.partialorder %v6085_v19, %v6967_v47  ;;  %v2828_v34 = vsel %vm2748_vm0, %v6968_v12, 0.0  ;;  %v2701_v18 = vsub.s32 %v2626_v15, %v2594_v26  ;;  %v2439_v1 = vcvt.f32.s32 %v2438_v10  ;;  %v2480_v44 = vpop.xlane.xlu1 %2479  ;;  %v2466_v14 = vpop.xlane.xlu0 %2465  ;;  %v6983_v4 = vld [vmem:[#allocation15_spill] sm:$0xff] }
 0x8da   : > { %2845 = vst.msk [vmem:[%s6097_s8 + $0x18] sm:$0xff] %vm2841_vm6, %v2828_v34  ;;  %vm2718_vm2 = vcmp.lt.s32.totalorder %v2702_v7, 6  ;;  %vm2599_vm14 = vcmp.lt.s32.totalorder %v6969_v29, %v2456_v25  ;;  %vm2631_vm5 = vcmp.gt.s32.totalorder %v6970_v53, %v2456_v25  ;;  %v2481_v48 = vcvt.f32.s32 %v2480_v44  ;;  %v6984_v7 = vld [vmem:[#allocation21_spill] sm:$0xff]  ;;  %v6988_v12 = vld [vmem:[#allocation55_spill] sm:$0xff] }
 0x8db   : > { %vm2690_vm11 = vcmp.gt.f32.partialorder %v6972_v32, %v6971_v33  ;;  %vm2734_vm4 = vmand %vm2686_vm9, %vm2718_vm2  ;;  %vm2717_vm13 = vcmp.lt.s32.totalorder %v2701_v18, 6  ;;  %v2600_v52 = vsel %vm2599_vm14, %v6969_v29, %v2456_v25  ;;  %v2632_v62 = vsel %vm2631_vm5, %v6970_v53, %v2456_v25  ;;  %v6992_v29 = vld [vmem:[#allocation127_spill] sm:$0xff] }
 0x8dc   : > { %v2442_v24 = vadd.s32 %v6137_v23, %v2439_v1  ;;  %vm2674_vm0 = vcmp.lt.f32.partialorder %v6971_v33, 1.0  ;;  %vm2750_vm3 = vmor %vm2670_vm7, %vm2734_vm4  ;;  %v2704_v28 = vsub.s32 %v2632_v62, %v2600_v52  ;;  %v2484_v50 = vadd.s32 %v2483_v42, %v2481_v48  ;;  %v6976_v23 = vld [vmem:[#allocation40_spill] sm:$0xff]  ;;  %v6990_v1 = vld [vmem:[#allocation33_spill] sm:$0xff] }
 0x8dd   : > { %v2467_v9 = vcvt.f32.s32 %v2466_v14  ;;  %v2830_v43 = vsel %vm2750_vm3, %v6974_v8, 0.0  ;;  %vm2733_vm9 = vmand %vm2685_vm15, %vm2717_vm13  ;;  %v2508_v40 = vpop.xlane.xlu1 %2507  ;;  %v2494_v30 = vpop.xlane.xlu0 %2493  ;;  %vm2689_vm7 = vcmp.gt.f32.partialorder %v6089_v59, %v6977_v13  ;;  %vm2673_vm4 = vcmp.lt.f32.partialorder %v6977_v13, 1.0  ;;  %v6991_v14 = vld [vmem:[#allocation126_spill] sm:$0xff]  ;;  %v6993_v48 = vld [vmem:[#allocation85_spill] sm:$0xff] }
 0x8de   : > { %vm2597_vm2 = vcmp.lt.s32.totalorder %v6975_v54, %v2442_v24  ;;  %vm2629_vm14 = vcmp.gt.s32.totalorder %v6976_v23, %v2442_v24  ;;  %2847 = vst.msk [vmem:[%s6097_s8 + $0x28] sm:$0xff] %vm2841_vm6, %v2830_v43  ;;  %vm2749_vm5 = vmor %vm2669_vm1, %vm2733_vm9  ;;  %vm2720_vm3 = vcmp.lt.s32.totalorder %v2704_v28, 6  ;;  %vm2603_vm15 = vcmp.lt.s32.totalorder %v6978_v5, %v2484_v50  ;;  %v6996_v8 = vld [vmem:[#allocation87_spill] sm:$0xff] }
 0x8df   : > { %v2598_v45 = vsel %vm2597_vm2, %v6975_v54, %v2442_v24  ;;  %v2630_v11 = vsel %vm2629_vm14, %v6976_v23, %v2442_v24  ;;  %v2829_v22 = vsel %vm2749_vm5, %v6979_v6, 0.0  ;;  %vm2736_vm13 = vmand %vm2688_vm12, %vm2720_vm3  ;;  %v2604_v57 = vsel %vm2603_vm15, %v6978_v5, %v2484_v50  ;;  %v6997_v43 = vld [vmem:[#allocation83_spill] sm:$0xff]  ;;  %v6998_v54 = vld [vmem:[#allocation84_spill] sm:$0xff] }
 0x8e0   : > { %v2703_v3 = vsub.s32 %v2630_v11, %v2598_v45  ;;  %vm2635_vm1 = vcmp.gt.s32.totalorder %v6980_v37, %v2484_v50  ;;  %vm2692_vm9 = vcmp.gt.f32.partialorder %v6982_v63, %v6981_v16  ;;  %2846 = vst.msk [vmem:[%s6097_s8 + $0x20] sm:$0xff] %vm2841_vm6, %v2829_v22  ;;  %vm2752_vm2 = vmor %vm2672_vm10, %vm2736_vm13  ;;  %v2470_v10 = vadd.s32 %v6142_v35, %v2467_v9  ;;  %v6986_v35 = vld [vmem:[#allocation125_spill] sm:$0xff]  ;;  %v6995_v9 = vld [vmem:[#allocation44_spill] sm:$0xff] }
 0x8e1   : > { %v2636_v36 = vsel %vm2635_vm1, %v6980_v37, %v2484_v50  ;;  %v2509_v56 = vcvt.f32.s32 %v2508_v40  ;;  %v2495_v49 = vcvt.f32.s32 %v2494_v30  ;;  %vm2676_vm12 = vcmp.lt.f32.partialorder %v6981_v16, 1.0  ;;  %v2536_v41 = vpop.xlane.xlu1 %2535  ;;  %v2522_v2 = vpop.xlane.xlu0 %2521  ;;  %v6994_v50 = vld [vmem:[#allocation74_spill] sm:$0xff]  ;;  %v6999_v30 = vld [vmem:[#allocation89_spill] sm:$0xff]  ;;  %v7004_v22 = vld [vmem:[#allocation32_spill] sm:$0xff] }
 0x8e2   : > { %v2539_v61 = vshll.u32 %v2538_v21, 16  ;;  %v2832_v58 = vsel %vm2752_vm2, %v6983_v4, 0.0  ;;  %vm2719_vm14 = vcmp.lt.s32.totalorder %v2703_v3, 6  ;;  %v2706_v51 = vsub.s32 %v2636_v36, %v2604_v57  ;;  %v7002_v11 = vld [vmem:[#allocation30_spill] sm:$0xff]  ;;  %v7005_v3 = vld [vmem:[#allocation28_spill] sm:$0xff] }
 0x8e3   : > { %2849 = vst.msk [vmem:[%s6097_s8 + $0x38] sm:$0xff] %vm2841_vm6, %v2832_v58  ;;  %vm2735_vm10 = vmand %vm2687_vm8, %vm2719_vm14  ;;  %vm2601_vm3 = vcmp.lt.s32.totalorder %v6985_v46, %v2470_v10  ;;  %vm2633_vm15 = vcmp.gt.s32.totalorder %v6986_v35, %v2470_v10  ;;  %v2512_v26 = vadd.s32 %v2511_v27, %v2509_v56  ;;  %v2498_v15 = vadd.s32 %v6144_v31, %v2495_v49  ;;  %v6989_v31 = vld [vmem:[#allocation35_spill] sm:$0xff]  ;;  %v7007_v36 = vld [vmem:[#allocation26_spill] sm:$0xff] }
 0x8e4   : > { %vm6987_vm1 = vcmp.lt.f32.partialorder %v6967_v47, 1.0  ;;  %vm2722_vm5 = vcmp.lt.s32.totalorder %v2706_v51, 6  ;;  %v2602_v25 = vsel %vm2601_vm3, %v6985_v46, %v2470_v10  ;;  %v2634_v42 = vsel %vm2633_vm15, %v6986_v35, %v2470_v10  ;;  %v7008_v56 = vld [vmem:[#allocation106_spill] sm:$0xff]  ;;  %v7010_v58 = vld [vmem:[#allocation117_spill] sm:$0xff] }
 0x8e5   : > { %vm2751_vm2 = vmor %vm6987_vm1, %vm2735_vm10  ;;  %v2537_v19 = vcvt.f32.s32 %v2536_v41  ;;  %v2705_v18 = vsub.s32 %v2634_v42, %v2602_v25  ;;  %vm2607_vm14 = vcmp.lt.s32.totalorder %v6989_v31, %v2512_v26  ;;  %vm2639_vm13 = vcmp.gt.s32.totalorder %v6990_v1, %v2512_v26  ;;  %v2550_v53 = vpop.xlane.xlu0 %2549  ;;  %v7009_v49 = vld [vmem:[#allocation90_spill] sm:$0xff] }
 0x8e6   : > { %v2831_v34 = vsel %vm2751_vm2, %v6988_v12, 0.0  ;;  %vm2738_vm8 = vmand %vm2690_vm11, %vm2722_vm5  ;;  %v2608_v47 = vsel %vm2607_vm14, %v6989_v31, %v2512_v26  ;;  %v2640_v44 = vsel %vm2639_vm13, %v6990_v1, %v2512_v26  ;;  %vm2605_vm3 = vcmp.lt.s32.totalorder %v6991_v14, %v2498_v15  ;;  %v7013_v25 = vld [vmem:[#allocation86_spill] sm:$0xff]  ;;  %v7014_v12 = vld [vmem:[#allocation27_spill] sm:$0xff] }
 0x8e7   : > { %2848 = vst.msk [vmem:[%s6097_s8 + $0x30] sm:$0xff] %vm2841_vm6, %v2831_v34  ;;  %vm2754_vm10 = vmor %vm2674_vm0, %vm2738_vm8  ;;  %vm2637_vm15 = vcmp.gt.s32.totalorder %v6992_v29, %v2498_v15  ;;  %vm2721_vm11 = vcmp.lt.s32.totalorder %v2705_v18, 6  ;;  %v2708_v52 = vsub.s32 %v2640_v44, %v2608_v47  ;;  %v2606_v62 = vsel %vm2605_vm3, %v6991_v14, %v2498_v15  ;;  %v7015_v31 = vld [vmem:[#allocation18_spill] sm:$0xff] }
 0x8e8   : > { %v2834_v32 = vsel %vm2754_vm10, %v6993_v48, 0.0  ;;  %vm2737_vm0 = vmand %vm2689_vm7, %vm2721_vm11  ;;  %v2638_v33 = vsel %vm2637_vm15, %v6992_v29, %v2498_v15  ;;  %v2540_v24 = vadd.s32 %v2539_v61, %v2537_v19  ;;  %v2523_v27 = vcvt.f32.s32 %v2522_v2 }
 0x8e9   : > { %2851 = vst.msk [vmem:[%s6097_s8 + $0x48] sm:$0xff] %vm2841_vm6, %v2834_v32  ;;  %v2551_v28 = vcvt.f32.s32 %v2550_v53  ;;  %vm2694_vm5 = vcmp.gt.f32.partialorder %v6995_v9, %v6994_v50  ;;  %vm2753_vm13 = vmor %vm2673_vm4, %vm2737_vm0  ;;  %vm2724_vm1 = vcmp.lt.s32.totalorder %v2708_v52, 6  ;;  %v2707_v21 = vsub.s32 %v2638_v33, %v2606_v62  ;;  %v2806_v41 = vpop.permute.xlu0 %2805 }
 0x8ea   : > { %v2833_v59 = vsel %vm2753_vm13, %v6996_v8, 0.0  ;;  %vm2740_vm7 = vmand %vm2692_vm9, %vm2724_vm1  ;;  %vm2611_vm2 = vcmp.lt.s32.totalorder %v6997_v43, %v2540_v24  ;;  %vm2643_vm8 = vcmp.gt.s32.totalorder %v6998_v54, %v2540_v24  ;;  %v2526_v23 = vadd.s32 %v6154_v20, %v2523_v27  ;;  %v7001_v20 = vld [vmem:[#allocation45_spill] sm:$0xff] }
 0x8eb   : > { %2850 = vst.msk [vmem:[%s6097_s8 + $0x40] sm:$0xff] %vm2841_vm6, %v2833_v59  ;;  %vm2756_vm4 = vmor %vm2676_vm12, %vm2740_vm7  ;;  %vm2723_vm14 = vcmp.lt.s32.totalorder %v2707_v21, 6  ;;  %v2612_v0 = vsel %vm2611_vm2, %v6997_v43, %v2540_v24  ;;  %v2644_v55 = vsel %vm2643_vm8, %v6998_v54, %v2540_v24  ;;  %v2554_v40 = vadd.s32 %v2553_v38, %v2551_v28 }
 0x8ec   : > { %v2836_v13 = vsel %vm2756_vm4, %v6999_v30, 0.0  ;;  %vm7000_vm9 = vcmp.gt.f32.partialorder %v6092_v60, %v6984_v7  ;;  %v2710_v45 = vsub.s32 %v2644_v55, %v2612_v0  ;;  %vm2609_vm3 = vcmp.lt.s32.totalorder %v7001_v20, %v2526_v23  ;;  %v7006_v60 = vld [vmem:[#allocation82_spill] sm:$0xff] }
 0x8ed   : > { %vm2739_vm10 = vmand %vm7000_vm9, %vm2723_vm14  ;;  %vm2641_vm15 = vcmp.gt.s32.totalorder %v7002_v11, %v2526_v23  ;;  %2853 = vst.msk [vmem:[%s6097_s8 + $0x58] sm:$0xff] %vm2841_vm6, %v2836_v13  ;;  %vm7003_vm12 = vcmp.lt.f32.partialorder %v6984_v7, 1.0  ;;  %v2610_v5 = vsel %vm2609_vm3, %v7001_v20, %v2526_v23  ;;  %vm2613_vm0 = vcmp.lt.s32.totalorder %v7004_v22, %v2554_v40  ;;  %v7011_v7 = vld [vmem:[#allocation10_spill] sm:$0xff] }
 0x8ee   : > { %vm2755_vm11 = vmor %vm7003_vm12, %vm2739_vm10  ;;  %v2642_v6 = vsel %vm2641_vm15, %v7002_v11, %v2526_v23  ;;  %vm2645_vm13 = vcmp.gt.s32.totalorder %v7005_v3, %v2554_v40  ;;  %vm2726_vm1 = vcmp.lt.s32.totalorder %v2710_v45, 6  ;;  %v2614_v16 = vsel %vm2613_vm0, %v7004_v22, %v2554_v40 }
 0x8ef   : > { %v2835_v57 = vsel %vm2755_vm11, %v7006_v60, 0.0  ;;  %v2709_v37 = vsub.s32 %v2642_v6, %v2610_v5  ;;  %vm2678_vm7 = vcmp.lt.f32.partialorder %v6994_v50, 1.0  ;;  %vm2742_vm2 = vmand %vm2694_vm5, %vm2726_vm1  ;;  %v2646_v63 = vsel %vm2645_vm13, %v7005_v3, %v2554_v40 }
 0x8f0   : > { %2852 = vst.msk [vmem:[%s6097_s8 + $0x50] sm:$0xff] %vm2841_vm6, %v2835_v57  ;;  %v2663_v10 = vmul.f32 0.7, %v7007_v36  ;;  %vm2693_vm8 = vcmp.gt.f32.partialorder %v7009_v49, %v7008_v56  ;;  %vm2758_vm4 = vmor %vm2678_vm7, %vm2742_vm2  ;;  %v2711_v61 = vsub.s32 %v2646_v63, %v2614_v16  ;;  %vm2677_vm9 = vcmp.lt.f32.partialorder %v7008_v56, 1.0 }
 0x8f1   : > { %vm2725_vm14 = vcmp.lt.s32.totalorder %v2709_v37, 6  ;;  %v2838_v4 = vsel %vm2758_vm4, %v6053_v17, 0.0  ;;  %v2566_v17 = vcvt.f32.s32 %v7011_v7  ;;  %v2664_v34 = vmul.f32 0.7, %v7014_v12 }
 0x8f2   : > { %vm2741_vm10 = vmand %vm2693_vm8, %vm2725_vm14  ;;  %2855 = vst.msk [vmem:[%s6097_s8 + $0x68] sm:$0xff] %vm2841_vm6, %v2838_v4  ;;  %vm2695_vm3 = vcmp.gt.f32.partialorder %v6113_v39, %v2663_v10  ;;  %vm2727_vm15 = vcmp.lt.s32.totalorder %v2711_v61, 6  ;;  %vm2679_vm12 = vcmp.lt.f32.partialorder %v2663_v10, 1.0  ;;  %v7012_v39 = vld [vmem:[#allocation8_spill] sm:$0xff] }
 0x8f3   : > { %vm2757_vm5 = vmor %vm2677_vm9, %vm2741_vm10  ;;  %v2567_v35 = vshll.u32 %v2566_v17, 16  ;;  %vm2696_vm7 = vcmp.gt.f32.partialorder %v7015_v31, %v2664_v34  ;;  %vm2680_vm8 = vcmp.lt.f32.partialorder %v2664_v34, 1.0 }
 0x8f4   : > { %v2837_v51 = vsel %vm2757_vm5, %v7010_v58, 0.0  ;;  %vm2743_vm11 = vmand %vm2695_vm3, %vm2727_vm15 }
 0x8f5   : > { %2854 = vst.msk [vmem:[%s6097_s8 + $0x60] sm:$0xff] %vm2841_vm6, %v2837_v51  ;;  %vm2759_vm0 = vmor %vm2679_vm12, %vm2743_vm11 }
 0x8f6   : > { %v2839_v2 = vsel %vm2759_vm0, %v2806_v41, 0.0 }
 0x8f7   : > { %2856 = vst.msk [vmem:[%s6097_s8 + $0x70] sm:$0xff] %vm2841_vm6, %v2839_v2 }
 0x914   : > { %v2564_v46 = vpop.xlane.xlu1 %2563 }
 0x915   : > { %v2565_v26 = vcvt.f32.s32 %v2564_v46 }
 0x917   : > { %v2568_v15 = vadd.s32 %v2567_v35, %v2565_v26 }
 0x918   : > { %v2808_v1 = vpop.permute.xlu1 %2807 }
 0x919   : > { %vm2615_vm13 = vcmp.lt.s32.totalorder %v7012_v39, %v2568_v15  ;;  %vm2647_vm1 = vcmp.gt.s32.totalorder %v7013_v25, %v2568_v15 }
 0x91a   : > { %v2616_v42 = vsel %vm2615_vm13, %v7012_v39, %v2568_v15  ;;  %v2648_v19 = vsel %vm2647_vm1, %v7013_v25, %v2568_v15 }
 0x91b   : > { %v2712_v18 = vsub.s32 %v2648_v19, %v2616_v42 }
 0x91d   : > { %vm2728_vm2 = vcmp.lt.s32.totalorder %v2712_v18, 6 }
 0x91e   : > { %vm2744_vm4 = vmand %vm2696_vm7, %vm2728_vm2 }
 0x91f   : > { %vm2760_vm14 = vmor %vm2680_vm8, %vm2744_vm4 }
 0x920   : > { %v2840_v47 = vsel %vm2760_vm14, %v2808_v1, 0.0 }
 0x921   : > { %2857 = vst.msk [vmem:[%s6097_s8 + $0x78] sm:$0xff] %vm2841_vm6, %v2840_v47 }
 0x922 PF: > { %p13_p7 = scmp.ge.s32.totalorder %s3347_s20, 4   ;;  %s7016_s9 = smov %s3267_s10 }
 0x923   : > { %s7017_s10 = smov %s3271_s11  ;;  %s7018_s11 = smov %s3364_s28 }
 0x924   : > { %s7019_s12 = smov %s3347_s20  ;;  %15 = sbr.rel (!%p13_p7) target bundleno = 4 (0x4), region = 72 }
 0x929   :  { %2880 = vsyncpa [#allocation3], 1 }
 0x92a   :  { %2882 = vsyncpa [#allocation3 + $0x1], 1 }
 0x92b   :  { %2883 = vsyncpa [#allocation5], 1 }

</bundles_post_ra>
